<compile_context>
chip_gen: v6e
topology: v6e:2x2x1
jax: 0.10.0
libtpu: 0.0.40
codegen_flags: <defaults>
</compile_context>

<pallas_src>
import jax
import jax.numpy as jnp
import numpy as np
from jax.experimental import pallas as pl
from jax.experimental.pallas import tpu as pltpu


# ----------------------------------------------------------------------------
# Model-level constants (from the original module)
# ----------------------------------------------------------------------------
IMG_HW = 64                 # spatial size of img_src / cano_exemplar / img_tar
PRE_HW = 224                # preprocess() target resolution
RENDER_LOWRES = 32          # proxy renderer low-res output
RASTER_SIZE = 224           # int(2 * center) in the original module
N_COEFF = 257               # deep3D 3DMM coefficient vector length
N_COEFF_PAD = 272           # padded to a bf16 sublane multiple (zero pad)
FACE_COLS = 3 * RENDER_LOWRES * RENDER_LOWRES   # 3072
FACE_BLK = 1024             # render_w column block (pipelined grid)
PLANE_COLS = 96 * 16        # 1536 = (expr-plane channel, ox) columns
PLANE_BLK = 512
IMAGE_MEAN = (0.485, 0.456, 0.406)
IMAGE_STD = (0.229, 0.224, 0.225)


# ----------------------------------------------------------------------------
# Host-side helpers (pack-time constants, numpy)
# ----------------------------------------------------------------------------
def _bilinear_matrix(in_size, out_size):
    """Row matrix for F.interpolate(mode='bilinear', align_corners=False)."""
    scale = in_size / out_size
    o = np.arange(out_size)
    src = (o + 0.5) * scale - 0.5
    src = np.clip(src, 0.0, in_size - 1)
    i0 = np.floor(src).astype(np.int64)
    i1 = np.minimum(i0 + 1, in_size - 1)
    w = (src - i0).astype(np.float32)
    R = np.zeros((out_size, in_size), dtype=np.float32)
    R[o, i0] += (1.0 - w)
    R[o, i1] += w
    return R


# ----------------------------------------------------------------------------
# Pallas kernels
# ----------------------------------------------------------------------------
def _face_kernel(imgs_ref, poolw_ref, cw_ref, beff_ref, rw_ref, rb_ref,
                 face_ref):
    """preprocess-mean collapse + recon proxy + coeff splice + render proxy.

    means_p = sum(img_p * poolw) + 0.5   (algebraic collapse of the 224x224
    bilinear resize followed by a global mean; the +0.5 constant is folded
    into `beff`/`cw` at pack time).  row0 is the spliced 257-coeff vector
    (zero-padded to 272).  The render-proxy matmul is blocked over its 3072
    output columns by the grid; the cheap coeff computation is simply redone
    per block so the grid axis stays embarrassingly parallel (megacore-safe).
    """
    raw = jnp.sum(imgs_ref[...] * poolw_ref[...], axis=1, keepdims=True)  # (9,1)
    cw = cw_ref[...]                                                      # (9,272)
    row0 = beff_ref[...]                                                  # (1,272)
    for p in range(9):
        row0 = row0 + raw[p:p + 1, :] * cw[p:p + 1, :]
    # TODO(synk): deep3D facemodel.compute_for_render + nvdiffrast MeshRenderer
    # are replaced by this deterministic linear+sigmoid proxy (bf16 MXU
    # operands, f32 accumulation and f32 sigmoid epilogue).
    logits = jnp.dot(row0.astype(jnp.bfloat16), rw_ref[...],
                     preferred_element_type=jnp.float32) + rb_ref[...]
    face_ref[...] = jax.nn.sigmoid(logits)                                # (1,blk)


def _plane_kernel(fwide_ref, abig_ref, bfold_ref, cwide_ref, out_ref):
    """sudo chain + im2col + patch-embed/encoder/embed2expr matmul chain.

    Everything downstream of the sigmoid is linear, so the resize (32->224->64),
    the *2-1 / (x+1)/2 / mean-std affines, the 7x7 stride-4 im2col gather and
    the three weight matrices are pre-folded (pack time) into:
      abig  (112, 32)        : per-dy row-gather composed with the row resize
      bfold (7, 96, 1536)    : per-dy col-gather x col resize x folded weights
      cwide (16, 1536)       : all additive constants (biases + offset terms)
    Output Z[oy, e*16+ox] is lane-dense (512-wide blocks); the final
    (oy,e,ox)->(e,oy,ox) permutation is one cheap XLA transpose outside.
    """
    v = jnp.dot(abig_ref[...], fwide_ref[...],
                preferred_element_type=jnp.float32)                 # (112, 96)
    vb = v.astype(jnp.bfloat16)
    acc = cwide_ref[...]                                            # (16, blk)
    for dy in range(7):
        acc = acc + jnp.dot(vb[dy * 16:(dy + 1) * 16, :], bfold_ref[dy],
                            preferred_element_type=jnp.float32)
    out_ref[...] = acc


# ----------------------------------------------------------------------------
# Pallas wrappers
# ----------------------------------------------------------------------------
def pallas_face(imgs9, poolw, cw, beff, rw, rb):
    nblk = FACE_COLS // FACE_BLK
    return pl.pallas_call(
        _face_kernel,
        out_shape=jax.ShapeDtypeStruct((1, FACE_COLS), jnp.float32),
        grid=(nblk,),
        in_specs=[
            pl.BlockSpec((9, IMG_HW * IMG_HW), lambda i: (0, 0)),
            pl.BlockSpec((1, IMG_HW * IMG_HW), lambda i: (0, 0)),
            pl.BlockSpec((9, N_COEFF_PAD), lambda i: (0, 0)),
            pl.BlockSpec((1, N_COEFF_PAD), lambda i: (0, 0)),
            pl.BlockSpec((N_COEFF_PAD, FACE_BLK), lambda i: (0, i)),
            pl.BlockSpec((1, FACE_BLK), lambda i: (0, i)),
        ],
        out_specs=pl.BlockSpec((1, FACE_BLK), lambda i: (0, i)),
        compiler_params=pltpu.CompilerParams(
            dimension_semantics=("parallel",)),
    )(imgs9, poolw, cw, beff, rw, rb)


def pallas_plane(fwide, abig, bfold, cwide):
    nblk = PLANE_COLS // PLANE_BLK
    return pl.pallas_call(
        _plane_kernel,
        out_shape=jax.ShapeDtypeStruct((16, PLANE_COLS), jnp.float32),
        grid=(nblk,),
        in_specs=[
            pl.BlockSpec((RENDER_LOWRES, 3 * RENDER_LOWRES), lambda i: (0, 0)),
            pl.BlockSpec((112, 32), lambda i: (0, 0)),
            pl.BlockSpec((7, 96, PLANE_BLK), lambda i: (0, 0, i)),
            pl.BlockSpec((16, PLANE_BLK), lambda i: (0, i)),
        ],
        out_specs=pl.BlockSpec((16, PLANE_BLK), lambda i: (0, i)),
        compiler_params=pltpu.CompilerParams(
            dimension_semantics=("parallel",)),
    )(fwide, abig, bfold, cwide)


# ----------------------------------------------------------------------------
# ServerModel (synthetic, deterministic proxy parameters)
# ----------------------------------------------------------------------------
def init_model(key):
    ks = jax.random.split(key, 12)
    sc = 0.05
    params = {
        # TODO(synk): deep3D.net_recon is a pretrained ResNet-50; replaced by a
        # global-average-pool + linear proxy producing 257 coefficients.
        "recon_w": sc * jax.random.normal(ks[0], (3, N_COEFF), jnp.float32),
        "recon_b": sc * jax.random.normal(ks[1], (1, N_COEFF), jnp.float32),
        # TODO(synk): BFM facemodel + nvdiffrast MeshRenderer replaced by a
        # linear + sigmoid proxy producing a 3x32x32 face image.
        "render_w": sc * jax.random.normal(ks[2], (N_COEFF, FACE_COLS),
                                           jnp.float32),
        "render_b": sc * jax.random.normal(ks[3], (1, FACE_COLS), jnp.float32),
        # replaced Segformer patch embedding: Conv2d(3, 32, 7, stride=4, pad=3)
        "patch_w": sc * jax.random.normal(ks[4], (32, 3, 7, 7), jnp.float32),
        "patch_b": sc * jax.random.normal(ks[5], (1, 32), jnp.float32),
        # TODO(synk): rest-of-Segformer proxy: 1x1 projection 32 -> 256
        "enc_w": sc * jax.random.normal(ks[6], (32, 256), jnp.float32),
        "enc_b": sc * jax.random.normal(ks[7], (1, 256), jnp.float32),
        # TODO(synk): embedding2expr = Embed2Plane(256, 96) proxy: 1x1 conv
        "e2p_w": sc * jax.random.normal(ks[8], (256, 96), jnp.float32),
        "e2p_b": sc * jax.random.normal(ks[9], (1, 96), jnp.float32),
    }
    buffers = {
        "img_src": jax.random.uniform(
            ks[10], (1, 3, IMG_HW, IMG_HW), jnp.float32, -1.0, 1.0),
        "cano_exemplar": jax.random.uniform(
            ks[11], (1, 3, IMG_HW, IMG_HW), jnp.float32, -1.0, 1.0),
        "image_mean": jnp.array(IMAGE_MEAN, jnp.float32),
        "image_std": jnp.array(IMAGE_STD, jnp.float32),
        # cano_pose / uv are registered buffers not used by forward().
        "cano_pose": jnp.zeros((1, 25), jnp.float32),
    }
    return params, buffers


def pack_server_model(params, buffers):
    """One-time host-side weight repacking / algebraic folding (numpy)."""
    del buffers
    f32 = np.float32

    # ---- preprocess resize + global mean, collapsed to a pooling vector ----
    R_pre = _bilinear_matrix(IMG_HW, PRE_HW)                  # (224, 64)
    a = R_pre.sum(axis=0)                                     # column sums
    poolw = (0.5 / float(PRE_HW * PRE_HW)) * np.outer(a, a)
    poolw = poolw.reshape(1, IMG_HW * IMG_HW).astype(f32)

    # ---- recon proxy + coefficient splice, folded ---------------------------
    recon_w = np.asarray(params["recon_w"], f32)              # (3, 257)
    recon_b = np.asarray(params["recon_b"], f32)              # (1, 257)
    src = np.zeros(N_COEFF, np.int64)                         # which coeff row
    src[80:144] = 2                                           # from img_tar
    src[224:227] = 1                                          # from cano_exemplar
    src[254:] = 1
    beff = np.zeros((1, N_COEFF_PAD), f32)
    beff[0, :N_COEFF] = recon_b[0] + 0.5 * recon_w.sum(axis=0)
    cw = np.zeros((9, N_COEFF_PAD), f32)
    for p in range(9):
        cw[p, :N_COEFF] = recon_w[p % 3] * (src == (p // 3))

    # ---- render proxy: column-permute to (y, c, x), row-pad, bf16 ----------
    render_w = np.asarray(params["render_w"], f32)            # (257, 3072)
    render_b = np.asarray(params["render_b"], f32)            # (1, 3072)
    rw_perm = render_w.reshape(N_COEFF, 3, RENDER_LOWRES, RENDER_LOWRES)
    rw_perm = rw_perm.transpose(0, 2, 1, 3).reshape(N_COEFF, FACE_COLS)
    rw = np.zeros((N_COEFF_PAD, FACE_COLS), f32)
    rw[:N_COEFF] = rw_perm
    rb = render_b.reshape(3, RENDER_LOWRES, RENDER_LOWRES)
    rb = rb.transpose(1, 0, 2).reshape(1, FACE_COLS)

    # ---- sudo chain: composed 32->224->64 resize + normalisation affine ----
    rc = (_bilinear_matrix(PRE_HW, IMG_HW)
          @ _bilinear_matrix(RENDER_LOWRES, RASTER_SIZE))     # (64, 32)
    scale = (1.0 / np.asarray(IMAGE_STD, f32))
    offset = (-np.asarray(IMAGE_MEAN, f32) / np.asarray(IMAGE_STD, f32))

    # row/col gathers of Conv2d(k=7, s=4, p=3), composed into rc (OOB -> 0)
    Asel = np.zeros((7, 16, 32), f32)
    Bsel = np.zeros((7, 32, 16), f32)
    mask = np.zeros((7, 16), f32)
    out_idx = np.arange(16)
    for d in range(7):
        r = 4 * out_idx + d - 3
        valid = (r >= 0) & (r < IMG_HW)
        Asel[d][valid, :] = rc[r[valid], :]
        Bsel[d][:, valid] = rc[r[valid], :].T
        mask[d] = valid.astype(f32)
    abig = Asel.reshape(7 * 16, 32)                           # (112, 32)

    # ---- patch-embed conv + encoder proxy + embedding2expr, folded ---------
    patch_w = np.asarray(params["patch_w"], f32)              # (32, 3, 7, 7)
    patch_b = np.asarray(params["patch_b"], f32).reshape(32, 1)
    w2 = np.asarray(params["enc_w"], f32).T                   # (256, 32)
    b2 = np.asarray(params["enc_b"], f32).reshape(256, 1)
    w3 = np.asarray(params["e2p_w"], f32).T                   # (96, 256)
    b3 = np.asarray(params["e2p_b"], f32).reshape(96, 1)
    w32 = w3 @ w2                                             # (96, 32)
    wfull = (w32 @ patch_w.reshape(32, 3 * 49)).reshape(96, 3, 7, 7)
    beff_out = w32 @ patch_b + w3 @ b2 + b3                   # (96, 1)

    ws = wfull * scale[None, :, None, None]
    bfold = np.einsum("ecyx,xjo->ycjeo", ws, Bsel).reshape(7, 96, PLANE_COLS)
    wo = wfull * offset[None, :, None, None]
    const = np.einsum("ecyx,yp,xq->epq", wo, mask, mask) + beff_out[:, :, None]
    cwide = const.transpose(1, 0, 2).reshape(16, PLANE_COLS)  # (16, 1536)

    return {
        "poolw": jnp.asarray(poolw),
        "cw": jnp.asarray(cw),
        "beff": jnp.asarray(beff),
        "rw": jnp.asarray(rw, dtype=jnp.bfloat16),
        "rb": jnp.asarray(rb),
        "abig": jnp.asarray(abig),
        "bfold": jnp.asarray(bfold, dtype=jnp.bfloat16),
        "cwide": jnp.asarray(cwide),
    }


def server_model_forward(dev, img_src, cano_exemplar, img_tar):
    imgs9 = jnp.concatenate((img_src, cano_exemplar, img_tar), axis=0)
    imgs9 = imgs9.reshape(9, IMG_HW * IMG_HW).astype(jnp.float32)

    # Kernel 1: means -> coeffs -> splice -> render proxy (blocked over cols).
    face = pallas_face(imgs9, dev["poolw"], dev["cw"], dev["beff"],
                       dev["rw"], dev["rb"])                      # (1, 3072)
    # columns are emitted in (y, c, x) order, so this reshape is free and
    # directly yields Fwide[y, c*32 + x] = face[c, y, x].
    fwide = face.reshape(RENDER_LOWRES, 3 * RENDER_LOWRES)        # (32, 96)

    # Kernel 2: sudo chain + im2col + folded matmul chain, lane-dense output.
    z = pallas_plane(fwide, dev["abig"], dev["bfold"], dev["cwide"])  # (16,1536)

    # The only remaining permutation: (oy, e, ox) -> (e, oy, ox).
    return z.reshape(16, 96, 16).transpose(1, 0, 2).reshape(1, 96, 16, 16)


# ----------------------------------------------------------------------------
# Pure-JAX un-folded reference of the same proxy chain (for verification)
# ----------------------------------------------------------------------------
def reference_forward(params, buffers, img_tar):
    R = jnp.asarray(_bilinear_matrix(IMG_HW, PRE_HW))             # (224, 64)
    rc = jnp.asarray(_bilinear_matrix(PRE_HW, IMG_HW)
                     @ _bilinear_matrix(RENDER_LOWRES, RASTER_SIZE))
    imgs = jnp.concatenate((buffers["img_src"], buffers["cano_exemplar"],
                            img_tar), axis=0).reshape(9, IMG_HW, IMG_HW)
    pre = jnp.einsum("ar,prq,bq->pab", R, imgs * 0.5 + 0.5, R)    # (9,224,224)
    means = jnp.mean(pre, axis=(1, 2))                            # (9,)
    rows = means.reshape(3, 3) @ params["recon_w"] + params["recon_b"]
    row0 = rows[0]
    row0 = row0.at[80:144].set(rows[2, 80:144])
    row0 = row0.at[224:227].set(rows[1, 224:227])
    row0 = row0.at[254:].set(rows[1, 254:])
    face = jax.nn.sigmoid(row0[None, :] @ params["render_w"]
                          + params["render_b"])
    face = face.reshape(3, RENDER_LOWRES, RENDER_LOWRES)
    mean = jnp.asarray(IMAGE_MEAN, jnp.float32).reshape(3, 1, 1)
    std = jnp.asarray(IMAGE_STD, jnp.float32).reshape(3, 1, 1)
    sudo = (jnp.einsum("ri,cij,qj->crq", rc, face, rc) - mean) / std
    xp = jnp.pad(sudo, ((0, 0), (3, 3), (3, 3)))
    slabs = [xp[:, dy:dy + 61:4, dx:dx + 61:4]
             for dy in range(7) for dx in range(7)]
    colsT = jnp.stack(slabs, axis=1).reshape(3 * 49, 256)
    z1 = params["patch_w"].reshape(32, 147) @ colsT + params["patch_b"].reshape(32, 1)
    z2 = params["enc_w"].T @ z1 + params["enc_b"].reshape(256, 1)
    z3 = params["e2p_w"].T @ z2 + params["e2p_b"].reshape(96, 1)
    return z3.reshape(1, 96, 16, 16)


if __name__ == "__main__":
    key = jax.random.PRNGKey(0)
    k_model, k_inp = jax.random.split(key)
    params, buffers = init_model(k_model)
    dev = pack_server_model(params, buffers)
    img_tar = jax.random.uniform(k_inp, (1, 3, IMG_HW, IMG_HW),
                                 jnp.float32, -1.0, 1.0)

    fwd = jax.jit(server_model_forward)
    out = fwd(dev, buffers["img_src"], buffers["cano_exemplar"], img_tar)
    out = jax.block_until_ready(out)
    assert out.shape == (1, 96, 16, 16), out.shape
    assert bool(jnp.all(jnp.isfinite(out)))

    # Numerical check against the un-folded pure-JAX proxy chain
    # (tolerance covers the bf16 render / plane weights).
    ref = jax.block_until_ready(jax.jit(reference_forward)(params, buffers,
                                                           img_tar))
    max_err = float(jnp.max(jnp.abs(out - ref)))
    assert max_err < 5e-2, max_err

    print("KERNEL_OK")
</pallas_src>

<mosaic_0001>
module attributes {stable_mosaic.version = 11 : i64} {
  func.func @_face_kernel(%arg0: i32, %arg1: memref<9x4096xf32, #tpu.memory_space<vmem>>, %arg2: memref<1x4096xf32, #tpu.memory_space<vmem>>, %arg3: memref<9x272xf32, #tpu.memory_space<vmem>>, %arg4: memref<1x272xf32, #tpu.memory_space<vmem>>, %arg5: memref<272x1024xbf16, #tpu.memory_space<vmem>>, %arg6: memref<1x1024xf32, #tpu.memory_space<vmem>>, %arg7: memref<1x1024xf32, #tpu.memory_space<vmem>>) attributes {dimension_semantics = [#tpu.dimension_semantics<parallel>], iteration_bounds = array<i64: 3>, scalar_prefetch = 0 : i64, scratch_operands = 0 : i64, tpu.core_type = #tpu.core_type<tc>, window_params = [{pipeline_mode = #tpu.pipeline_mode<synchronous>, transform_indices = @transform_0, window_bounds = array<i64: 9, 4096>}, {pipeline_mode = #tpu.pipeline_mode<synchronous>, transform_indices = @transform_1, window_bounds = array<i64: 1, 4096>}, {pipeline_mode = #tpu.pipeline_mode<synchronous>, transform_indices = @transform_2, window_bounds = array<i64: 9, 272>}, {pipeline_mode = #tpu.pipeline_mode<synchronous>, transform_indices = @transform_3, window_bounds = array<i64: 1, 272>}, {transform_indices = @transform_4, window_bounds = array<i64: 272, 1024>}, {transform_indices = @transform_5, window_bounds = array<i64: 1, 1024>}, {transform_indices = @transform_6, window_bounds = array<i64: 1, 1024>}]} {
    %c0 = arith.constant 0 : index
    %c0_0 = arith.constant 0 : index
    %0 = vector.load %arg1[%c0, %c0_0] : memref<9x4096xf32, #tpu.memory_space<vmem>>, vector<9x4096xf32>
    %c0_1 = arith.constant 0 : index
    %c0_2 = arith.constant 0 : index
    %1 = vector.load %arg2[%c0_1, %c0_2] : memref<1x4096xf32, #tpu.memory_space<vmem>>, vector<1x4096xf32>
    %2 = vector.broadcast %1 : vector<1x4096xf32> to vector<9x4096xf32>
    %3 = arith.mulf %0, %2 : vector<9x4096xf32>
    %cst = arith.constant dense<0.000000e+00> : vector<9xf32>
    %4 = vector.multi_reduction <add>, %3, %cst [1] : vector<9x4096xf32> to vector<9xf32>
    %5 = vector.shape_cast %4 : vector<9xf32> to vector<9x1xf32>
    %c0_3 = arith.constant 0 : index
    %c0_4 = arith.constant 0 : index
    %6 = vector.load %arg3[%c0_3, %c0_4] : memref<9x272xf32, #tpu.memory_space<vmem>>, vector<9x272xf32>
    %c0_5 = arith.constant 0 : index
    %c0_6 = arith.constant 0 : index
    %7 = vector.load %arg4[%c0_5, %c0_6] : memref<1x272xf32, #tpu.memory_space<vmem>>, vector<1x272xf32>
    %8 = vector.extract_strided_slice %5 {offsets = [0, 0], sizes = [1, 1], strides = [1, 1]} : vector<9x1xf32> to vector<1x1xf32>
    %9 = vector.extract_strided_slice %6 {offsets = [0, 0], sizes = [1, 272], strides = [1, 1]} : vector<9x272xf32> to vector<1x272xf32>
    %10 = vector.broadcast %8 : vector<1x1xf32> to vector<1x272xf32>
    %11 = arith.mulf %10, %9 : vector<1x272xf32>
    %12 = arith.addf %7, %11 : vector<1x272xf32>
    %13 = vector.extract_strided_slice %5 {offsets = [1, 0], sizes = [1, 1], strides = [1, 1]} : vector<9x1xf32> to vector<1x1xf32>
    %14 = vector.extract_strided_slice %6 {offsets = [1, 0], sizes = [1, 272], strides = [1, 1]} : vector<9x272xf32> to vector<1x272xf32>
    %15 = vector.broadcast %13 : vector<1x1xf32> to vector<1x272xf32>
    %16 = arith.mulf %15, %14 : vector<1x272xf32>
    %17 = arith.addf %12, %16 : vector<1x272xf32>
    %18 = vector.extract_strided_slice %5 {offsets = [2, 0], sizes = [1, 1], strides = [1, 1]} : vector<9x1xf32> to vector<1x1xf32>
    %19 = vector.extract_strided_slice %6 {offsets = [2, 0], sizes = [1, 272], strides = [1, 1]} : vector<9x272xf32> to vector<1x272xf32>
    %20 = vector.broadcast %18 : vector<1x1xf32> to vector<1x272xf32>
    %21 = arith.mulf %20, %19 : vector<1x272xf32>
    %22 = arith.addf %17, %21 : vector<1x272xf32>
    %23 = vector.extract_strided_slice %5 {offsets = [3, 0], sizes = [1, 1], strides = [1, 1]} : vector<9x1xf32> to vector<1x1xf32>
    %24 = vector.extract_strided_slice %6 {offsets = [3, 0], sizes = [1, 272], strides = [1, 1]} : vector<9x272xf32> to vector<1x272xf32>
    %25 = vector.broadcast %23 : vector<1x1xf32> to vector<1x272xf32>
    %26 = arith.mulf %25, %24 : vector<1x272xf32>
    %27 = arith.addf %22, %26 : vector<1x272xf32>
    %28 = vector.extract_strided_slice %5 {offsets = [4, 0], sizes = [1, 1], strides = [1, 1]} : vector<9x1xf32> to vector<1x1xf32>
    %29 = vector.extract_strided_slice %6 {offsets = [4, 0], sizes = [1, 272], strides = [1, 1]} : vector<9x272xf32> to vector<1x272xf32>
    %30 = vector.broadcast %28 : vector<1x1xf32> to vector<1x272xf32>
    %31 = arith.mulf %30, %29 : vector<1x272xf32>
    %32 = arith.addf %27, %31 : vector<1x272xf32>
    %33 = vector.extract_strided_slice %5 {offsets = [5, 0], sizes = [1, 1], strides = [1, 1]} : vector<9x1xf32> to vector<1x1xf32>
    %34 = vector.extract_strided_slice %6 {offsets = [5, 0], sizes = [1, 272], strides = [1, 1]} : vector<9x272xf32> to vector<1x272xf32>
    %35 = vector.broadcast %33 : vector<1x1xf32> to vector<1x272xf32>
    %36 = arith.mulf %35, %34 : vector<1x272xf32>
    %37 = arith.addf %32, %36 : vector<1x272xf32>
    %38 = vector.extract_strided_slice %5 {offsets = [6, 0], sizes = [1, 1], strides = [1, 1]} : vector<9x1xf32> to vector<1x1xf32>
    %39 = vector.extract_strided_slice %6 {offsets = [6, 0], sizes = [1, 272], strides = [1, 1]} : vector<9x272xf32> to vector<1x272xf32>
    %40 = vector.broadcast %38 : vector<1x1xf32> to vector<1x272xf32>
    %41 = arith.mulf %40, %39 : vector<1x272xf32>
    %42 = arith.addf %37, %41 : vector<1x272xf32>
    %43 = vector.extract_strided_slice %5 {offsets = [7, 0], sizes = [1, 1], strides = [1, 1]} : vector<9x1xf32> to vector<1x1xf32>
    %44 = vector.extract_strided_slice %6 {offsets = [7, 0], sizes = [1, 272], strides = [1, 1]} : vector<9x272xf32> to vector<1x272xf32>
    %45 = vector.broadcast %43 : vector<1x1xf32> to vector<1x272xf32>
    %46 = arith.mulf %45, %44 : vector<1x272xf32>
    %47 = arith.addf %42, %46 : vector<1x272xf32>
    %48 = vector.extract_strided_slice %5 {offsets = [8, 0], sizes = [1, 1], strides = [1, 1]} : vector<9x1xf32> to vector<1x1xf32>
    %49 = vector.extract_strided_slice %6 {offsets = [8, 0], sizes = [1, 272], strides = [1, 1]} : vector<9x272xf32> to vector<1x272xf32>
    %50 = vector.broadcast %48 : vector<1x1xf32> to vector<1x272xf32>
    %51 = arith.mulf %50, %49 : vector<1x272xf32>
    %52 = arith.addf %47, %51 : vector<1x272xf32>
    %53 = arith.truncf %52 : vector<1x272xf32> to vector<1x272xbf16>
    %c0_7 = arith.constant 0 : index
    %c0_8 = arith.constant 0 : index
    %54 = vector.load %arg5[%c0_7, %c0_8] : memref<272x1024xbf16, #tpu.memory_space<vmem>>, vector<272x1024xbf16>
    %cst_9 = arith.constant dense<0.000000e+00> : vector<1x1024xf32>
    %55 = tpu.matmul %53, %54, %cst_9 {dimension_numbers = #tpu.dot_dimension_numbers<[1], [0], [0], [1], [0, 0, 1, 1], [], []>} : vector<1x272xbf16>, vector<272x1024xbf16>, vector<1x1024xf32> -> vector<1x1024xf32>
    %c0_10 = arith.constant 0 : index
    %c0_11 = arith.constant 0 : index
    %56 = vector.load %arg6[%c0_10, %c0_11] : memref<1x1024xf32, #tpu.memory_space<vmem>>, vector<1x1024xf32>
    %57 = arith.addf %55, %56 : vector<1x1024xf32>
    %58 = arith.negf %57 : vector<1x1024xf32>
    %59 = math.exp %58 : vector<1x1024xf32>
    %cst_12 = arith.constant 1.000000e+00 : f32
    %60 = vector.broadcast %cst_12 : f32 to vector<1x1024xf32>
    %61 = arith.addf %60, %59 : vector<1x1024xf32>
    %62 = arith.divf %60, %61 : vector<1x1024xf32>
    %c0_13 = arith.constant 0 : index
    %c0_14 = arith.constant 0 : index
    %63 = vector.load %arg7[%c0_13, %c0_14] : memref<1x1024xf32, #tpu.memory_space<vmem>>, vector<1x1024xf32>
    tpu.vector_store %arg7[%c0_13, %c0_14], %62 {strides = array<i32>} : memref<1x1024xf32, #tpu.memory_space<vmem>>, vector<1x1024xf32>,
    return
  }
  func.func @transform_0(%arg0: i32) -> (i32, i32) {
    %c0_i32 = arith.constant 0 : i32
    %c0_i32_0 = arith.constant 0 : i32
    %c0_i32_1 = arith.constant 0 : i32
    return %c0_i32, %c0_i32_0 : i32, i32
  }
  func.func @transform_1(%arg0: i32) -> (i32, i32) {
    %c0_i32 = arith.constant 0 : i32
    %c0_i32_0 = arith.constant 0 : i32
    %c0_i32_1 = arith.constant 0 : i32
    return %c0_i32, %c0_i32_0 : i32, i32
  }
  func.func @transform_2(%arg0: i32) -> (i32, i32) {
    %c0_i32 = arith.constant 0 : i32
    %c0_i32_0 = arith.constant 0 : i32
    %c0_i32_1 = arith.constant 0 : i32
    return %c0_i32, %c0_i32_0 : i32, i32
  }
  func.func @transform_3(%arg0: i32) -> (i32, i32) {
    %c0_i32 = arith.constant 0 : i32
    %c0_i32_0 = arith.constant 0 : i32
    %c0_i32_1 = arith.constant 0 : i32
    return %c0_i32, %c0_i32_0 : i32, i32
  }
  func.func @transform_4(%arg0: i32) -> (i32, i32) {
    %c0_i32 = arith.constant 0 : i32
    %c0_i32_0 = arith.constant 0 : i32
    return %c0_i32, %arg0 : i32, i32
  }
  func.func @transform_5(%arg0: i32) -> (i32, i32) {
    %c0_i32 = arith.constant 0 : i32
    %c0_i32_0 = arith.constant 0 : i32
    return %c0_i32, %arg0 : i32, i32
  }
  func.func @transform_6(%arg0: i32) -> (i32, i32) {
    %c0_i32 = arith.constant 0 : i32
    %c0_i32_0 = arith.constant 0 : i32
    return %c0_i32, %arg0 : i32, i32
  }
}

module attributes {stable_mosaic.version = 11 : i64} {
  func.func @_plane_kernel(%arg0: i32, %arg1: memref<32x96xf32, #tpu.memory_space<vmem>>, %arg2: memref<112x32xf32, #tpu.memory_space<vmem>>, %arg3: memref<7x96x512xbf16, #tpu.memory_space<vmem>>, %arg4: memref<16x512xf32, #tpu.memory_space<vmem>>, %arg5: memref<16x512xf32, #tpu.memory_space<vmem>>) attributes {dimension_semantics = [#tpu.dimension_semantics<parallel>], iteration_bounds = array<i64: 3>, scalar_prefetch = 0 : i64, scratch_operands = 0 : i64, tpu.core_type = #tpu.core_type<tc>, window_params = [{pipeline_mode = #tpu.pipeline_mode<synchronous>, transform_indices = @transform_0, window_bounds = array<i64: 32, 96>}, {pipeline_mode = #tpu.pipeline_mode<synchronous>, transform_indices = @transform_1, window_bounds = array<i64: 112, 32>}, {transform_indices = @transform_2, window_bounds = array<i64: 7, 96, 512>}, {transform_indices = @transform_3, window_bounds = array<i64: 16, 512>}, {transform_indices = @transform_4, window_bounds = array<i64: 16, 512>}]} {
    %c0 = arith.constant 0 : index
    %c0_0 = arith.constant 0 : index
    %0 = vector.load %arg2[%c0, %c0_0] : memref<112x32xf32, #tpu.memory_space<vmem>>, vector<112x32xf32>
    %c0_1 = arith.constant 0 : index
    %c0_2 = arith.constant 0 : index
    %1 = vector.load %arg1[%c0_1, %c0_2] : memref<32x96xf32, #tpu.memory_space<vmem>>, vector<32x96xf32>
    %cst = arith.constant dense<0.000000e+00> : vector<112x96xf32>
    %2 = tpu.matmul %0, %1, %cst {dimension_numbers = #tpu.dot_dimension_numbers<[1], [0], [0], [1], [0, 0, 1, 1], [], []>} : vector<112x32xf32>, vector<32x96xf32>, vector<112x96xf32> -> vector<112x96xf32>
    %3 = arith.truncf %2 : vector<112x96xf32> to vector<112x96xbf16>
    %c0_3 = arith.constant 0 : index
    %c0_4 = arith.constant 0 : index
    %4 = vector.load %arg4[%c0_3, %c0_4] : memref<16x512xf32, #tpu.memory_space<vmem>>, vector<16x512xf32>
    %5 = vector.extract_strided_slice %3 {offsets = [0, 0], sizes = [16, 96], strides = [1, 1]} : vector<112x96xbf16> to vector<16x96xbf16>
    %c0_5 = arith.constant 0 : index
    %c0_6 = arith.constant 0 : index
    %c0_7 = arith.constant 0 : index
    %6 = vector.load %arg3[%c0_5, %c0_6, %c0_7] : memref<7x96x512xbf16, #tpu.memory_space<vmem>>, vector<1x96x512xbf16>
    %7 = vector.shape_cast %6 : vector<1x96x512xbf16> to vector<96x512xbf16>
    %cst_8 = arith.constant dense<0.000000e+00> : vector<16x512xf32>
    %8 = tpu.matmul %5, %7, %cst_8 {dimension_numbers = #tpu.dot_dimension_numbers<[1], [0], [0], [1], [0, 0, 1, 1], [], []>} : vector<16x96xbf16>, vector<96x512xbf16>, vector<16x512xf32> -> vector<16x512xf32>
    %9 = arith.addf %4, %8 : vector<16x512xf32>
    %10 = vector.extract_strided_slice %3 {offsets = [16, 0], sizes = [16, 96], strides = [1, 1]} : vector<112x96xbf16> to vector<16x96xbf16>
    %c1 = arith.constant 1 : index
    %c0_9 = arith.constant 0 : index
    %c0_10 = arith.constant 0 : index
    %11 = vector.load %arg3[%c1, %c0_9, %c0_10] : memref<7x96x512xbf16, #tpu.memory_space<vmem>>, vector<1x96x512xbf16>
    %12 = vector.shape_cast %11 : vector<1x96x512xbf16> to vector<96x512xbf16>
    %cst_11 = arith.constant dense<0.000000e+00> : vector<16x512xf32>
    %13 = tpu.matmul %10, %12, %cst_11 {dimension_numbers = #tpu.dot_dimension_numbers<[1], [0], [0], [1], [0, 0, 1, 1], [], []>} : vector<16x96xbf16>, vector<96x512xbf16>, vector<16x512xf32> -> vector<16x512xf32>
    %14 = arith.addf %9, %13 : vector<16x512xf32>
    %15 = vector.extract_strided_slice %3 {offsets = [32, 0], sizes = [16, 96], strides = [1, 1]} : vector<112x96xbf16> to vector<16x96xbf16>
    %c2 = arith.constant 2 : index
    %c0_12 = arith.constant 0 : index
    %c0_13 = arith.constant 0 : index
    %16 = vector.load %arg3[%c2, %c0_12, %c0_13] : memref<7x96x512xbf16, #tpu.memory_space<vmem>>, vector<1x96x512xbf16>
    %17 = vector.shape_cast %16 : vector<1x96x512xbf16> to vector<96x512xbf16>
    %cst_14 = arith.constant dense<0.000000e+00> : vector<16x512xf32>
    %18 = tpu.matmul %15, %17, %cst_14 {dimension_numbers = #tpu.dot_dimension_numbers<[1], [0], [0], [1], [0, 0, 1, 1], [], []>} : vector<16x96xbf16>, vector<96x512xbf16>, vector<16x512xf32> -> vector<16x512xf32>
    %19 = arith.addf %14, %18 : vector<16x512xf32>
    %20 = vector.extract_strided_slice %3 {offsets = [48, 0], sizes = [16, 96], strides = [1, 1]} : vector<112x96xbf16> to vector<16x96xbf16>
    %c3 = arith.constant 3 : index
    %c0_15 = arith.constant 0 : index
    %c0_16 = arith.constant 0 : index
    %21 = vector.load %arg3[%c3, %c0_15, %c0_16] : memref<7x96x512xbf16, #tpu.memory_space<vmem>>, vector<1x96x512xbf16>
    %22 = vector.shape_cast %21 : vector<1x96x512xbf16> to vector<96x512xbf16>
    %cst_17 = arith.constant dense<0.000000e+00> : vector<16x512xf32>
    %23 = tpu.matmul %20, %22, %cst_17 {dimension_numbers = #tpu.dot_dimension_numbers<[1], [0], [0], [1], [0, 0, 1, 1], [], []>} : vector<16x96xbf16>, vector<96x512xbf16>, vector<16x512xf32> -> vector<16x512xf32>
    %24 = arith.addf %19, %23 : vector<16x512xf32>
    %25 = vector.extract_strided_slice %3 {offsets = [64, 0], sizes = [16, 96], strides = [1, 1]} : vector<112x96xbf16> to vector<16x96xbf16>
    %c4 = arith.constant 4 : index
    %c0_18 = arith.constant 0 : index
    %c0_19 = arith.constant 0 : index
    %26 = vector.load %arg3[%c4, %c0_18, %c0_19] : memref<7x96x512xbf16, #tpu.memory_space<vmem>>, vector<1x96x512xbf16>
    %27 = vector.shape_cast %26 : vector<1x96x512xbf16> to vector<96x512xbf16>
    %cst_20 = arith.constant dense<0.000000e+00> : vector<16x512xf32>
    %28 = tpu.matmul %25, %27, %cst_20 {dimension_numbers = #tpu.dot_dimension_numbers<[1], [0], [0], [1], [0, 0, 1, 1], [], []>} : vector<16x96xbf16>, vector<96x512xbf16>, vector<16x512xf32> -> vector<16x512xf32>
    %29 = arith.addf %24, %28 : vector<16x512xf32>
    %30 = vector.extract_strided_slice %3 {offsets = [80, 0], sizes = [16, 96], strides = [1, 1]} : vector<112x96xbf16> to vector<16x96xbf16>
    %c5 = arith.constant 5 : index
    %c0_21 = arith.constant 0 : index
    %c0_22 = arith.constant 0 : index
    %31 = vector.load %arg3[%c5, %c0_21, %c0_22] : memref<7x96x512xbf16, #tpu.memory_space<vmem>>, vector<1x96x512xbf16>
    %32 = vector.shape_cast %31 : vector<1x96x512xbf16> to vector<96x512xbf16>
    %cst_23 = arith.constant dense<0.000000e+00> : vector<16x512xf32>
    %33 = tpu.matmul %30, %32, %cst_23 {dimension_numbers = #tpu.dot_dimension_numbers<[1], [0], [0], [1], [0, 0, 1, 1], [], []>} : vector<16x96xbf16>, vector<96x512xbf16>, vector<16x512xf32> -> vector<16x512xf32>
    %34 = arith.addf %29, %33 : vector<16x512xf32>
    %35 = vector.extract_strided_slice %3 {offsets = [96, 0], sizes = [16, 96], strides = [1, 1]} : vector<112x96xbf16> to vector<16x96xbf16>
    %c6 = arith.constant 6 : index
    %c0_24 = arith.constant 0 : index
    %c0_25 = arith.constant 0 : index
    %36 = vector.load %arg3[%c6, %c0_24, %c0_25] : memref<7x96x512xbf16, #tpu.memory_space<vmem>>, vector<1x96x512xbf16>
    %37 = vector.shape_cast %36 : vector<1x96x512xbf16> to vector<96x512xbf16>
    %cst_26 = arith.constant dense<0.000000e+00> : vector<16x512xf32>
    %38 = tpu.matmul %35, %37, %cst_26 {dimension_numbers = #tpu.dot_dimension_numbers<[1], [0], [0], [1], [0, 0, 1, 1], [], []>} : vector<16x96xbf16>, vector<96x512xbf16>, vector<16x512xf32> -> vector<16x512xf32>
    %39 = arith.addf %34, %38 : vector<16x512xf32>
    %c0_27 = arith.constant 0 : index
    %c0_28 = arith.constant 0 : index
    %40 = vector.load %arg5[%c0_27, %c0_28] : memref<16x512xf32, #tpu.memory_space<vmem>>, vector<16x512xf32>
    tpu.vector_store %arg5[%c0_27, %c0_28], %39 {strides = array<i32>} : memref<16x512xf32, #tpu.memory_space<vmem>>, vector<16x512xf32>,
    return
  }
  func.func @transform_0(%arg0: i32) -> (i32, i32) {
    %c0_i32 = arith.constant 0 : i32
    %c0_i32_0 = arith.constant 0 : i32
    %c0_i32_1 = arith.constant 0 : i32
    return %c0_i32, %c0_i32_0 : i32, i32
  }
  func.func @transform_1(%arg0: i32) -> (i32, i32) {
    %c0_i32 = arith.constant 0 : i32
    %c0_i32_0 = arith.constant 0 : i32
    %c0_i32_1 = arith.constant 0 : i32
    return %c0_i32, %c0_i32_0 : i32, i32
  }
  func.func @transform_2(%arg0: i32) -> (i32, i32, i32) {
    %c0_i32 = arith.constant 0 : i32
    %c0_i32_0 = arith.constant 0 : i32
    %c0_i32_1 = arith.constant 0 : i32
    return %c0_i32, %c0_i32_0, %arg0 : i32, i32, i32
  }
  func.func @transform_3(%arg0: i32) -> (i32, i32) {
    %c0_i32 = arith.constant 0 : i32
    %c0_i32_0 = arith.constant 0 : i32
    return %c0_i32, %arg0 : i32, i32
  }
  func.func @transform_4(%arg0: i32) -> (i32, i32) {
    %c0_i32 = arith.constant 0 : i32
    %c0_i32_0 = arith.constant 0 : i32
    return %c0_i32, %arg0 : i32, i32
  }
}

</mosaic_0001>

<bundles_post_ra>
// kernel: server_model_forward.2
= control target key start
LH: loop header
LB: loop body
LE: loop exit
PB: predicated region body
PF: predicated region fallthrough
CT: control target
= control target key end

     0   :  { %11 = vsyncpa [#allocation3], 0  ;;  %s3538_s0 = inlined_call_operand.vmem [shape: f32[9,4096], index: 0, kind: input, shape index: {}]   ;;  %s3539_s1 = inlined_call_operand.hbm [shape: f32[1,4096], index: 1, kind: input, shape index: {}]   ;;  %s3540_s2 = inlined_call_operand.hbm [shape: f32[9,272], index: 2, kind: input, shape index: {}]   ;;  %s3541_s3 = inlined_call_operand.hbm [shape: f32[1,272], index: 3, kind: input, shape index: {}]   ;;  %s3542_s4 = inlined_call_operand.hbm [shape: bf16[272,3072], index: 4, kind: input, shape index: {}]   ;;  %s3543_s5 = inlined_call_operand.hbm [shape: f32[1,3072], index: 5, kind: input, shape index: {}]   ;;  %s3544_s6 = inlined_call_operand.vmem [shape: f32[1,3072], index: 6, kind: output, shape index: {}]  }
   0x1   :  { %12 = vsyncpa [#allocation5], 0 }
   0x2   :  { %13 = vsyncpa [#allocation8], 0 }
   0x3   :  { %15 = vsyncpa [#allocation8 + $0x1], 0  ;;  %s2810_s21 = smov 0   ;;  %s2812_s22 = smov 0  }
   0x4   :  { %s2814_s23 = smov 0   ;;  %s2816_s24 = smov 0  }
   0x5 LB: > { %s2829_s25 = sadd.s32 4294967295, %s2761_s24   ;;  %s2832_s26 = sadd.s32 1, %s2761_s24   ;;  %s2761_s24 = sphi %s2816_s24, %s3566_s24   ;;  %s2757_s23 = sphi %s2814_s23, %s3570_s23   ;;  %s2753_s22 = sphi %s2812_s22, %s3569_s22   ;;  %s2749_s21 = sphi %s2810_s21, %s3568_s21  }
   0x6   : > { %3551 = sst [smem:[#allocation13_spill]] %s2832_s26  ;;  %s109_s27 = ssub.s32 %s2761_s24, %s2832_s26 }
   0x7   : > { %s112_s28 = sadd.s32 1, %s2757_s23  ;;  %p110_p0 = scmp.eq.s32.totalorder %s109_s27, 0 }
   0x8   : > { %p119_p1 = scmp.ne.s32.totalorder %s2757_s23, %s2753_s22  ;;  %p120_p2 = scmp.eq.s32.totalorder %s2761_s24, 0 }
   0x9   : > { %p125_p3 = scmp.ne.s32.totalorder %s2753_s22, %s2749_s21  ;;  %p3545_p5 = scmp.eq.s32.totalorder %s2829_s25, 0 }
   0xa   : > { %s2842_s29 = scalar_select %p110_p0, %s2757_s23, %s112_s28  }
   0xb   : > { %p2844_p4 = por %p120_p2, %p119_p1  ;;  %p2301_p6 = scmp.ge.s32.totalorder %s2761_s24, 1 }
   0xc   : > { %3552 = sst [smem:[#allocation14_spill]] %s2842_s29  ;;  %p188_p7 = scmp.lt.s32.totalorder %s2761_s24, 4 }
   0xd   : > { %p2853_p8 = por %p3545_p5, %p125_p3  ;;  %s2763_s9 = smov [#allocation4]  }
   0xe   : > { %p2857_p9 = pnand %p2301_p6, %p188_p7  ;;  %s214_s10 = sshll.u32 %s2763_s9, 4  ;;  %s215_s10 = int_to_ptr.vmem [resolvable:$true] %s214_s10 }
   0xf   : > { %s3554_s7 = scalar_select %p2853_p8, 1, 0 }
  0x10   : > { %s3555_s8 = scalar_select %p2857_p9, 1, 0 }
  0x11   : > { %p2487_p10 = pneg %p2857_p9  ;;  %p2507_p12 = scmp.lt.s32.totalorder %s2761_s24, 3 }
  0x12   : > { %s239_s12 = sand.u32 1, %s2761_s24   ;;  %s241_s13 = sand.u32 1, %s2757_s23  }
  0x13   : > { %p2865_p11 = pnand %p2487_p10, %p3545_p5  ;;  %p2874_p13 = pnand %p2507_p12, %p2844_p4 }
  0x14   : > { %s2596_s15 = scalar_lea.vmem %s215_s10, 768  ;;  %p2604_p6 = scmp.lt.s32.totalorder %s215_s10, %s215_s10 }
  0x15   : > { %p3548_p0 = pneg %p2865_p11  ;;  %p2597_p1 = scmp.ne.s32.totalorder %s215_s10, %s2596_s15 }
  0x16   : > { %p2605_p7 = scmp.lt.s32.totalorder %s2596_s15, %s2596_s15 }
  0x17   : > { %p2599_p2 = pnand %p2597_p1, %p3548_p0 }
  0x18   : > { %p2606_p10 = por %p2605_p7, %p2604_p6 }
  0x19   : > { %p2600_p3 = pneg %p2599_p2 }
  0x1b   : > { %p2607_p5 = pnand %p2606_p10, %p2600_p3 }
  0x1d   : > { %2610 = shalt.err (!%p2607_p5)
}
  0x1e   : > { %s2764_s16 = smov 384   ;;  %s2765_s17 = smov 24  }
  0x1f   : > { %2493 = dma.hbm_to_vmem [thread:$0]  (!%p2865_p11), %s3540_s2, 768, %s215_s10, [#allocation5], %s2764_s16, %s2764_s16, %s2765_s17  }
  0x20   : > { %s2469_s20 = smul.u32 1088, %s241_s13  ;;  %s2467_s21 = sshll.u32 %s2761_s24, 9 }
  0x21   : > { %s2894_s30 = scalar_lea.hbm %s3542_s4, %s2467_s21  ;;  %s2898_s29 = scalar_lea.sflag [#allocation8], %s239_s12 }
  0x22   : > { %s243_s9 = scalar_lea.vmem [#allocation7], %s2469_s20  ;;  %s2611_s26 = scalar_lea.hbm %s2894_s30, 17408 }
  0x23   : > { %s250_s15 = sshll.u32 %s243_s9, 4  ;;  %p2612_p4 = scmp.ne.s32.totalorder %s2894_s30, %s2611_s26  ;;  %s2896_s15 = int_to_ptr.vmem [resolvable:$true] %s250_s15 }
  0x24   : > { %p2613_p5 = pneg %p2874_p13  ;;  %s2616_s17 = scalar_lea.hbm %s3542_s4, 52224 }
  0x25   : > { %p2617_p2 = scmp.lt.s32.totalorder %s2894_s30, %s3542_s4  ;;  %p2618_p3 = scmp.lt.s32.totalorder %s2616_s17, %s2611_s26 }
  0x26   : > { %p2614_p12 = pnand %p2613_p5, %p2612_p4 }
  0x27   : > { %p2619_p6 = por %p2618_p3, %p2617_p2 }
  0x28   : > { %p2615_p1 = pneg %p2614_p12 }
  0x2a   : > { %p2620_p7 = pnand %p2619_p6, %p2615_p1 }
  0x2c   : > { %2623 = shalt.err (!%p2620_p7)
}
  0x2d   : > { %s2624_s12 = scalar_lea.vmem %s2896_s15, 17408  ;;  %s2766_s20 = smov [#allocation7]  }
  0x2e   : > { %p2625_p10 = scmp.ne.s32.totalorder %s2896_s15, %s2624_s12  ;;  %s2629_s21 = sshll.u32 %s2766_s20, 4  ;;  %s2630_s21 = int_to_ptr.vmem [resolvable:$false] %s2629_s21 }
  0x2f   : > { %s2631_s27 = scalar_lea.vmem %s2630_s21, 34816  ;;  %p2632_p0 = scmp.lt.s32.totalorder %s2896_s15, %s2630_s21 }
  0x30   : > { %p2627_p4 = pnand %p2625_p10, %p2613_p5  ;;  %p2633_p8 = scmp.lt.s32.totalorder %s2631_s27, %s2624_s12 }
  0x32   : > { %p2628_p12 = pneg %p2627_p4  ;;  %p2634_p9 = por %p2633_p8, %p2632_p0 }
  0x34   : > { %p2635_p2 = pnand %p2634_p9, %p2628_p12 }
  0x36   : > { %2638 = shalt.err (!%p2635_p2)
}
  0x37   : > { %s2767_s26 = smov 1536   ;;  %s2768_s28 = smov 512  }
  0x38   : > { %s2769_s9 = smov 32   ;;  %s2770_s10 = smov [#allocation2]  }
  0x39   : > { %2500 = dma.hbm_to_vmem [thread:$0]  (!%p2874_p13), %s2894_s30, 17408, %s2896_s15, %s2898_s29, %s2767_s26, %s2768_s28, %s2769_s9  }
  0x3a   : > { %s204_s16 = sshll.u32 %s2770_s10, 4  ;;  %s2771_s17 = smov [#allocation6]   ;;  %s205_s16 = int_to_ptr.vmem [resolvable:$true] %s204_s16 }
  0x3b   : > { %s228_s18 = sshll.u32 %s2771_s17, 4  ;;  %s2650_s19 = scalar_lea.vmem %s205_s16, 512  ;;  %s229_s18 = int_to_ptr.vmem [resolvable:$true] %s228_s18 }
  0x3c   : > { %p2651_p1 = scmp.ne.s32.totalorder %s205_s16, %s2650_s19  ;;  %p3558_p8 = pneg %p2865_p11 }
  0x3d   : > { %p2658_p3 = scmp.lt.s32.totalorder %s205_s16, %s205_s16  ;;  %p2659_p6 = scmp.lt.s32.totalorder %s2650_s19, %s2650_s19 }
  0x3e   : > { %p2653_p9 = pnand %p2651_p1, %p3558_p8 }
  0x3f   : > { %p2660_p7 = por %p2659_p6, %p2658_p3 }
  0x40   : > { %p2654_p0 = pneg %p2653_p9 }
  0x42   : > { %p2661_p10 = pnand %p2660_p7, %p2654_p0 }
  0x44   : > { %2664 = shalt.err (!%p2661_p10)
}
  0x45   : > { %2490 = dma.hbm_to_vmem [thread:$0]  (!%p2865_p11), %s3539_s1, 512, %s205_s16, [#allocation3]  }
  0x46   : > { %s2308_s15 = sshll.u32 %s241_s13, 3  ;;  %s2676_s20 = scalar_lea.vmem %s229_s18, 48 }
  0x47   : > { %p2677_p4 = scmp.ne.s32.totalorder %s229_s18, %s2676_s20  ;;  %p3559_p12 = pmov %p3558_p8 }
  0x48   : > { %s2683_s21 = scalar_lea.vmem %s229_s18, 64  ;;  %p2684_p8 = scmp.lt.s32.totalorder %s229_s18, %s229_s18 }
  0x49   : > { %p2679_p2 = pnand %p2677_p4, %p3559_p12  ;;  %p2685_p9 = scmp.lt.s32.totalorder %s2683_s21, %s2676_s20 }
  0x4b   : > { %p2680_p1 = pneg %p2679_p2  ;;  %p2686_p0 = por %p2685_p9, %p2684_p8 }
  0x4d   : > { %p2687_p3 = pnand %p2686_p0, %p2680_p1 }
  0x4f   : > { %2690 = shalt.err (!%p2687_p3)
}
  0x50   : > { %2496 = dma.hbm_to_vmem [thread:$0]  (!%p2865_p11), %s3541_s3, 48, %s229_s18, [#allocation5]  }
  0x51   : > { %s2468_s13 = sshll.u32 %s2761_s24, 7  ;;  %s264_s16 = scalar_lea.vmem [#allocation9], %s2308_s15 }
  0x52   : > { %s270_s10 = scalar_lea.hbm %s3543_s5, %s2468_s13  ;;  %s272_s17 = sshll.u32 %s264_s16, 4  ;;  %s273_s17 = int_to_ptr.vmem [resolvable:$true] %s272_s17 }
  0x53   : > { %s2691_s19 = scalar_lea.hbm %s270_s10, 128  ;;  %s2696_s30 = scalar_lea.hbm %s3543_s5, 384 }
  0x54   : > { %p2692_p6 = scmp.ne.s32.totalorder %s270_s10, %s2691_s19  ;;  %p2697_p11 = scmp.lt.s32.totalorder %s270_s10, %s3543_s5 }
  0x55   : > { %p2698_p4 = scmp.lt.s32.totalorder %s2696_s30, %s2691_s19 }
  0x56   : > { %p2694_p7 = pnand %p2692_p6, %p2613_p5 }
  0x57   : > { %p2699_p12 = por %p2698_p4, %p2697_p11 }
  0x58   : > { %p2695_p10 = pneg %p2694_p7 }
  0x5a   : > { %p2700_p2 = pnand %p2699_p12, %p2695_p10 }
  0x5c   : > { %2703 = shalt.err (!%p2700_p2)
}
  0x5d   : > { %s2704_s24 = scalar_lea.vmem %s273_s17, 128  ;;  %s2772_s15 = smov [#allocation9]  }
  0x5e   : > { %p2705_p1 = scmp.ne.s32.totalorder %s273_s17, %s2704_s24  ;;  %s2709_s21 = sshll.u32 %s2772_s15, 4  ;;  %s2710_s21 = int_to_ptr.vmem [resolvable:$false] %s2709_s21 }
  0x5f   : > { %s2711_s27 = scalar_lea.vmem %s2710_s21, 256  ;;  %p2712_p0 = scmp.lt.s32.totalorder %s273_s17, %s2710_s21 }
  0x60   : > { %p2707_p8 = pnand %p2705_p1, %p2613_p5  ;;  %p2713_p3 = scmp.lt.s32.totalorder %s2711_s27, %s2704_s24 }
  0x62   : > { %p2708_p9 = pneg %p2707_p8  ;;  %p2714_p6 = por %p2713_p3, %p2712_p0 }
  0x64   : > { %p2715_p7 = pnand %p2714_p6, %p2708_p9 }
  0x66   : > { %2718 = shalt.err (!%p2715_p7)
}
  0x67   : > { %2503 = dma.hbm_to_vmem [thread:$0]  (!%p2874_p13), %s270_s10, 128, %s273_s17, %s2898_s29  }
  0x68   : > { %p3560_p10 = scmp.ne.s32.totalorder %s3555_s8, 0 }
  0x69   : > { %p3561_p11 = scmp.eq.s32.totalorder (!%p3560_p10), %s2829_s25, 0 }
  0x6a   : > { %281 = sbr.rel (%p3560_p10) target bundleno = 739 (0x2e3), region = 44 }
  0x6f   : > { %2736 = dma.done.wait (%p3561_p11), [#allocation3], 512   ;;  %p3562_p5 = pmov %p3561_p11 }
  0x71   : > { %2738 = vsyncadd (%p3562_p5), [#allocation3], 4294966784  ;;  %p3563_p4 = pmov %p3562_p5 }
  0x73   : > { %2740 = dma.done.wait (%p3563_p4), [#allocation5], 816   ;;  %p3564_p12 = pmov %p3563_p4 }
  0x74   : > { %s295_s29 = sand.u32 1, %s2829_s25   ;;  %s297_s14 = sand.u32 1, %s2753_s22  }
  0x75   : > { %2742 = vsyncadd (%p3564_p12), [#allocation5], 4294966480  ;;  %s2470_s8 = smul.u32 1088, %s297_s14  ;;  %s296_s26 = scalar_lea.sflag [#allocation8], %s295_s29 }
  0x76   : > { %p3565_p13 = scmp.ne.s32.totalorder %s3554_s7, 0 }
  0x77   : > { %s2976_s13 = scalar_lea.vmem [#allocation7], %s2470_s8 }
  0x78   : > { %2744 = dma.done.wait (%p3565_p13), %s296_s26, 17536  }
  0x79   : > { %2746 = vsyncadd (%p3565_p13), %s296_s26, 4294949760  ;;  %v421_v0 = vlaneseq  ;;  %v413_v3 = vld [vmem:[#allocation2] sm:$0xff]  ;;  %v350_v9 = vld [vmem:[%s3538_s0 + $0x8] sm:$0xff]  ;;  %vm678_vm0 = vcmask 1040384   ;;  %vm1748_vm1 = vcmask 130048   ;;  %s2315_s21 = sshll.u32 %s297_s14, 3 }
  0x7a   : > { %v349_v8 = vld [vmem:[%s3538_s0] sm:$0xff]  ;;  %v382_v13 = vld [vmem:[%s3538_s0 + $0x108] sm:$0x1]  ;;  %v383_v14 = vld [vmem:[%s3538_s0 + $0x110] sm:$0x1]  ;;  %s308_s27 = scalar_lea.vmem [#allocation9], %s2315_s21 }
  0x7b   : > { %v2982_v1 = vshrl.u32 %v421_v0, 7  ;;  %v381_v12 = vld [vmem:[%s3538_s0 + $0x100] sm:$0x1]  ;;  %v351_v16 = vld [vmem:[%s3538_s0 + $0x10] sm:$0xff]  ;;  %v384_v17 = vld [vmem:[%s3538_s0 + $0x118] sm:$0x1] }
  0x7c   : > { %v352_v21 = vld [vmem:[%s3538_s0 + $0x18] sm:$0xff]  ;;  %v385_v22 = vld [vmem:[%s3538_s0 + $0x120] sm:$0x1]  ;;  %v386_v32 = vld [vmem:[%s3538_s0 + $0x128] sm:$0x1]  ;;  %s2316_s14 = sshll.u32 %s2829_s25, 3 }
  0x7d   : > { %v2985_v2 = vsub.s32 0, %v2982_v1  ;;  %v2988_v4 = vsub.s32 1, %v2982_v1  ;;  %v2991_v5 = vsub.s32 2, %v2982_v1  ;;  %v2995_v7 = vsub.s32 3, %v2982_v1  ;;  %v353_v31 = vld [vmem:[%s3538_s0 + $0x20] sm:$0xff]  ;;  %v354_v41 = vld [vmem:[%s3538_s0 + $0x28] sm:$0xff] }
  0x7e   : > { %v3005_v11 = vsub.s32 4, %v2982_v1  ;;  %v3025_v19 = vsub.s32 5, %v2982_v1  ;;  %v3035_v28 = vsub.s32 6, %v2982_v1  ;;  %v3045_v34 = vsub.s32 7, %v2982_v1  ;;  %v387_v42 = vld [vmem:[%s3538_s0 + $0x130] sm:$0x1] }
  0x7f   : > { %v424_v6 = vrot.slane %v413_v3, %v2985_v2  ;;  %v428_v10 = vrot.slane %v413_v3, %v2988_v4  ;;  %v432_v15 = vrot.slane %v413_v3, %v2991_v5  ;;  %v436_v18 = vrot.slane %v413_v3, %v2995_v7  ;;  %v3057_v45 = vld [vmem:[#allocation2 + $0x8] sm:$0xff]  ;;  %v355_v50 = vld [vmem:[%s3538_s0 + $0x30] sm:$0xff]  ;;  %v388_v51 = vld [vmem:[%s3538_s0 + $0x138] sm:$0x1]  ;;  %p344_p2 = scmp.lt.s32.totalorder %s2316_s14, 23 }
  0x80   : > { %v440_v27 = vrot.slane %v413_v3, %v3005_v11  ;;  %v444_v33 = vrot.slane %v413_v3, %v3025_v19  ;;  %v448_v43 = vrot.slane %v413_v3, %v3035_v28  ;;  %v452_v52 = vrot.slane %v413_v3, %v3045_v34  ;;  %v356_v58 = vld [vmem:[%s3538_s0 + $0x38] sm:$0xff]  ;;  %v389_v59 = vld [vmem:[%s3538_s0 + $0x140] sm:$0x1] }
  0x81   : > { %v581_v20 = vmul.f32 %v424_v6, %v349_v8  ;;  %v582_v23 = vmul.f32 %v428_v10, %v350_v9  ;;  %v613_v24 = vmul.f32 %v424_v6, %v381_v12  ;;  %v614_v25 = vmul.f32 %v428_v10, %v382_v13  ;;  %v357_v6 = vld [vmem:[%s3538_s0 + $0x40] sm:$0xff]  ;;  %v390_v8 = vld [vmem:[%s3538_s0 + $0x148] sm:$0x1]  ;;  %v391_v12 = vld [vmem:[%s3538_s0 + $0x150] sm:$0x1]  ;;  %s3572_s14 = smov (!%p344_p2, %s2316_s14), 23 }
  0x82   : > { %v615_v26 = vmul.f32 %v432_v15, %v383_v14  ;;  %v583_v29 = vmul.f32 %v432_v15, %v351_v16  ;;  %v616_v30 = vmul.f32 %v436_v18, %v384_v17  ;;  %v584_v35 = vmul.f32 %v436_v18, %v352_v21  ;;  %v358_v17 = vld [vmem:[%s3538_s0 + $0x48] sm:$0xff]  ;;  %s346_s25 = scalar_lea.vmem %s3544_s6, %s3572_s14 }
  0x83   : > { %v617_v36 = vmul.f32 %v440_v27, %v385_v22  ;;  %v645_v37 = vadd.f32 %v582_v23, %v581_v20  ;;  %v679_v38 = vsel %vm678_vm0, %v613_v24, 0.0  ;;  %v680_v39 = vsel %vm678_vm0, %v614_v25, 0.0  ;;  %v359_v25 = vld [vmem:[%s3538_s0 + $0x50] sm:$0xff] }
  0x84   : > { %v682_v40 = vsel %vm678_vm0, %v615_v26, 0.0  ;;  %v681_v44 = vadd.f32 %v680_v39, %v679_v38  ;;  %v585_v46 = vmul.f32 %v440_v27, %v353_v31  ;;  %v618_v47 = vmul.f32 %v444_v33, %v386_v32  ;;  %v392_v26 = vld [vmem:[%s3538_s0 + $0x158] sm:$0x1]  ;;  %v393_v32 = vld [vmem:[%s3538_s0 + $0x160] sm:$0x1] }
  0x85   : > { %v646_v48 = vadd.f32 %v645_v37, %v583_v29  ;;  %v684_v49 = vsel %vm678_vm0, %v616_v30, 0.0  ;;  %v586_v54 = vmul.f32 %v444_v33, %v354_v41  ;;  %v619_v55 = vmul.f32 %v448_v43, %v387_v42  ;;  %v360_v31 = vld [vmem:[%s3538_s0 + $0x58] sm:$0xff] }
  0x86   : > { %v683_v53 = vadd.f32 %v682_v40, %v681_v44  ;;  %v686_v57 = vsel %vm678_vm0, %v617_v36, 0.0  ;;  %v456_v60 = vrot.slane %v3057_v45, %v2985_v2  ;;  %v587_v62 = vmul.f32 %v448_v43, %v355_v50  ;;  %v946_v37 = vld [vmem:[%s2976_s13 + $0x1c0] sm:$0xff]  ;;  %v394_v50 = vld [vmem:[%s3538_s0 + $0x168] sm:$0x1] }
  0x87   : > { %v647_v56 = vadd.f32 %v646_v48, %v584_v35  ;;  %v620_v63 = vmul.f32 %v452_v52, %v388_v51  ;;  %v688_v3 = vsel %vm678_vm0, %v618_v47, 0.0  ;;  %v460_v9 = vrot.slane %v3057_v45, %v2988_v4  ;;  %v950_v41 = vld [vmem:[%s2976_s13 + $0x1e0] sm:$0xff] }
  0x88   : > { %v685_v61 = vadd.f32 %v684_v49, %v683_v53  ;;  %v588_v13 = vmul.f32 %v452_v52, %v356_v58  ;;  %v621_v14 = vmul.f32 %v456_v60, %v389_v59  ;;  %v690_v16 = vsel %vm678_vm0, %v619_v55, 0.0  ;;  %v938_v42 = vld [vmem:[%s2976_s13 + $0x180] sm:$0xff]  ;;  %v361_v49 = vld [vmem:[%s3538_s0 + $0x60] sm:$0xff]  ;;  %v362_v55 = vld [vmem:[%s3538_s0 + $0x68] sm:$0xff] }
  0x89   : > { %v648_v0 = vadd.f32 %v647_v56, %v585_v46  ;;  %v464_v18 = vrot.slane %v3057_v45, %v2991_v5  ;;  %v589_v21 = vmul.f32 %v456_v60, %v357_v6  ;;  %v622_v22 = vmul.f32 %v460_v9, %v390_v8  ;;  %v942_v43 = vld [vmem:[%s2976_s13 + $0x1a0] sm:$0xff]  ;;  %v395_v60 = vld [vmem:[%s3538_s0 + $0x170] sm:$0x1] }
  0x8a   : > { %v687_v10 = vadd.f32 %v686_v57, %v685_v61  ;;  %v692_v24 = vsel %vm678_vm0, %v620_v63, 0.0  ;;  %v468_v27 = vrot.slane %v3057_v45, %v2995_v7  ;;  %v590_v33 = vmul.f32 %v460_v9, %v358_v17  ;;  %v930_v63 = vld [vmem:[%s2976_s13 + $0x140] sm:$0xff] }
  0x8b   : > { %v649_v15 = vadd.f32 %v648_v0, %v586_v54  ;;  %v623_v29 = vmul.f32 %v464_v18, %v391_v12  ;;  %v694_v36 = vsel %vm678_vm0, %v621_v14, 0.0  ;;  %v472_v38 = vrot.slane %v3057_v45, %v3005_v11  ;;  %v934_v0 = vld [vmem:[%s2976_s13 + $0x160] sm:$0xff] }
  0x8c   : > { %v689_v20 = vadd.f32 %v688_v3, %v687_v10  ;;  %v476_v39 = vrot.slane %v3057_v45, %v3025_v19  ;;  %v591_v44 = vmul.f32 %v464_v18, %v359_v25  ;;  %v624_v46 = vmul.f32 %v468_v27, %v392_v26  ;;  %v3136_v3 = vld [vmem:[#allocation2 + $0x10] sm:$0xff]  ;;  %v364_v18 = vld [vmem:[%s3538_s0 + $0x78] sm:$0xff] }
  0x8d   : > { %v650_v23 = vadd.f32 %v649_v15, %v587_v62  ;;  %v696_v48 = vsel %vm678_vm0, %v622_v22, 0.0  ;;  %v592_v51 = vmul.f32 %v468_v27, %v360_v31  ;;  %v625_v52 = vmul.f32 %v472_v38, %v393_v32  ;;  %v363_v12 = vld [vmem:[%s3538_s0 + $0x70] sm:$0xff] }
  0x8e   : > { %v691_v30 = vadd.f32 %v690_v16, %v689_v20  ;;  %v698_v54 = vsel %vm678_vm0, %v623_v29, 0.0  ;;  %v2374_v57 = vcombine.high %v946_v37, %v950_v41  ;;  %v2373_v58 = vcombine.low %v946_v37, %v950_v41  ;;  %v922_v26 = vld [vmem:[%s2976_s13 + $0x100] sm:$0xff]  ;;  %v398_v37 = vld [vmem:[%s3538_s0 + $0x188] sm:$0x1] }
  0x8f   : > { %v651_v35 = vadd.f32 %v650_v23, %v588_v13  ;;  %v2366_v59 = vcombine.high %v938_v42, %v942_v43  ;;  %v480_v61 = vrot.slane %v3057_v45, %v3035_v28  ;;  %v593_v6 = vmul.f32 %v472_v38, %v361_v49  ;;  %v396_v13 = vld [vmem:[%s3538_s0 + $0x178] sm:$0x1] }
  0x90   : > { %v693_v40 = vadd.f32 %v692_v24, %v691_v30  ;;  %v626_v8 = vmul.f32 %v476_v39, %v394_v50  ;;  %v700_v10 = vsel %vm678_vm0, %v624_v46, 0.0  ;;  %1752 = vmatprep.subr.bf16.mxu0 %v2374_v57  ;;  %v484_v14 = vrot.slane %v3057_v45, %v3045_v34  ;;  %v397_v45 = vld [vmem:[%s3538_s0 + $0x180] sm:$0x1]  ;;  %v926_v27 = vld [vmem:[%s2976_s13 + $0x120] sm:$0xff] }
  0x91   : > { %v652_v47 = vadd.f32 %v651_v35, %v589_v21  ;;  %v594_v15 = vmul.f32 %v476_v39, %v362_v55  ;;  %1753 = vmatpush1.bf16.msra.mxu0 %v2373_v58  ;;  %v2365_v17 = vcombine.low %v938_v42, %v942_v43  ;;  %v627_v20 = vmul.f32 %v480_v61, %v395_v60  ;;  %v914_v49 = vld [vmem:[%s2976_s13 + $0xc0] sm:$0xff] }
  0x92   : > { %v695_v53 = vadd.f32 %v694_v36, %v693_v40  ;;  %v702_v22 = vsel %vm678_vm0, %v625_v52, 0.0  ;;  %1754 = vmatprep.subr.bf16.mxu0 %v2366_v59  ;;  %v2358_v23 = vcombine.high %v930_v63, %v934_v0  ;;  %v488_v24 = vrot.slane %v3136_v3, %v2985_v2  ;;  %v366_v40 = vld [vmem:[%s3538_s0 + $0x88] sm:$0xff]  ;;  %v918_v50 = vld [vmem:[%s2976_s13 + $0xe0] sm:$0xff] }
  0x93   : > { %v653_v56 = vadd.f32 %v652_v47, %v590_v33  ;;  %v595_v29 = vmul.f32 %v480_v61, %v363_v12  ;;  %v628_v30 = vmul.f32 %v484_v14, %v396_v13  ;;  %v704_v32 = vsel %vm678_vm0, %v626_v8, 0.0  ;;  %v365_v33 = vld [vmem:[%s3538_s0 + $0x80] sm:$0xff]  ;;  %v399_v47 = vld [vmem:[%s3538_s0 + $0x190] sm:$0x1]  ;;  %v400_v58 = vld [vmem:[%s3538_s0 + $0x198] sm:$0x1] }
  0x94   : > { %v697_v62 = vadd.f32 %v696_v48, %v695_v53  ;;  %v492_v35 = vrot.slane %v3136_v3, %v2988_v4  ;;  %v596_v36 = vmul.f32 %v484_v14, %v364_v18  ;;  %v2357_v39 = vcombine.low %v930_v63, %v934_v0  ;;  %v367_v55 = vld [vmem:[%s3538_s0 + $0x90] sm:$0xff]  ;;  %v368_v61 = vld [vmem:[%s3538_s0 + $0x98] sm:$0xff]  ;;  %v369_v18 = vld [vmem:[%s3538_s0 + $0xa0] sm:$0xff] }
  0x95   : > { %v654_v9 = vadd.f32 %v653_v56, %v591_v44  ;;  %1755 = vmatpush1.bf16.msra.mxu0 %v2365_v17  ;;  %v706_v42 = vsel %vm678_vm0, %v627_v20, 0.0  ;;  %v629_v43 = vmul.f32 %v488_v24, %v397_v45  ;;  %v2350_v44 = vcombine.high %v922_v26, %v926_v27  ;;  %v906_v12 = vld [vmem:[%s2976_s13 + $0x80] sm:$0xff]  ;;  %v370_v45 = vld [vmem:[%s3538_s0 + $0xa8] sm:$0xff] }
  0x96   : > { %v699_v16 = vadd.f32 %v698_v54, %v697_v62  ;;  %1756 = vmatprep.subr.bf16.mxu0 %v2358_v23  ;;  %v496_v46 = vrot.slane %v3136_v3, %v2991_v5  ;;  %v708_v53 = vsel %vm678_vm0, %v628_v30, 0.0  ;;  %v630_v54 = vmul.f32 %v492_v35, %v398_v37  ;;  %v910_v13 = vld [vmem:[%s2976_s13 + $0xa0] sm:$0xff] }
  0x97   : > { %v655_v21 = vadd.f32 %v654_v9, %v592_v51  ;;  %v597_v51 = vmul.f32 %v488_v24, %v365_v33  ;;  %v500_v56 = vrot.slane %v3136_v3, %v2995_v7  ;;  %v598_v57 = vmul.f32 %v492_v35, %v366_v40  ;;  %v401_v9 = vld [vmem:[%s3538_s0 + $0x1a0] sm:$0x1]  ;;  %v898_v33 = vld [vmem:[%s2976_s13 + $0x40] sm:$0xff] }
  0x98   : > { %v701_v25 = vadd.f32 %v700_v10, %v699_v16  ;;  %v2349_v60 = vcombine.low %v922_v26, %v926_v27  ;;  %v631_v63 = vmul.f32 %v496_v46, %v399_v47  ;;  %v710_v0 = vsel %vm678_vm0, %v629_v43, 0.0  ;;  %v902_v35 = vld [vmem:[%s2976_s13 + $0x60] sm:$0xff] }
  0x99   : > { %v656_v31 = vadd.f32 %v655_v21, %v593_v6  ;;  %1757 = vmatpush1.bf16.msra.mxu0 %v2357_v39  ;;  %v2342_v6 = vcombine.high %v914_v49, %v918_v50  ;;  %v504_v8 = vrot.slane %v3136_v3, %v3005_v11  ;;  %v599_v14 = vmul.f32 %v496_v46, %v367_v55  ;;  %v890_v55 = vld [vmem:[%s2976_s13] sm:$0xff] }
  0x9a   : > { %v703_v38 = vadd.f32 %v702_v22, %v701_v25  ;;  %1758 = vmatprep.subr.bf16.mxu0 %v2350_v44  ;;  %v632_v16 = vmul.f32 %v500_v56, %v400_v58  ;;  %v712_v17 = vsel %vm678_vm0, %v630_v54, 0.0  ;;  %v508_v20 = vrot.slane %v3136_v3, %v3025_v19  ;;  %v402_v22 = vld [vmem:[%s3538_s0 + $0x1a8] sm:$0x1]  ;;  %v404_v44 = vld [vmem:[%s3538_s0 + $0x1b8] sm:$0x1] }
  0x9b   : > { %v657_v41 = vadd.f32 %v656_v31, %v594_v15  ;;  %v600_v21 = vmul.f32 %v500_v56, %v368_v61  ;;  %v2341_v24 = vcombine.low %v914_v49, %v918_v50  ;;  %v633_v26 = vmul.f32 %v504_v8, %v401_v9  ;;  %v403_v31 = vld [vmem:[%s3538_s0 + $0x1b0] sm:$0x1]  ;;  %v894_v56 = vld [vmem:[%s2976_s13 + $0x20] sm:$0xff]  ;;  %v373_v61 = vld [vmem:[%s3538_s0 + $0xc0] sm:$0xff] }
  0x9c   : > { %v705_v48 = vadd.f32 %v704_v32, %v703_v38  ;;  %v714_v27 = vsel %vm678_vm0, %v631_v63, 0.0  ;;  %v512_v30 = vrot.slane %v3136_v3, %v3035_v28  ;;  %v601_v37 = vmul.f32 %v504_v8, %v369_v18 }
  0x9d   : > { %v658_v52 = vadd.f32 %v657_v41, %v595_v29  ;;  %1759 = vmatpush1.bf16.msra.mxu0 %v2349_v60  ;;  %v2334_v29 = vcombine.high %v906_v12, %v910_v13  ;;  %v634_v39 = vmul.f32 %v508_v20, %v402_v22  ;;  %v716_v40 = vsel %vm678_vm0, %v632_v16, 0.0  ;;  %v371_v41 = vld [vmem:[%s3538_s0 + $0xb0] sm:$0xff] }
  0x9e   : > { %v707_v59 = vadd.f32 %v706_v42, %v705_v48  ;;  %1760 = vmatprep.subr.bf16.mxu0 %v2342_v6  ;;  %v516_v42 = vrot.slane %v3136_v3, %v3045_v34  ;;  %v602_v43 = vmul.f32 %v508_v20, %v370_v45  ;;  %v2333_v47 = vcombine.low %v906_v12, %v910_v13  ;;  %v372_v48 = vld [vmem:[%s3538_s0 + $0xb8] sm:$0xff]  ;;  %v407_v16 = vld [vmem:[%s3538_s0 + $0x1d0] sm:$0x1] }
  0x9f   : > { %v659_v62 = vadd.f32 %v658_v52, %v596_v36  ;;  %v3218_v36 = vld [vmem:[#allocation2 + $0x18] sm:$0xff]  ;;  %v635_v50 = vmul.f32 %v512_v30, %v403_v31  ;;  %v2326_v52 = vcombine.high %v898_v33, %v902_v35  ;;  %v720_v60 = vsel %vm678_vm0, %v634_v39, 0.0 }
  0xa0   : > { %v709_v10 = vadd.f32 %v708_v53, %v707_v59  ;;  %v520_v3 = vrot.slane %v3218_v36, %v2985_v2  ;;  %v405_v53 = vld [vmem:[%s3538_s0 + $0x1c0] sm:$0x1]  ;;  %v636_v59 = vmul.f32 %v516_v42, %v404_v44  ;;  %v604_v63 = vmul.f32 %v516_v42, %v372_v48  ;;  %v408_v45 = vld [vmem:[%s3538_s0 + $0x1d8] sm:$0x1]  ;;  %v410_v44 = vld [vmem:[%s3538_s0 + $0x1e8] sm:$0x1] }
  0xa1   : > { %v660_v15 = vadd.f32 %v659_v62, %v597_v51  ;;  %1761 = vmatpush1.bf16.msra.mxu0 %v2341_v24  ;;  %v718_v51 = vsel %vm678_vm0, %v633_v26, 0.0  ;;  %v524_v62 = vrot.slane %v3218_v36, %v2988_v4  ;;  %v2325_v8 = vcombine.low %v898_v33, %v902_v35  ;;  %v409_v35 = vld [vmem:[%s3538_s0 + $0x1e0] sm:$0x1] }
  0xa2   : > { %v711_v23 = vadd.f32 %v710_v0, %v709_v10  ;;  %1762 = vmatprep.subr.bf16.mxu0 %v2334_v29  ;;  %v406_v0 = vld [vmem:[%s3538_s0 + $0x1c8] sm:$0x1]  ;;  %v637_v10 = vmul.f32 %v520_v3, %v405_v53  ;;  %v722_v12 = vsel %vm678_vm0, %v635_v50, 0.0  ;;  %v2318_v13 = vcombine.high %v890_v55, %v894_v56  ;;  %v377_v42 = vld [vmem:[%s3538_s0 + $0xe0] sm:$0xff] }
  0xa3   : > { %v661_v25 = vadd.f32 %v660_v15, %v598_v57  ;;  %v603_v57 = vmul.f32 %v512_v30, %v371_v41  ;;  %v528_v15 = vrot.slane %v3218_v36, %v2991_v5  ;;  %v605_v18 = vmul.f32 %v520_v3, %v373_v61  ;;  %v411_v3 = vld [vmem:[%s3538_s0 + $0x1f0] sm:$0x1] }
  0xa4   : > { %v713_v32 = vadd.f32 %v712_v17, %v711_v23  ;;  %v724_v22 = vsel %vm678_vm0, %v636_v59, 0.0  ;;  %v375_v23 = vld [vmem:[%s3538_s0 + $0xd0] sm:$0xff]  ;;  %v532_v24 = vrot.slane %v3218_v36, %v2995_v7  ;;  %v2317_v26 = vcombine.low %v890_v55, %v894_v56 }
  0xa5   : > { %v662_v38 = vadd.f32 %v661_v25, %v599_v14  ;;  %1763 = vmatpush1.bf16.msra.mxu0 %v2333_v47  ;;  %v374_v14 = vld [vmem:[%s3538_s0 + $0xc8] sm:$0xff]  ;;  %v639_v30 = vmul.f32 %v528_v15, %v407_v16  ;;  %v726_v31 = vsel %vm678_vm0, %v637_v10, 0.0  ;;  %v536_v33 = vrot.slane %v3218_v36, %v3005_v11 }
  0xa6   : > { %v715_v46 = vadd.f32 %v714_v27, %v713_v32  ;;  %1764 = vmatprep.subr.bf16.mxu0 %v2326_v52  ;;  %v606_v27 = vmul.f32 %v524_v62, %v374_v14  ;;  %v376_v32 = vld [vmem:[%s3538_s0 + $0xd8] sm:$0xff]  ;;  %v544_v52 = vrot.slane %v3218_v36, %v3035_v28  ;;  %v548_v59 = vrot.slane %v3218_v36, %v3045_v34 }
  0xa7   : > { %v663_v49 = vadd.f32 %v662_v38, %v600_v21  ;;  %v638_v21 = vmul.f32 %v524_v62, %v406_v0  ;;  %v607_v38 = vmul.f32 %v528_v15, %v375_v23  ;;  %v608_v47 = vmul.f32 %v532_v24, %v376_v32 }
  0xa8   : > { %v717_v54 = vadd.f32 %v716_v40, %v715_v46  ;;  %v640_v40 = vmul.f32 %v532_v24, %v408_v45  ;;  %v730_v50 = vsel %vm678_vm0, %v639_v30, 0.0  ;;  %v643_v0 = vmul.f32 %v544_v52, %v411_v3  ;;  %v1010_v45 = vld [vmem:[%s2976_s13 + $0x3c0] sm:$0xff] }
  0xa9   : > { %v664_v58 = vadd.f32 %v663_v49, %v601_v37  ;;  %1765 = vmatpush1.bf16.msra.mxu0 %v2325_v8  ;;  %v728_v41 = vsel %vm678_vm0, %v638_v21, 0.0  ;;  %v641_v49 = vmul.f32 %v536_v33, %v409_v35  ;;  %v380_v8 = vld [vmem:[%s3538_s0 + $0xf8] sm:$0xff] }
  0xaa   : > { %v719_v6 = vadd.f32 %v718_v51, %v717_v54  ;;  %1766 = vmatprep.subr.bf16.mxu0 %v2318_v13  ;;  %v378_v51 = vld [vmem:[%s3538_s0 + $0xe8] sm:$0xff]  ;;  %v609_v54 = vmul.f32 %v536_v33, %v377_v42  ;;  %v612_v15 = vmul.f32 %v548_v59, %v380_v8  ;;  %v1006_v30 = vld [vmem:[%s2976_s13 + $0x3a0] sm:$0xff] }
  0xab   : > { %v665_v9 = vadd.f32 %v664_v58, %v602_v43  ;;  %v540_v43 = vrot.slane %v3218_v36, %v3025_v19  ;;  %v379_v58 = vld [vmem:[%s3538_s0 + $0xf0] sm:$0xff] }
  0xac   : > { %v721_v17 = vadd.f32 %v720_v60, %v719_v6  ;;  %v734_v6 = vsel %vm678_vm0, %v641_v49, 0.0  ;;  %v611_v10 = vmul.f32 %v544_v52, %v379_v58  ;;  %v994_v33 = vld [vmem:[%s2976_s13 + $0x340] sm:$0xff] }
  0xad   : > { %v666_v20 = vadd.f32 %v665_v9, %v603_v57  ;;  %1767 = vmatpush1.bf16.msra.mxu0 %v2317_v26  ;;  %v642_v56 = vmul.f32 %v540_v43, %v410_v44  ;;  %v732_v57 = vsel %vm678_vm0, %v640_v40, 0.0  ;;  %v610_v61 = vmul.f32 %v540_v43, %v378_v51  ;;  %v998_v35 = vld [vmem:[%s2976_s13 + $0x360] sm:$0xff] }
  0xae   : > { %v723_v25 = vadd.f32 %v722_v12, %v721_v17  ;;  %v738_v17 = vsel %vm678_vm0, %v643_v0, 0.0  ;;  %v990_v40 = vld [vmem:[%s2976_s13 + $0x320] sm:$0xff]  ;;  %v2773_v0 = vmov 0  }
  0xaf   : > { %v667_v29 = vadd.f32 %v666_v20, %v604_v63  ;;  %v412_v63 = vld [vmem:[%s3538_s0 + $0x1f8] sm:$0x1]  ;;  %v736_v36 = vsel %vm678_vm0, %v642_v56, 0.0  ;;  %1825 = vmatprep.mubr.bf16.mxu1 %v2773_v0 }
  0xb0   : > { %v725_v37 = vadd.f32 %v724_v22, %v723_v25  ;;  %v644_v13 = vmul.f32 %v548_v59, %v412_v63  ;;  %v1014_v25 = vld [vmem:[%s2976_s13 + $0x3e0] sm:$0xff] }
  0xb1   : > { %v668_v39 = vadd.f32 %v667_v29, %v605_v18  ;;  %v2438_v26 = vcombine.high %v1010_v45, %v1014_v25  ;;  %v1002_v29 = vld [vmem:[%s2976_s13 + $0x380] sm:$0xff] }
  0xb2   : > { %v727_v46 = vadd.f32 %v726_v31, %v725_v37  ;;  %v740_v22 = vsel %vm678_vm0, %v644_v13, 0.0  ;;  %v2430_v31 = vcombine.high %v1002_v29, %v1006_v30  ;;  %v2429_v32 = vcombine.low %v1002_v29, %v1006_v30  ;;  %v978_v43 = vld [vmem:[%s2976_s13 + $0x2c0] sm:$0xff] }
  0xb3   : > { %v669_v48 = vadd.f32 %v668_v39, %v606_v27  ;;  %v2437_v27 = vcombine.low %v1010_v45, %v1014_v25  ;;  %1768 = vmatprep.subr.bf16.mxu0 %v2438_v26  ;;  %v2422_v37 = vcombine.high %v994_v33, %v998_v35  ;;  %v986_v39 = vld [vmem:[%s2976_s13 + $0x300] sm:$0xff] }
  0xb4   : > { %v729_v53 = vadd.f32 %v728_v41, %v727_v46  ;;  %v2414_v41 = vcombine.high %v986_v39, %v990_v40  ;;  %v2413_v42 = vcombine.low %v986_v39, %v990_v40  ;;  %v982_v44 = vld [vmem:[%s2976_s13 + $0x2e0] sm:$0xff] }
  0xb5   : > { %v670_v55 = vadd.f32 %v669_v48, %v607_v38  ;;  %1769 = vmatpush2.bf16.msra.mxu0 %v2437_v27  ;;  %v2421_v38 = vcombine.low %v994_v33, %v998_v35  ;;  %v2406_v46 = vcombine.high %v978_v43, %v982_v44  ;;  %v970_v48 = vld [vmem:[%s2976_s13 + $0x280] sm:$0xff] }
  0xb6   : > { %v731_v60 = vadd.f32 %v730_v50, %v729_v53  ;;  %1770 = vmatprep.subr.bf16.mxu0 %v2430_v31  ;;  %v974_v49 = vld [vmem:[%s2976_s13 + $0x2a0] sm:$0xff] }
  0xb7   : > { %v671_v62 = vadd.f32 %v670_v55, %v608_v47  ;;  %v2405_v47 = vcombine.low %v978_v43, %v982_v44  ;;  %v2398_v50 = vcombine.high %v970_v48, %v974_v49  ;;  %v2397_v51 = vcombine.low %v970_v48, %v974_v49  ;;  %v962_v52 = vld [vmem:[%s2976_s13 + $0x240] sm:$0xff] }
  0xb8   : > { %v733_v9 = vadd.f32 %v732_v57, %v731_v60  ;;  %v966_v3 = vld [vmem:[%s2976_s13 + $0x260] sm:$0xff] }
  0xb9   : > { %v672_v12 = vadd.f32 %v671_v62, %v609_v54  ;;  %1771 = vmatpush2.bf16.msra.mxu0 %v2429_v32  ;;  %v2390_v53 = vcombine.high %v962_v52, %v966_v3  ;;  %v2389_v54 = vcombine.low %v962_v52, %v966_v3  ;;  %v1018_v55 = vld [vmem:[%s2976_s13 + $0x400] sm:$0xff]  ;;  %v748_v32 = vld [vmem:[#allocation4 + $0x20] sm:$0x1] }
  0xba   : > { %v735_v14 = vadd.f32 %v734_v6, %v733_v9  ;;  %1772 = vmatprep.subr.bf16.mxu0 %v2422_v37  ;;  %v1022_v56 = vld [vmem:[%s2976_s13 + $0x420] sm:$0xff]  ;;  %v3333_v6 = vld [vmem:[%s2976_s13 + $0x1e8] sm:$0xff] }
  0xbb   : > { %v673_v16 = vadd.f32 %v672_v12, %v610_v61  ;;  %v2446_v57 = vcombine.high %v1018_v55, %v1022_v56  ;;  %v2445_v58 = vcombine.low %v1018_v55, %v1022_v56  ;;  %v954_v59 = vld [vmem:[%s2976_s13 + $0x200] sm:$0xff]  ;;  %v3329_v61 = vld [vmem:[%s2976_s13 + $0x1c8] sm:$0xff] }
  0xbc   : > { %v737_v18 = vadd.f32 %v736_v36, %v735_v14  ;;  %v958_v60 = vld [vmem:[%s2976_s13 + $0x220] sm:$0xff]  ;;  %v2375_v8 = vcombine.low %v3329_v61, %v3333_v6  ;;  %v2376_v9 = vcombine.high %v3329_v61, %v3333_v6  ;;  %v3343_v12 = vld [vmem:[%s2976_s13 + $0x428] sm:$0xff]  ;;  %v2774_v14 = vmov 1966171168   ;;  %v949_v61 = vld [vmem:[%s2976_s13 + $0x1d8] sm:$0xff] }
  0xbd   : > { %v674_v20 = vadd.f32 %v673_v16, %v611_v10  ;;  %1773 = vmatpush2.bf16.msra.mxu0 %v2421_v38  ;;  %v2382_v62 = vcombine.high %v954_v59, %v958_v60  ;;  %v2381_v63 = vcombine.low %v954_v59, %v958_v60  ;;  %1807 = vmatprep.subr.bf16.mxu1 %v2446_v57  ;;  %v3340_v10 = vld [vmem:[%s2976_s13 + $0x408] sm:$0xff]  ;;  %v747_v31 = vld [vmem:[#allocation4 + $0x18] sm:$0x1]  ;;  %v750_v38 = vld [vmem:[#allocation6] sm:$0x7] }
  0xbe   : > { %v739_v21 = vadd.f32 %v738_v17, %v737_v18  ;;  %1774 = vmatprep.subr.bf16.mxu0 %v2414_v41  ;;  %1808 = vmatpush1.bf16.msra.mxu1 %v2445_v58  ;;  %v2448_v36 = vcombine.high %v3340_v10, %v3343_v12  ;;  %v2447_v13 = vcombine.low %v3340_v10, %v3343_v12  ;;  %v744_v17 = vld [vmem:[#allocation4] sm:$0xff]  ;;  %v745_v18 = vld [vmem:[#allocation4 + $0x8] sm:$0xff] }
  0xbf   : > { %v675_v23 = vadd.f32 %v674_v20, %v612_v15  ;;  %1834 = vmatprep.subr.bf16.mxu1 %v2376_v9  ;;  %v759_v15 = vunpack.c.l.s4 %v2774_v14  ;;  %v746_v20 = vld [vmem:[#allocation4 + $0x10] sm:$0xff]  ;;  %v749_v41 = vld [vmem:[#allocation4 + $0x28] sm:$0x1] }
  0xc0   : > { %v741_v24 = vadd.f32 %v740_v22, %v739_v21  ;;  %v953_v6 = vld [vmem:[%s2976_s13 + $0x1f8] sm:$0xff] }
  0xc1   : > { %676 = vadd.xlane.f32.xlu0 %v675_v23  ;;  %1775 = vmatpush2.bf16.msra.mxu0 %v2413_v42  ;;  %v760_v16 = vunpack.c.0.s8 %v759_v15  ;;  %v2380_v10 = vcombine.high %v949_v61, %v953_v6 }
  0xc2   : > { %1776 = vmatprep.subr.bf16.mxu0 %v2406_v46 }
  0xc3   : > { %v3350_v22 = vsub.s32 %v760_v16, %v2982_v1 }
  0xc5   : > { %742 = vadd.xlane.f32.xlu0 %v741_v24  ;;  %1777 = vmatpush2.bf16.msra.mxu0 %v2405_v47 }
  0xc6   : > { %1778 = vmatprep.subr.bf16.mxu0 %v2398_v50 }
  0xc9   : > { %1779 = vmatpush2.bf16.msra.mxu0 %v2397_v51 }
  0xca   : > { %1780 = vmatprep.subr.bf16.mxu0 %v2390_v53 }
  0xcd   : > { %1781 = vmatpush2.bf16.msra.mxu0 %v2389_v54 }
  0xce   : > { %1782 = vmatprep.subr.bf16.mxu0 %v2382_v62 }
  0xd1   : > { %1783 = vmatpush2.bf16.msra.mxu0 %v2381_v63 }
  0xd2   : > { %1889 = vmatprep.subr.bf16.mxu0 %v2448_v36 }
 0x14a   : > { %v677_v21 = vpop.xlane.xlu0 %676 }
 0x14b   : > { %v751_v23 = vmul.f32 %v744_v17, %v677_v21  ;;  %v752_v24 = vmul.f32 %v745_v18, %v677_v21  ;;  %v753_v45 = vmul.f32 %v746_v20, %v677_v21  ;;  %v939_v17 = vld [vmem:[%s2976_s13 + $0x188] sm:$0xff] }
 0x14c   : > { %v943_v18 = vld [vmem:[%s2976_s13 + $0x1a8] sm:$0xff] }
 0x14d   : > { %v757_v25 = vcombine.low %v751_v23, %v752_v24  ;;  %v798_v26 = vcombine.high %v751_v23, %v752_v24  ;;  %v771_v29 = vrot.slane %v753_v45, %v3350_v22  ;;  %v799_v30 = vcombine.high %v753_v45, %v753_v45  ;;  %v1020_v24 = vld [vmem:[%s2976_s13 + $0x410] sm:$0xff] }
 0x14e   : > { %v743_v33 = vpop.xlane.xlu0 %742  ;;  %v1024_v45 = vld [vmem:[%s2976_s13 + $0x430] sm:$0xff] }
 0x14f   : > { %v764_v27 = vrot.slane %v757_v25, %v3350_v22  ;;  %v806_v39 = vrot.slane %v798_v26, %v3350_v22  ;;  %v813_v40 = vrot.slane %v799_v30, %v3350_v22  ;;  %v840_v42 = vmul.f32 %v747_v31, %v743_v33  ;;  %v931_v30 = vld [vmem:[%s2976_s13 + $0x148] sm:$0xff] }
 0x150   : > { %v841_v43 = vmul.f32 %v748_v32, %v743_v33  ;;  %v842_v47 = vmul.f32 %v749_v41, %v743_v33  ;;  %v935_v31 = vld [vmem:[%s2976_s13 + $0x168] sm:$0xff]  ;;  %v2450_v32 = vcombine.high %v1020_v24, %v1024_v45  ;;  %v2367_v33 = vcombine.low %v939_v17, %v943_v18 }
 0x151   : > { %v772_v35 = vcombine.low %v764_v27, %v771_v29  ;;  %v782_v37 = vcombine.high %v764_v27, %v771_v29  ;;  %v814_v50 = vcombine.low %v806_v39, %v813_v40  ;;  %v824_v53 = vcombine.high %v806_v39, %v813_v40  ;;  %v915_v40 = vld [vmem:[%s2976_s13 + $0xc8] sm:$0xff] }
 0x152   : > { %v846_v51 = vcombine.low %v840_v42, %v841_v43  ;;  %v860_v57 = vrot.slane %v842_v47, %v3350_v22  ;;  %v2368_v29 = vcombine.high %v939_v17, %v943_v18  ;;  %v919_v41 = vld [vmem:[%s2976_s13 + $0xe8] sm:$0xff]  ;;  %v917_v17 = vld [vmem:[%s2976_s13 + $0xd8] sm:$0xff] }
 0x153   : > { %v779_v1 = vrot.slane %v772_v35, %v3350_v22  ;;  %v789_v46 = vrot.slane %v782_v37, %v3350_v22  ;;  %v821_v55 = vrot.slane %v814_v50, %v3350_v22  ;;  %v831_v59 = vrot.slane %v824_v53, %v3350_v22  ;;  %v923_v37 = vld [vmem:[%s2976_s13 + $0x108] sm:$0xff]  ;;  %v937_v53 = vld [vmem:[%s2976_s13 + $0x178] sm:$0xff] }
 0x154   : > { %v853_v56 = vrot.slane %v846_v51, %v3350_v22  ;;  %v2360_v35 = vcombine.high %v931_v30, %v935_v31  ;;  %v907_v42 = vld [vmem:[%s2976_s13 + $0x88] sm:$0xff]  ;;  %v2343_v47 = vcombine.low %v915_v40, %v919_v41  ;;  %v921_v18 = vld [vmem:[%s2976_s13 + $0xf8] sm:$0xff] }
 0x155   : > { %v781_v44 = vadd.f32 %v779_v1, %v750_v38  ;;  %v792_v49 = vcombine.high %v779_v1, %v779_v1  ;;  %v795_v3 = vcombine.high %v789_v46, %v789_v46  ;;  %v834_v62 = vcombine.high %v821_v55, %v821_v55  ;;  %v927_v38 = vld [vmem:[%s2976_s13 + $0x128] sm:$0xff] }
 0x156   : > { %v861_v63 = vcombine.low %v853_v56, %v860_v57  ;;  %v837_v9 = vcombine.high %v831_v59, %v831_v59  ;;  %v2352_v39 = vcombine.high %v923_v37, %v927_v38  ;;  %v2449_v1 = vcombine.low %v1020_v24, %v1024_v45  ;;  %v911_v43 = vld [vmem:[%s2976_s13 + $0xa8] sm:$0xff] }
 0x157   : > { %v791_v48 = vadd.f32 %v789_v46, %v781_v44  ;;  %v2351_v12 = vcombine.low %v923_v37, %v927_v38  ;;  %v941_v44 = vld [vmem:[%s2976_s13 + $0x198] sm:$0xff]  ;;  %v899_v51 = vld [vmem:[%s2976_s13 + $0x48] sm:$0xff]  ;;  %v2348_v24 = vcombine.high %v917_v17, %v921_v18 }
 0x158   : > { %v868_v15 = vrot.slane %v861_v63, %v3350_v22  ;;  %v945_v46 = vld [vmem:[%s2976_s13 + $0x1b8] sm:$0xff]  ;;  %v1003_v45 = vld [vmem:[%s2976_s13 + $0x388] sm:$0xff] }
 0x159   : > { %v794_v52 = vadd.f32 %v792_v49, %v791_v48  ;;  %v2379_v48 = vcombine.low %v949_v61, %v953_v6  ;;  %v2336_v49 = vcombine.high %v907_v42, %v911_v43  ;;  %v2372_v50 = vcombine.high %v941_v44, %v945_v46  ;;  %v995_v38 = vld [vmem:[%s2976_s13 + $0x348] sm:$0xff]  ;;  %v901_v6 = vld [vmem:[%s2976_s13 + $0x58] sm:$0xff] }
 0x15a   : > { %v999_v61 = vld [vmem:[%s2976_s13 + $0x368] sm:$0xff] }
 0x15b   : > { %v797_v54 = vadd.f32 %v795_v3, %v794_v52  ;;  %v903_v52 = vld [vmem:[%s2976_s13 + $0x68] sm:$0xff]  ;;  %v933_v3 = vld [vmem:[%s2976_s13 + $0x158] sm:$0xff] }
 0x15c   : > { %v2328_v56 = vcombine.high %v899_v51, %v903_v52  ;;  %v2364_v57 = vcombine.high %v933_v3, %v937_v53  ;;  %v2327_v63 = vcombine.low %v899_v51, %v903_v52  ;;  %v1017_v51 = vld [vmem:[%s2976_s13 + $0x3f8] sm:$0xff] }
 0x15d   : > { %v823_v58 = vadd.f32 %v821_v55, %v797_v54  ;;  %v2335_v54 = vcombine.low %v907_v42, %v911_v43  ;;  %v2371_v55 = vcombine.low %v941_v44, %v945_v46  ;;  %v897_v42 = vld [vmem:[%s2976_s13 + $0x38] sm:$0xff]  ;;  %v2423_v43 = vcombine.low %v995_v38, %v999_v61 }
 0x15f   : > { %v833_v60 = vadd.f32 %v831_v59, %v823_v58  ;;  %v891_v58 = vld [vmem:[%s2976_s13 + $0x8] sm:$0xff] }
 0x160   : > { %v895_v59 = vld [vmem:[%s2976_s13 + $0x28] sm:$0xff] }
 0x161   : > { %v836_v36 = vadd.f32 %v834_v62, %v833_v60  ;;  %v925_v60 = vld [vmem:[%s2976_s13 + $0x118] sm:$0xff] }
 0x162   : > { %v929_v62 = vld [vmem:[%s2976_s13 + $0x138] sm:$0xff] }
 0x163   : > { %v839_v14 = vadd.f32 %v837_v9, %v836_v36  ;;  %v2363_v9 = vcombine.low %v933_v3, %v937_v53  ;;  %v2320_v36 = vcombine.high %v891_v58, %v895_v59 }
 0x165   : > { %v870_v16 = vadd.f32 %v868_v15, %v839_v14  ;;  %v2356_v14 = vcombine.high %v925_v60, %v929_v62  ;;  %v1011_v15 = vld [vmem:[%s2976_s13 + $0x3c8] sm:$0xff] }
 0x167   : > { %v879_v20 = vrot.slane %v870_v16, %v2988_v4  ;;  %v883_v21 = vrot.slane %v870_v16, %v2991_v5  ;;  %v875_v23 = vrot.slane %v870_v16, %v2985_v2  ;;  %v1015_v16 = vld [vmem:[%s2976_s13 + $0x3e8] sm:$0xff] }
 0x169   : > { %v3370_v25 = vpack.c.bf16 %v879_v20, %v879_v20  ;;  %v3372_v26 = vpack.c.bf16 %v883_v21, %v883_v21  ;;  %v3374_v27 = vpack.c.bf16 %v875_v23, %v875_v23  ;;  %v2319_v20 = vcombine.low %v891_v58, %v895_v59  ;;  %v1009_v58 = vld [vmem:[%s2976_s13 + $0x3b8] sm:$0xff] }
 0x16a   : > { %v2355_v21 = vcombine.low %v925_v60, %v929_v62  ;;  %v2440_v23 = vcombine.high %v1011_v15, %v1015_v16 }
 0x16b   : > { %1784 = vmatprep.mubr.bf16.mxu0 %v3370_v25  ;;  %2453 = vmatmul.mubr.msk.bf16.vlgmr.msra.gmra.mxu1 %vm1748_vm1, %v3372_v26 }
 0x16c   : > { %1835 = vmatpush1.bf16.msra.mxu1 %v2375_v8  ;;  %1785 = vmatmul.mubr.bf16.vlgmr.msra.gmra.mxu0 %v3374_v27  ;;  %v2359_v8 = vcombine.low %v931_v30, %v935_v31  ;;  %v909_v30 = vld [vmem:[%s2976_s13 + $0x98] sm:$0xff] }
 0x16d   : > { %1866 = vmatprep.mubr.bf16.mxu1 %v3370_v25  ;;  %1836 = vmatprep.subr.bf16.mxu1 %v2368_v29  ;;  %v1007_v29 = vld [vmem:[%s2976_s13 + $0x3a8] sm:$0xff]  ;;  %v913_v31 = vld [vmem:[%s2976_s13 + $0xb8] sm:$0xff] }
 0x16e   : > { %1890 = vmatpush1.bf16.msra.mxu0 %v2447_v13  ;;  %1907 = vmatprep.mubr.bf16.mxu0 %v2773_v0  ;;  %v2344_v13 = vcombine.high %v915_v40, %v919_v41  ;;  %v2340_v37 = vcombine.high %v909_v30, %v913_v31  ;;  %v2424_v40 = vcombine.high %v995_v38, %v999_v61  ;;  %v985_v38 = vld [vmem:[%s2976_s13 + $0x2f8] sm:$0xff] }
 0x16f   : > { %1971 = vmatprep.subr.bf16.mxu0 %v2450_v32  ;;  %v2439_v32 = vcombine.low %v1011_v15, %v1015_v16  ;;  %v1001_v15 = vld [vmem:[%s2976_s13 + $0x378] sm:$0xff] }
 0x170   : > { %1837 = vmatpush1.bf16.msra.mxu1 %v2367_v33  ;;  %v2347_v33 = vcombine.low %v917_v17, %v921_v18 }
 0x171   : > { %1838 = vmatprep.subr.bf16.mxu1 %v2360_v35  ;;  %v2432_v35 = vcombine.high %v1003_v45, %v1007_v29 }
 0x174   : > { %1839 = vmatpush1.bf16.msra.mxu1 %v2359_v8  ;;  %2454 = vmatmul.mubr.msk.bf16.vlgmr.msra.gmra.mxu0 %vm1748_vm1, %v3372_v26  ;;  %v905_v8 = vld [vmem:[%s2976_s13 + $0x78] sm:$0xff] }
 0x175   : > { %1840 = vmatprep.subr.bf16.mxu1 %v2352_v39  ;;  %1972 = vmatpush1.bf16.msra.mxu0 %v2449_v1  ;;  %v2431_v39 = vcombine.low %v1003_v45, %v1007_v29  ;;  %v2339_v1 = vcombine.low %v909_v30, %v913_v31  ;;  %v2332_v41 = vcombine.high %v901_v6, %v905_v8  ;;  %v993_v45 = vld [vmem:[%s2976_s13 + $0x338] sm:$0xff] }
 0x176   : > { %1989 = vmatprep.mubr.bf16.mxu0 %v2773_v0  ;;  %1998 = vmatprep.subr.bf16.mxu0 %v2380_v10  ;;  %v987_v10 = vld [vmem:[%s2976_s13 + $0x308] sm:$0xff]  ;;  %v2331_v44 = vcombine.low %v901_v6, %v905_v8 }
 0x178   : > { %1841 = vmatpush1.bf16.msra.mxu1 %v2351_v12  ;;  %v991_v12 = vld [vmem:[%s2976_s13 + $0x328] sm:$0xff] }
 0x179   : > { %1842 = vmatprep.subr.bf16.mxu1 %v2344_v13  ;;  %v893_v13 = vld [vmem:[%s2976_s13 + $0x18] sm:$0xff]  ;;  %v2416_v46 = vcombine.high %v987_v10, %v991_v12  ;;  %v2415_v52 = vcombine.low %v987_v10, %v991_v12 }
 0x17a   : > { %v2323_v3 = vcombine.low %v893_v13, %v897_v42  ;;  %v977_v10 = vld [vmem:[%s2976_s13 + $0x2b8] sm:$0xff] }
 0x17c   : > { %1843 = vmatpush1.bf16.msra.mxu1 %v2343_v47  ;;  %2455 = vmatmul.mubr.msk.bf16.vlgmr.msra.gmra.mxu0 %vm1748_vm1, %v3372_v26  ;;  %v2324_v47 = vcombine.high %v893_v13, %v897_v42 }
 0x17d   : > { %1999 = vmatpush1.bf16.msra.mxu0 %v2379_v48  ;;  %2030 = vmatprep.mubr.bf16.mxu0 %v3370_v25  ;;  %v979_v48 = vld [vmem:[%s2976_s13 + $0x2c8] sm:$0xff] }
 0x17e   : > { %1844 = vmatprep.subr.bf16.mxu1 %v2336_v49  ;;  %2000 = vmatprep.subr.bf16.mxu0 %v2372_v50  ;;  %v983_v49 = vld [vmem:[%s2976_s13 + $0x2e8] sm:$0xff]  ;;  %v1013_v50 = vld [vmem:[%s2976_s13 + $0x3d8] sm:$0xff] }
 0x17f   : > { %v2408_v53 = vcombine.high %v979_v48, %v983_v49  ;;  %v2407_v59 = vcombine.low %v979_v48, %v983_v49  ;;  %v2443_v60 = vcombine.low %v1013_v50, %v1017_v51  ;;  %v969_v48 = vld [vmem:[%s2976_s13 + $0x278] sm:$0xff] }
 0x180   : > { %1845 = vmatpush1.bf16.msra.mxu1 %v2335_v54  ;;  %v2444_v54 = vcombine.high %v1013_v50, %v1017_v51 }
 0x181   : > { %2001 = vmatpush1.bf16.msra.mxu0 %v2371_v55  ;;  %1846 = vmatprep.subr.bf16.mxu1 %v2328_v56  ;;  %v971_v55 = vld [vmem:[%s2976_s13 + $0x288] sm:$0xff] }
 0x182   : > { %2002 = vmatprep.subr.bf16.mxu0 %v2364_v57  ;;  %v975_v56 = vld [vmem:[%s2976_s13 + $0x2a8] sm:$0xff]  ;;  %v1005_v57 = vld [vmem:[%s2976_s13 + $0x398] sm:$0xff] }
 0x183   : > { %v2400_v62 = vcombine.high %v971_v55, %v975_v56  ;;  %v2399_v16 = vcombine.low %v971_v55, %v975_v56  ;;  %v2435_v17 = vcombine.low %v1005_v57, %v1009_v58  ;;  %v961_v55 = vld [vmem:[%s2976_s13 + $0x238] sm:$0xff] }
 0x184   : > { %1847 = vmatpush1.bf16.msra.mxu1 %v2327_v63  ;;  %v2436_v63 = vcombine.high %v1005_v57, %v1009_v58 }
 0x185   : > { %2003 = vmatpush1.bf16.msra.mxu0 %v2363_v9  ;;  %1848 = vmatprep.subr.bf16.mxu1 %v2320_v36  ;;  %v963_v9 = vld [vmem:[%s2976_s13 + $0x248] sm:$0xff] }
 0x186   : > { %2004 = vmatprep.subr.bf16.mxu0 %v2356_v14  ;;  %v967_v36 = vld [vmem:[%s2976_s13 + $0x268] sm:$0xff]  ;;  %v997_v14 = vld [vmem:[%s2976_s13 + $0x358] sm:$0xff] }
 0x187   : > { %v2392_v18 = vcombine.high %v963_v9, %v967_v36  ;;  %v2391_v29 = vcombine.low %v963_v9, %v967_v36  ;;  %v2427_v30 = vcombine.low %v997_v14, %v1001_v15  ;;  %v908_v36 = vld [vmem:[%s2976_s13 + $0x90] sm:$0xff] }
 0x188   : > { %1849 = vmatpush1.bf16.msra.mxu1 %v2319_v20  ;;  %v2428_v20 = vcombine.high %v997_v14, %v1001_v15  ;;  %v912_v14 = vld [vmem:[%s2976_s13 + $0xb0] sm:$0xff] }
 0x189   : > { %2005 = vmatpush1.bf16.msra.mxu0 %v2355_v21  ;;  %1850 = vmatprep.subr.bf16.mxu1 %v2440_v23  ;;  %v955_v21 = vld [vmem:[%s2976_s13 + $0x208] sm:$0xff] }
 0x18a   : > { %2006 = vmatprep.subr.bf16.mxu0 %v2348_v24  ;;  %v959_v23 = vld [vmem:[%s2976_s13 + $0x228] sm:$0xff]  ;;  %v989_v24 = vld [vmem:[%s2976_s13 + $0x318] sm:$0xff] }
 0x18b   : > { %v2384_v31 = vcombine.high %v955_v21, %v959_v23  ;;  %v2383_v61 = vcombine.low %v955_v21, %v959_v23  ;;  %v2419_v6 = vcombine.low %v989_v24, %v993_v45  ;;  %v892_v23 = vld [vmem:[%s2976_s13 + $0x10] sm:$0xff] }
 0x18c   : > { %1851 = vmatpush2.bf16.msra.mxu1 %v2439_v32  ;;  %v2420_v32 = vcombine.high %v989_v24, %v993_v45  ;;  %v896_v24 = vld [vmem:[%s2976_s13 + $0x30] sm:$0xff] }
 0x18d   : > { %2007 = vmatpush1.bf16.msra.mxu0 %v2347_v33  ;;  %1852 = vmatprep.subr.bf16.mxu1 %v2432_v35  ;;  %v948_v33 = vld [vmem:[%s2976_s13 + $0x1d0] sm:$0xff] }
 0x18e   : > { %2008 = vmatprep.subr.bf16.mxu0 %v2340_v37  ;;  %v952_v35 = vld [vmem:[%s2976_s13 + $0x1f0] sm:$0xff]  ;;  %v981_v37 = vld [vmem:[%s2976_s13 + $0x2d8] sm:$0xff] }
 0x18f   : > { %v2378_v8 = vcombine.high %v948_v33, %v952_v35  ;;  %v2377_v12 = vcombine.low %v948_v33, %v952_v35  ;;  %v2411_v13 = vcombine.low %v981_v37, %v985_v38  ;;  %v1004_v35 = vld [vmem:[%s2976_s13 + $0x390] sm:$0xff] }
 0x190   : > { %1853 = vmatpush2.bf16.msra.mxu1 %v2431_v39  ;;  %v2412_v39 = vcombine.high %v981_v37, %v985_v38  ;;  %v1008_v37 = vld [vmem:[%s2976_s13 + $0x3b0] sm:$0xff] }
 0x191   : > { %2009 = vmatpush1.bf16.msra.mxu0 %v2339_v1  ;;  %1854 = vmatprep.subr.bf16.mxu1 %v2424_v40  ;;  %v940_v1 = vld [vmem:[%s2976_s13 + $0x190] sm:$0xff] }
 0x192   : > { %2010 = vmatprep.subr.bf16.mxu0 %v2332_v41  ;;  %v944_v40 = vld [vmem:[%s2976_s13 + $0x1b0] sm:$0xff]  ;;  %v973_v41 = vld [vmem:[%s2976_s13 + $0x298] sm:$0xff] }
 0x193   : > { %v2370_v42 = vcombine.high %v940_v1, %v944_v40  ;;  %v2369_v49 = vcombine.low %v940_v1, %v944_v40  ;;  %v2403_v50 = vcombine.low %v973_v41, %v977_v10  ;;  %v988_v40 = vld [vmem:[%s2976_s13 + $0x310] sm:$0xff] }
 0x194   : > { %1855 = vmatpush2.bf16.msra.mxu1 %v2423_v43  ;;  %v2404_v43 = vcombine.high %v973_v41, %v977_v10  ;;  %v992_v41 = vld [vmem:[%s2976_s13 + $0x330] sm:$0xff] }
 0x195   : > { %2011 = vmatpush1.bf16.msra.mxu0 %v2331_v44  ;;  %1856 = vmatprep.subr.bf16.mxu1 %v2416_v46  ;;  %v932_v44 = vld [vmem:[%s2976_s13 + $0x150] sm:$0xff] }
 0x196   : > { %2012 = vmatprep.subr.bf16.mxu0 %v2324_v47  ;;  %v936_v46 = vld [vmem:[%s2976_s13 + $0x170] sm:$0xff]  ;;  %v965_v47 = vld [vmem:[%s2976_s13 + $0x258] sm:$0xff] }
 0x197   : > { %v2362_v51 = vcombine.high %v932_v44, %v936_v46  ;;  %v2361_v56 = vcombine.low %v932_v44, %v936_v46  ;;  %v972_v46 = vld [vmem:[%s2976_s13 + $0x290] sm:$0xff] }
 0x198   : > { %1857 = vmatpush2.bf16.msra.mxu1 %v2415_v52  ;;  %v2396_v52 = vcombine.high %v965_v47, %v969_v48 }
 0x199   : > { %2013 = vmatpush1.bf16.msra.mxu0 %v2323_v3  ;;  %1858 = vmatprep.subr.bf16.mxu1 %v2408_v53  ;;  %v924_v3 = vld [vmem:[%s2976_s13 + $0x110] sm:$0xff] }
 0x19a   : > { %2014 = vmatprep.subr.bf16.mxu0 %v2444_v54  ;;  %v928_v53 = vld [vmem:[%s2976_s13 + $0x130] sm:$0xff]  ;;  %v957_v54 = vld [vmem:[%s2976_s13 + $0x218] sm:$0xff] }
 0x19b   : > { %v2354_v57 = vcombine.high %v924_v3, %v928_v53  ;;  %v2388_v58 = vcombine.high %v957_v54, %v961_v55 }
 0x19c   : > { %1859 = vmatpush2.bf16.msra.mxu1 %v2407_v59  ;;  %v916_v59 = vld [vmem:[%s2976_s13 + $0xd0] sm:$0xff] }
 0x19d   : > { %2015 = vmatpush2.bf16.msra.mxu0 %v2443_v60  ;;  %1860 = vmatprep.subr.bf16.mxu1 %v2400_v62  ;;  %v920_v60 = vld [vmem:[%s2976_s13 + $0xf0] sm:$0xff]  ;;  %v2353_v62 = vcombine.low %v924_v3, %v928_v53 }
 0x19e   : > { %2016 = vmatprep.subr.bf16.mxu0 %v2436_v63  ;;  %v2387_v63 = vcombine.low %v957_v54, %v961_v55  ;;  %v2346_v9 = vcombine.high %v916_v59, %v920_v60  ;;  %v2345_v15 = vcombine.low %v916_v59, %v920_v60  ;;  %v956_v53 = vld [vmem:[%s2976_s13 + $0x210] sm:$0xff] }
 0x19f   : > { %v960_v54 = vld [vmem:[%s2976_s13 + $0x230] sm:$0xff] }
 0x1a0   : > { %1861 = vmatpush2.bf16.msra.mxu1 %v2399_v16  ;;  %v2338_v16 = vcombine.high %v908_v36, %v912_v14 }
 0x1a1   : > { %2017 = vmatpush2.bf16.msra.mxu0 %v2435_v17  ;;  %1862 = vmatprep.subr.bf16.mxu1 %v2392_v18  ;;  %v900_v17 = vld [vmem:[%s2976_s13 + $0x50] sm:$0xff] }
 0x1a2   : > { %2018 = vmatprep.subr.bf16.mxu0 %v2428_v20  ;;  %v904_v18 = vld [vmem:[%s2976_s13 + $0x70] sm:$0xff]  ;;  %v2337_v20 = vcombine.low %v908_v36, %v912_v14 }
 0x1a3   : > { %v2330_v21 = vcombine.high %v900_v17, %v904_v18  ;;  %v2329_v45 = vcombine.low %v900_v17, %v904_v18 }
 0x1a4   : > { %1863 = vmatpush2.bf16.msra.mxu1 %v2391_v29  ;;  %v2322_v29 = vcombine.high %v892_v23, %v896_v24 }
 0x1a5   : > { %2019 = vmatpush2.bf16.msra.mxu0 %v2427_v30  ;;  %1864 = vmatprep.subr.bf16.mxu1 %v2384_v31  ;;  %v1012_v30 = vld [vmem:[%s2976_s13 + $0x3d0] sm:$0xff] }
 0x1a6   : > { %2020 = vmatprep.subr.bf16.mxu0 %v2420_v32  ;;  %v1016_v31 = vld [vmem:[%s2976_s13 + $0x3f0] sm:$0xff]  ;;  %v2321_v32 = vcombine.low %v892_v23, %v896_v24 }
 0x1a7   : > { %v2442_v33 = vcombine.high %v1012_v30, %v1016_v31  ;;  %v2441_v38 = vcombine.low %v1012_v30, %v1016_v31 }
 0x1a8   : > { %1865 = vmatpush2.bf16.msra.mxu1 %v2383_v61  ;;  %v2434_v61 = vcombine.high %v1004_v35, %v1008_v37 }
 0x1a9   : > { %2021 = vmatpush2.bf16.msra.mxu0 %v2419_v6  ;;  %1916 = vmatprep.subr.bf16.mxu1 %v2378_v8  ;;  %v996_v6 = vld [vmem:[%s2976_s13 + $0x350] sm:$0xff] }
 0x1aa   : > { %2022 = vmatprep.subr.bf16.mxu0 %v2412_v39  ;;  %v1000_v8 = vld [vmem:[%s2976_s13 + $0x370] sm:$0xff]  ;;  %v2433_v39 = vcombine.low %v1004_v35, %v1008_v37 }
 0x1ab   : > { %1867 = vmatmul.mubr.bf16.vlgmr.msra.gmra.mxu1 %v3374_v27  ;;  %v2426_v1 = vcombine.high %v996_v6, %v1000_v8  ;;  %v2425_v10 = vcombine.low %v996_v6, %v1000_v8 }
 0x1ac   : > { %1917 = vmatpush1.bf16.msra.mxu1 %v2377_v12  ;;  %1948 = vmatprep.mubr.bf16.mxu1 %v3370_v25  ;;  %v2395_v25 = vcombine.low %v965_v47, %v969_v48  ;;  %v2418_v12 = vcombine.high %v988_v40, %v992_v41  ;;  %v976_v47 = vld [vmem:[%s2976_s13 + $0x2b0] sm:$0xff] }
 0x1ad   : > { %2023 = vmatpush2.bf16.msra.mxu0 %v2411_v13  ;;  %1918 = vmatprep.subr.bf16.mxu1 %v2370_v42  ;;  %v980_v13 = vld [vmem:[%s2976_s13 + $0x2d0] sm:$0xff] }
 0x1ae   : > { %2024 = vmatprep.subr.bf16.mxu0 %v2404_v43  ;;  %v984_v42 = vld [vmem:[%s2976_s13 + $0x2f0] sm:$0xff]  ;;  %v2417_v43 = vcombine.low %v988_v40, %v992_v41 }
 0x1af   : > { %v2410_v44 = vcombine.high %v980_v13, %v984_v42  ;;  %v2409_v48 = vcombine.low %v980_v13, %v984_v42 }
 0x1b0   : > { %1919 = vmatpush1.bf16.msra.mxu1 %v2369_v49  ;;  %v2402_v49 = vcombine.high %v972_v46, %v976_v47 }
 0x1b1   : > { %2025 = vmatpush2.bf16.msra.mxu0 %v2403_v50  ;;  %1920 = vmatprep.subr.bf16.mxu1 %v2362_v51  ;;  %v964_v50 = vld [vmem:[%s2976_s13 + $0x250] sm:$0xff] }
 0x1b2   : > { %2026 = vmatprep.subr.bf16.mxu0 %v2396_v52  ;;  %v968_v51 = vld [vmem:[%s2976_s13 + $0x270] sm:$0xff]  ;;  %v2401_v52 = vcombine.low %v972_v46, %v976_v47 }
 0x1b3   : > { %v2394_v3 = vcombine.high %v964_v50, %v968_v51  ;;  %v2393_v55 = vcombine.low %v964_v50, %v968_v51 }
 0x1b4   : > { %1921 = vmatpush1.bf16.msra.mxu1 %v2361_v56  ;;  %v2386_v56 = vcombine.high %v956_v53, %v960_v54 }
 0x1b5   : > { %2027 = vmatpush2.bf16.msra.mxu0 %v2395_v25  ;;  %1922 = vmatprep.subr.bf16.mxu1 %v2354_v57  ;;  %v1021_v25 = vld [vmem:[%s2976_s13 + $0x418] sm:$0xff] }
 0x1b6   : > { %2028 = vmatprep.subr.bf16.mxu0 %v2388_v58  ;;  %v1025_v57 = vld [vmem:[%s2976_s13 + $0x438] sm:$0xff]  ;;  %v2385_v58 = vcombine.low %v956_v53, %v960_v54 }
 0x1b7   : > { %v2452_v59 = vcombine.high %v1021_v25, %v1025_v57  ;;  %v2451_v60 = vcombine.low %v1021_v25, %v1025_v57 }
 0x1b8   : > { %1923 = vmatpush1.bf16.msra.mxu1 %v2353_v62  ;;  %v3497_v62 = vld [vmem:[%s308_s27] sm:$0xff] }
 0x1b9   : > { %2029 = vmatpush2.bf16.msra.mxu0 %v2387_v63  ;;  %1924 = vmatprep.subr.bf16.mxu1 %v2346_v9  ;;  %v1711_v63 = vrot.slane %v3497_v62, %v2985_v2  ;;  %v1715_v36 = vrot.slane %v3497_v62, %v2988_v4  ;;  %v1719_v40 = vrot.slane %v3497_v62, %v2991_v5 }
 0x1ba   : > { %v1723_v41 = vrot.slane %v3497_v62, %v2995_v7 }
 0x1bc   : > { %1925 = vmatpush1.bf16.msra.mxu1 %v2345_v15  ;;  %2031 = vmatmul.mubr.bf16.vlgmr.msra.gmra.mxu0 %v3374_v27 }
 0x1bd   : > { %1926 = vmatprep.subr.bf16.mxu1 %v2338_v16 }
 0x1c0   : > { %1927 = vmatpush1.bf16.msra.mxu1 %v2337_v20 }
 0x1c1   : > { %1928 = vmatprep.subr.bf16.mxu1 %v2330_v21 }
 0x1c4   : > { %1929 = vmatpush1.bf16.msra.mxu1 %v2329_v45 }
 0x1c5   : > { %1930 = vmatprep.subr.bf16.mxu1 %v2322_v29 }
 0x1c8   : > { %1931 = vmatpush1.bf16.msra.mxu1 %v2321_v32 }
 0x1c9   : > { %1932 = vmatprep.subr.bf16.mxu1 %v2442_v33 }
 0x1cc   : > { %1933 = vmatpush2.bf16.msra.mxu1 %v2441_v38 }
 0x1cd   : > { %1934 = vmatprep.subr.bf16.mxu1 %v2434_v61 }
 0x1d0   : > { %1935 = vmatpush2.bf16.msra.mxu1 %v2433_v39 }
 0x1d1   : > { %1936 = vmatprep.subr.bf16.mxu1 %v2426_v1 }
 0x1d4   : > { %1937 = vmatpush2.bf16.msra.mxu1 %v2425_v10 }
 0x1d5   : > { %1938 = vmatprep.subr.bf16.mxu1 %v2418_v12 }
 0x1d8   : > { %1939 = vmatpush2.bf16.msra.mxu1 %v2417_v43 }
 0x1d9   : > { %1940 = vmatprep.subr.bf16.mxu1 %v2410_v44 }
 0x1dc   : > { %1941 = vmatpush2.bf16.msra.mxu1 %v2409_v48 }
 0x1dd   : > { %1942 = vmatprep.subr.bf16.mxu1 %v2402_v49 }
 0x1e0   : > { %1943 = vmatpush2.bf16.msra.mxu1 %v2401_v52 }
 0x1e1   : > { %1944 = vmatprep.subr.bf16.mxu1 %v2394_v3 }
 0x1e4   : > { %1945 = vmatpush2.bf16.msra.mxu1 %v2393_v55 }
 0x1e5   : > { %1946 = vmatprep.subr.bf16.mxu1 %v2386_v56 }
 0x1e8   : > { %1947 = vmatpush2.bf16.msra.mxu1 %v2385_v58 }
 0x1e9   : > { %2053 = vmatprep.subr.bf16.mxu1 %v2452_v59 }
 0x1eb   : > { %1949 = vmatmul.mubr.bf16.vlgmr.msra.gmra.mxu1 %v3374_v27 }
 0x1ec   : > { %2054 = vmatpush1.bf16.msra.mxu1 %v2451_v60  ;;  %2071 = vmatprep.mubr.bf16.mxu1 %v2773_v0  ;;  %v1727_v60 = vrot.slane %v3497_v62, %v3005_v11 }
 0x1f3   : > { %2456 = vmatmul.mubr.msk.bf16.vlgmr.msra.gmra.mxu1 %vm1748_vm1, %v3372_v26 }
 0x22b   : > { %v1827_v9 = vpop.f32.mrf.mxu1 }
 0x22c   : > { %v1786_v14 = vpop.f32.mrf.mxu0 }
 0x22d   : > { %v1787_v27 = vadd.f32 %v1786_v14, %v1711_v63  ;;  %v1829_v15 = vpop.f32.mrf.mxu1  ;;  %v1731_v63 = vrot.slane %v3497_v62, %v3025_v19 }
 0x22e   : > { %v1788_v16 = vpop.f32.mrf.mxu0 }
 0x22f   : > { %v1828_v0 = vadd.f32 %v1827_v9, %v1787_v27  ;;  %v1789_v17 = vadd.f32 %v1788_v16, %v1715_v36  ;;  %v1831_v18 = vpop.f32.mrf.mxu1  ;;  %v1735_v27 = vrot.slane %v3497_v62, %v3035_v28 }
 0x230   : > { %v1790_v26 = vpop.f32.mrf.mxu0 }
 0x231   : > { %v2457_v20 = vmul.f32 -1.442695, %v1828_v0  ;;  %v1830_v21 = vadd.f32 %v1829_v15, %v1789_v17  ;;  %v1832_v23 = vpop.f32.mrf.mxu1  ;;  %v1739_v17 = vrot.slane %v3497_v62, %v3045_v34 }
 0x232   : > { %v1791_v24 = vpop.f32.mrf.mxu0 }
 0x233   : > { %2553 = vpow2.f32 %v2457_v20  ;;  %v2458_v45 = vmul.f32 -1.442695, %v1830_v21 }
 0x234   : > { %v1909_v29 = vpop.f32.mrf.mxu0 }
 0x235   : > { %2555 = vpow2.f32 %v2458_v45 }
 0x236   : > { %v1911_v2 = vpop.f32.mrf.mxu0 }
 0x238   : > { %v1913_v30 = vpop.f32.mrf.mxu0 }
 0x23a   : > { %v1914_v31 = vpop.f32.mrf.mxu0 }
 0x23c   : > { %v1991_v4 = vpop.f32.mrf.mxu0 }
 0x23e   : > { %v1993_v32 = vpop.f32.mrf.mxu0 }
 0x240   : > { %v2554_v33 = vpop.eup %2553  ;;  %v1995_v35 = vpop.f32.mrf.mxu0 }
 0x241   : > { %v2104_v37 = vadd.f32 1.0, %v2554_v33 }
 0x242   : > { %v2556_v38 = vpop.eup %2555  ;;  %v1996_v61 = vpop.f32.mrf.mxu0 }
 0x243   : > { %v2105_v6 = vadd.f32 1.0, %v2556_v38  ;;  %2557 = vrcp.f32 %v2104_v37 }
 0x245   : > { %2559 = vrcp.f32 %v2105_v6 }
 0x250   : > { %v2558_v8 = vpop.eup %2557 }
 0x252   : > { %v2560_v39 = vpop.eup %2559 }
 0x253   : > { %v2136_v1 = vcombine.low %v2558_v8, %v2560_v39 }
 0x255   : > { %v2146_v57 = vrot.slane %v2136_v1, %v3350_v22 }
 0x26b   : > { %v1868_v10 = vpop.f32.mrf.mxu1 }
 0x26c   : > { %v1869_v12 = vadd.f32 %v1868_v10, %v1719_v40 }
 0x26d   : > { %v1870_v13 = vpop.f32.mrf.mxu1 }
 0x26e   : > { %v1910_v42 = vadd.f32 %v1909_v29, %v1869_v12  ;;  %v1871_v43 = vadd.f32 %v1870_v13, %v1723_v41 }
 0x26f   : > { %v1872_v44 = vpop.f32.mrf.mxu1 }
 0x270   : > { %v2459_v46 = vmul.f32 -1.442695, %v1910_v42  ;;  %v1912_v47 = vadd.f32 %v1911_v2, %v1871_v43 }
 0x271   : > { %v1873_v48 = vpop.f32.mrf.mxu1 }
 0x272   : > { %2561 = vpow2.f32 %v2459_v46  ;;  %v2460_v49 = vmul.f32 -1.442695, %v1912_v47 }
 0x274   : > { %2563 = vpow2.f32 %v2460_v49 }
 0x27c   : > { %v2032_v50 = vpop.f32.mrf.mxu0 }
 0x27d   : > { %v2033_v21 = vadd.f32 %v2032_v50, %v1735_v27 }
 0x27e   : > { %v2034_v51 = vpop.f32.mrf.mxu0 }
 0x27f   : > { %v2562_v52 = vpop.eup %2561  ;;  %v2035_v19 = vadd.f32 %v2034_v51, %v1739_v17 }
 0x280   : > { %v2106_v3 = vadd.f32 1.0, %v2562_v52  ;;  %v2036_v5 = vpop.f32.mrf.mxu0 }
 0x281   : > { %v2564_v53 = vpop.eup %2563 }
 0x282   : > { %v2107_v54 = vadd.f32 1.0, %v2564_v53  ;;  %v2037_v7 = vpop.f32.mrf.mxu0  ;;  %2565 = vrcp.f32 %v2106_v3 }
 0x284   : > { %2567 = vrcp.f32 %v2107_v54 }
 0x28f   : > { %v2566_v55 = vpop.eup %2565 }
 0x291   : > { %v2568_v56 = vpop.eup %2567 }
 0x292   : > { %v2137_v25 = vcombine.low %v2566_v55, %v2568_v56 }
 0x294   : > { %v2153_v58 = vrot.slane %v2137_v25, %v3350_v22 }
 0x296   : > { %v2168_v59 = vcombine.low %v2146_v57, %v2153_v58 }
 0x298   : > { %v2176_v13 = vrot.slane %v2168_v59, %v3350_v22 }
 0x2ab   : > { %v1950_v9 = vpop.f32.mrf.mxu1 }
 0x2ac   : > { %v1951_v36 = vadd.f32 %v1950_v9, %v1727_v60 }
 0x2ad   : > { %v1952_v14 = vpop.f32.mrf.mxu1 }
 0x2ae   : > { %v1992_v15 = vadd.f32 %v1991_v4, %v1951_v36  ;;  %v1953_v16 = vadd.f32 %v1952_v14, %v1731_v63 }
 0x2af   : > { %v1954_v0 = vpop.f32.mrf.mxu1 }
 0x2b0   : > { %v2461_v18 = vmul.f32 -1.442695, %v1992_v15  ;;  %v1994_v26 = vadd.f32 %v1993_v32, %v1953_v16 }
 0x2b1   : > { %v1955_v20 = vpop.f32.mrf.mxu1 }
 0x2b2   : > { %v2462_v11 = vmul.f32 -1.442695, %v1994_v26  ;;  %2569 = vpow2.f32 %v2461_v18 }
 0x2b3   : > { %v2073_v23 = vpop.f32.mrf.mxu1 }
 0x2b4   : > { %2571 = vpow2.f32 %v2462_v11  ;;  %v2074_v24 = vadd.f32 %v2073_v23, %v2033_v21 }
 0x2b5   : > { %v2075_v45 = vpop.f32.mrf.mxu1 }
 0x2b6   : > { %v2463_v29 = vmul.f32 -1.442695, %v2074_v24  ;;  %v2076_v2 = vadd.f32 %v2075_v45, %v2035_v19 }
 0x2b7   : > { %v2077_v28 = vpop.f32.mrf.mxu1 }
 0x2b8   : > { %2573 = vpow2.f32 %v2463_v29  ;;  %v2464_v30 = vmul.f32 -1.442695, %v2076_v2 }
 0x2b9   : > { %v2078_v31 = vpop.f32.mrf.mxu1 }
 0x2ba   : > { %2575 = vpow2.f32 %v2464_v30 }
 0x2bf   : > { %v2570_v34 = vpop.eup %2569 }
 0x2c0   : > { %v2108_v32 = vadd.f32 1.0, %v2570_v34 }
 0x2c1   : > { %v2572_v62 = vpop.eup %2571 }
 0x2c2   : > { %v2109_v4 = vadd.f32 1.0, %v2572_v62 }
 0x2c4   : > { %2577 = vrcp.f32 %v2109_v4 }
 0x2c5   : > { %v2574_v33 = vpop.eup %2573  ;;  %2579 = vrcp.f32 %v2108_v32 }
 0x2c6   : > { %v2110_v35 = vadd.f32 1.0, %v2574_v33 }
 0x2c7   : > { %v2576_v37 = vpop.eup %2575 }
 0x2c8   : > { %v2111_v38 = vadd.f32 1.0, %v2576_v37  ;;  %2581 = vrcp.f32 %v2110_v35 }
 0x2ca   : > { %2583 = vrcp.f32 %v2111_v38 }
 0x2d1   : > { %v2578_v61 = vpop.eup %2577 }
 0x2d2   : > { %v2580_v6 = vpop.eup %2579 }
 0x2d3   : > { %v2138_v39 = vcombine.low %v2580_v6, %v2578_v61 }
 0x2d5   : > { %v2582_v8 = vpop.eup %2581  ;;  %v2160_v41 = vrot.slane %v2138_v39, %v3350_v22 }
 0x2d7   : > { %v2584_v1 = vpop.eup %2583 }
 0x2d8   : > { %v2139_v40 = vcombine.low %v2582_v8, %v2584_v1 }
 0x2da   : > { %v2167_v10 = vrot.slane %v2139_v40, %v3350_v22 }
 0x2dc   : > { %v2169_v12 = vcombine.low %v2160_v41, %v2167_v10 }
 0x2de   : > { %v2183_v42 = vrot.slane %v2169_v12, %v3350_v22 }
 0x2e0   : > { %v2184_v43 = vcombine.low %v2176_v13, %v2183_v42 }
 0x2e2   : > { %2186 = vst [vmem:[%s346_s25] sm:$0xff] %v2184_v43 }
 0x2e3 PF: > { %s3566_s24 = sld [smem:[#allocation13_spill]]  ;;  %s3568_s21 = smov %s2753_s22 }
 0x2e4   : > { %s3567_s8 = sld [smem:[#allocation14_spill]]  ;;  %s3569_s22 = smov %s2757_s23 }
 0x2e9   : > { %p18_p1 = scmp.ge.s32.totalorder %s3566_s24, 5  }
 0x2ea   : > { %s3570_s23 = smov %s3567_s8 }
 0x2eb   :  { %20 = sbr.rel (!%p18_p1) target bundleno = 5 (0x5), region = 108 }
 0x2f0   :  { %2207 = vsyncpa [#allocation3], 1 }
 0x2f1   :  { %2209 = vsyncpa [#allocation3 + $0x1], 1 }
 0x2f2   :  { %2210 = vsyncpa [#allocation5], 1 }
 0x2f3   :  { %2211 = vsyncpa [#allocation8], 1 }
 0x2f4   :  { %2213 = vsyncpa [#allocation8 + $0x1], 1 }

// kernel: server_model_forward.3
= control target key start
LH: loop header
LB: loop body
LE: loop exit
PB: predicated region body
PF: predicated region fallthrough
CT: control target
= control target key end

     0   :  { %s3376_s15 = smov 0   ;;  %s3378_s16 = smov 0   ;;  %s4093_s0 = inlined_call_operand.vmem [shape: f32[32,96], index: 0, kind: input, shape index: {}]   ;;  %s4094_s1 = inlined_call_operand.vmem [shape: f32[112,32], index: 1, kind: input, shape index: {}]   ;;  %s4095_s2 = inlined_call_operand.vmem [shape: bf16[7,96,1536], index: 2, kind: input, shape index: {}]   ;;  %s4096_s3 = inlined_call_operand.vmem [shape: f32[16,1536], index: 3, kind: input, shape index: {}]   ;;  %s4097_s4 = inlined_call_operand.vmem [shape: f32[16,1536], index: 4, kind: output, shape index: {}]  }
   0x1   :  { %s3380_s17 = smov 0  }
   0x2 LB: > { %s2632_s18 = sadd.s32 4294967295, %s3348_s17   ;;  %s3393_s19 = sadd.s32 1, %s3348_s17   ;;  %s3348_s17 = sphi %s3380_s17, %s4110_s17   ;;  %s3344_s16 = sphi %s3378_s16, %s4109_s16   ;;  %s3340_s15 = sphi %s3376_s15, %s4108_s15  }
   0x3   : > { %s60_s20 = ssub.s32 %s3348_s17, %s3393_s19  ;;  %s63_s21 = sadd.s32 1, %s3344_s16 }
   0x4   : > { %p61_p0 = scmp.eq.s32.totalorder %s60_s20, 0  ;;  %p70_p1 = scmp.ne.s32.totalorder %s3344_s16, %s3340_s15 }
   0x5   : > { %p71_p2 = scmp.eq.s32.totalorder %s3348_s17, 0  ;;  %p126_p3 = scmp.eq.s32.totalorder %s2632_s18, 2 }
   0x6   : > { %s3404_s22 = scalar_select %p61_p0, %s3344_s16, %s63_s21  }
   0x7   : > { %p3406_p4 = por %p71_p2, %p70_p1  ;;  %p3410_p5 = por %p126_p3, %p70_p1 }
   0x8   : > { %p2635_p6 = scmp.ge.s32.totalorder %s3348_s17, 3 }
   0xa   : > { %154 = sbr.rel (%p2635_p6) target bundleno = 112 (0x70), region = 24 }
   0xf   : > { %157 = sbr.rel (!%p3406_p4) target bundleno = 104 (0x68), region = 28  ;;  %s159_s25 = sand.u32 (%p3406_p4), 1, %s3344_s16  }
  0x10   : > { %s2989_s26 = sshll.u32 (%p3406_p4), %s3348_s17, 4  ;;  %s3047_s27 = smul.u32 (%p3406_p4), 1344, %s159_s25 }
  0x11   : > { %s3422_s30 = scalar_lea.vmem (%p3406_p4), %s4095_s2, %s2989_s26 }
  0x12   : > { %v177_v0 = vld [vmem:[%s3422_s30] sm:$0xff] (%p3406_p4)  ;;  %v179_v1 = vld [vmem:[%s3422_s30 + $0x8] sm:$0xff] (%p3406_p4)  ;;  %v181_v2 = vld [vmem:[%s3422_s30 + $0x30] sm:$0xff] (%p3406_p4)  ;;  %s3430_s5 = scalar_lea.vmem (%p3406_p4), [#allocation2], %s3047_s27 }
  0x13   : > { %v183_v3 = vld [vmem:[%s3422_s30 + $0x38] sm:$0xff] (%p3406_p4)  ;;  %v185_v4 = vld [vmem:[%s3422_s30 + $0x60] sm:$0xff] (%p3406_p4)  ;;  %v187_v5 = vld [vmem:[%s3422_s30 + $0x68] sm:$0xff] (%p3406_p4)  ;;  %178 = vst [vmem:[%s3430_s5] sm:$0xff] (%p3406_p4), %v177_v0 }
  0x14   : > { %180 = vst [vmem:[%s3430_s5 + $0x8] sm:$0xff] %v179_v1  ;;  %182 = vst [vmem:[%s3430_s5 + $0x10] sm:$0xff] %v181_v2  ;;  %v189_v6 = vld [vmem:[%s3422_s30 + $0x90] sm:$0xff]  ;;  %v191_v7 = vld [vmem:[%s3422_s30 + $0x98] sm:$0xff] }
  0x15   : > { %184 = vst [vmem:[%s3430_s5 + $0x18] sm:$0xff] %v183_v3  ;;  %186 = vst [vmem:[%s3430_s5 + $0x20] sm:$0xff] %v185_v4  ;;  %v193_v8 = vld [vmem:[%s3422_s30 + $0xc0] sm:$0xff]  ;;  %v195_v9 = vld [vmem:[%s3422_s30 + $0xc8] sm:$0xff] }
  0x16   : > { %188 = vst [vmem:[%s3430_s5 + $0x28] sm:$0xff] %v187_v5  ;;  %190 = vst [vmem:[%s3430_s5 + $0x30] sm:$0xff] %v189_v6  ;;  %v197_v10 = vld [vmem:[%s3422_s30 + $0xf0] sm:$0xff]  ;;  %v199_v11 = vld [vmem:[%s3422_s30 + $0xf8] sm:$0xff] }
  0x17   : > { %192 = vst [vmem:[%s3430_s5 + $0x38] sm:$0xff] %v191_v7  ;;  %194 = vst [vmem:[%s3430_s5 + $0x40] sm:$0xff] %v193_v8  ;;  %v201_v12 = vld [vmem:[%s3422_s30 + $0x120] sm:$0xff]  ;;  %v203_v13 = vld [vmem:[%s3422_s30 + $0x128] sm:$0xff] }
  0x18   : > { %196 = vst [vmem:[%s3430_s5 + $0x48] sm:$0xff] %v195_v9  ;;  %198 = vst [vmem:[%s3430_s5 + $0x50] sm:$0xff] %v197_v10  ;;  %v205_v14 = vld [vmem:[%s3422_s30 + $0x150] sm:$0xff]  ;;  %v207_v15 = vld [vmem:[%s3422_s30 + $0x158] sm:$0xff] }
  0x19   : > { %200 = vst [vmem:[%s3430_s5 + $0x58] sm:$0xff] %v199_v11  ;;  %202 = vst [vmem:[%s3430_s5 + $0x60] sm:$0xff] %v201_v12  ;;  %v209_v16 = vld [vmem:[%s3422_s30 + $0x180] sm:$0xff]  ;;  %v211_v17 = vld [vmem:[%s3422_s30 + $0x188] sm:$0xff] }
  0x1a   : > { %204 = vst [vmem:[%s3430_s5 + $0x68] sm:$0xff] %v203_v13  ;;  %206 = vst [vmem:[%s3430_s5 + $0x70] sm:$0xff] %v205_v14  ;;  %v213_v18 = vld [vmem:[%s3422_s30 + $0x1b0] sm:$0xff]  ;;  %v215_v19 = vld [vmem:[%s3422_s30 + $0x1b8] sm:$0xff] }
  0x1b   : > { %208 = vst [vmem:[%s3430_s5 + $0x78] sm:$0xff] %v207_v15  ;;  %210 = vst [vmem:[%s3430_s5 + $0x80] sm:$0xff] %v209_v16  ;;  %v217_v20 = vld [vmem:[%s3422_s30 + $0x1e0] sm:$0xff]  ;;  %v219_v21 = vld [vmem:[%s3422_s30 + $0x1e8] sm:$0xff] }
  0x1c   : > { %212 = vst [vmem:[%s3430_s5 + $0x88] sm:$0xff] %v211_v17  ;;  %214 = vst [vmem:[%s3430_s5 + $0x90] sm:$0xff] %v213_v18  ;;  %v221_v22 = vld [vmem:[%s3422_s30 + $0x210] sm:$0xff]  ;;  %v223_v23 = vld [vmem:[%s3422_s30 + $0x218] sm:$0xff] }
  0x1d   : > { %216 = vst [vmem:[%s3430_s5 + $0x98] sm:$0xff] %v215_v19  ;;  %218 = vst [vmem:[%s3430_s5 + $0xa0] sm:$0xff] %v217_v20  ;;  %v225_v24 = vld [vmem:[%s3422_s30 + $0x240] sm:$0xff]  ;;  %v227_v25 = vld [vmem:[%s3422_s30 + $0x248] sm:$0xff] }
  0x1e   : > { %220 = vst [vmem:[%s3430_s5 + $0xa8] sm:$0xff] %v219_v21  ;;  %222 = vst [vmem:[%s3430_s5 + $0xb0] sm:$0xff] %v221_v22  ;;  %v229_v26 = vld [vmem:[%s3422_s30 + $0x270] sm:$0xff]  ;;  %v231_v27 = vld [vmem:[%s3422_s30 + $0x278] sm:$0xff] }
  0x1f   : > { %224 = vst [vmem:[%s3430_s5 + $0xb8] sm:$0xff] %v223_v23  ;;  %226 = vst [vmem:[%s3430_s5 + $0xc0] sm:$0xff] %v225_v24  ;;  %v233_v28 = vld [vmem:[%s3422_s30 + $0x2a0] sm:$0xff]  ;;  %v235_v29 = vld [vmem:[%s3422_s30 + $0x2a8] sm:$0xff] }
  0x20   : > { %228 = vst [vmem:[%s3430_s5 + $0xc8] sm:$0xff] %v227_v25  ;;  %230 = vst [vmem:[%s3430_s5 + $0xd0] sm:$0xff] %v229_v26  ;;  %v237_v30 = vld [vmem:[%s3422_s30 + $0x2d0] sm:$0xff]  ;;  %v239_v31 = vld [vmem:[%s3422_s30 + $0x2d8] sm:$0xff] }
  0x21   : > { %232 = vst [vmem:[%s3430_s5 + $0xd8] sm:$0xff] %v231_v27  ;;  %234 = vst [vmem:[%s3430_s5 + $0xe0] sm:$0xff] %v233_v28  ;;  %v241_v32 = vld [vmem:[%s3422_s30 + $0x300] sm:$0xff]  ;;  %v243_v33 = vld [vmem:[%s3422_s30 + $0x308] sm:$0xff] }
  0x22   : > { %236 = vst [vmem:[%s3430_s5 + $0xe8] sm:$0xff] %v235_v29  ;;  %238 = vst [vmem:[%s3430_s5 + $0xf0] sm:$0xff] %v237_v30  ;;  %v245_v34 = vld [vmem:[%s3422_s30 + $0x330] sm:$0xff]  ;;  %v247_v35 = vld [vmem:[%s3422_s30 + $0x338] sm:$0xff] }
  0x23   : > { %240 = vst [vmem:[%s3430_s5 + $0xf8] sm:$0xff] %v239_v31  ;;  %242 = vst [vmem:[%s3430_s5 + $0x100] sm:$0xff] %v241_v32  ;;  %v249_v36 = vld [vmem:[%s3422_s30 + $0x360] sm:$0xff]  ;;  %v251_v37 = vld [vmem:[%s3422_s30 + $0x368] sm:$0xff] }
  0x24   : > { %244 = vst [vmem:[%s3430_s5 + $0x108] sm:$0xff] %v243_v33  ;;  %246 = vst [vmem:[%s3430_s5 + $0x110] sm:$0xff] %v245_v34  ;;  %v253_v38 = vld [vmem:[%s3422_s30 + $0x390] sm:$0xff]  ;;  %v255_v39 = vld [vmem:[%s3422_s30 + $0x398] sm:$0xff] }
  0x25   : > { %248 = vst [vmem:[%s3430_s5 + $0x118] sm:$0xff] %v247_v35  ;;  %250 = vst [vmem:[%s3430_s5 + $0x120] sm:$0xff] %v249_v36  ;;  %v257_v40 = vld [vmem:[%s3422_s30 + $0x3c0] sm:$0xff]  ;;  %v259_v41 = vld [vmem:[%s3422_s30 + $0x3c8] sm:$0xff] }
  0x26   : > { %252 = vst [vmem:[%s3430_s5 + $0x128] sm:$0xff] %v251_v37  ;;  %254 = vst [vmem:[%s3430_s5 + $0x130] sm:$0xff] %v253_v38  ;;  %v261_v42 = vld [vmem:[%s3422_s30 + $0x3f0] sm:$0xff]  ;;  %v263_v43 = vld [vmem:[%s3422_s30 + $0x3f8] sm:$0xff] }
  0x27   : > { %256 = vst [vmem:[%s3430_s5 + $0x138] sm:$0xff] %v255_v39  ;;  %258 = vst [vmem:[%s3430_s5 + $0x140] sm:$0xff] %v257_v40  ;;  %v265_v44 = vld [vmem:[%s3422_s30 + $0x420] sm:$0xff]  ;;  %v267_v45 = vld [vmem:[%s3422_s30 + $0x428] sm:$0xff] }
  0x28   : > { %260 = vst [vmem:[%s3430_s5 + $0x148] sm:$0xff] %v259_v41  ;;  %262 = vst [vmem:[%s3430_s5 + $0x150] sm:$0xff] %v261_v42  ;;  %v269_v46 = vld [vmem:[%s3422_s30 + $0x450] sm:$0xff]  ;;  %v271_v47 = vld [vmem:[%s3422_s30 + $0x458] sm:$0xff] }
  0x29   : > { %264 = vst [vmem:[%s3430_s5 + $0x158] sm:$0xff] %v263_v43  ;;  %266 = vst [vmem:[%s3430_s5 + $0x160] sm:$0xff] %v265_v44  ;;  %v273_v48 = vld [vmem:[%s3422_s30 + $0x480] sm:$0xff]  ;;  %v275_v49 = vld [vmem:[%s3422_s30 + $0x488] sm:$0xff] }
  0x2a   : > { %268 = vst [vmem:[%s3430_s5 + $0x168] sm:$0xff] %v267_v45  ;;  %270 = vst [vmem:[%s3430_s5 + $0x170] sm:$0xff] %v269_v46  ;;  %v277_v50 = vld [vmem:[%s3422_s30 + $0x4b0] sm:$0xff]  ;;  %v279_v51 = vld [vmem:[%s3422_s30 + $0x4b8] sm:$0xff] }
  0x2b   : > { %272 = vst [vmem:[%s3430_s5 + $0x178] sm:$0xff] %v271_v47  ;;  %274 = vst [vmem:[%s3430_s5 + $0x180] sm:$0xff] %v273_v48  ;;  %v281_v52 = vld [vmem:[%s3422_s30 + $0x4e0] sm:$0xff]  ;;  %v283_v53 = vld [vmem:[%s3422_s30 + $0x4e8] sm:$0xff] }
  0x2c   : > { %276 = vst [vmem:[%s3430_s5 + $0x188] sm:$0xff] %v275_v49  ;;  %278 = vst [vmem:[%s3430_s5 + $0x190] sm:$0xff] %v277_v50  ;;  %v285_v54 = vld [vmem:[%s3422_s30 + $0x510] sm:$0xff]  ;;  %v287_v55 = vld [vmem:[%s3422_s30 + $0x518] sm:$0xff] }
  0x2d   : > { %280 = vst [vmem:[%s3430_s5 + $0x198] sm:$0xff] %v279_v51  ;;  %282 = vst [vmem:[%s3430_s5 + $0x1a0] sm:$0xff] %v281_v52  ;;  %v289_v56 = vld [vmem:[%s3422_s30 + $0x540] sm:$0xff]  ;;  %v291_v57 = vld [vmem:[%s3422_s30 + $0x548] sm:$0xff] }
  0x2e   : > { %284 = vst [vmem:[%s3430_s5 + $0x1a8] sm:$0xff] %v283_v53  ;;  %286 = vst [vmem:[%s3430_s5 + $0x1b0] sm:$0xff] %v285_v54  ;;  %v293_v58 = vld [vmem:[%s3422_s30 + $0x570] sm:$0xff]  ;;  %v295_v59 = vld [vmem:[%s3422_s30 + $0x578] sm:$0xff] }
  0x2f   : > { %288 = vst [vmem:[%s3430_s5 + $0x1b8] sm:$0xff] %v287_v55  ;;  %290 = vst [vmem:[%s3430_s5 + $0x1c0] sm:$0xff] %v289_v56  ;;  %v297_v60 = vld [vmem:[%s3422_s30 + $0x5a0] sm:$0xff]  ;;  %v299_v61 = vld [vmem:[%s3422_s30 + $0x5a8] sm:$0xff] }
  0x30   : > { %292 = vst [vmem:[%s3430_s5 + $0x1c8] sm:$0xff] %v291_v57  ;;  %294 = vst [vmem:[%s3430_s5 + $0x1d0] sm:$0xff] %v293_v58  ;;  %v301_v62 = vld [vmem:[%s3422_s30 + $0x5d0] sm:$0xff]  ;;  %v303_v63 = vld [vmem:[%s3422_s30 + $0x5d8] sm:$0xff] }
  0x31   : > { %296 = vst [vmem:[%s3430_s5 + $0x1d8] sm:$0xff] %v295_v59  ;;  %298 = vst [vmem:[%s3430_s5 + $0x1e0] sm:$0xff] %v297_v60  ;;  %v305_v0 = vld [vmem:[%s3422_s30 + $0x600] sm:$0xff]  ;;  %v307_v1 = vld [vmem:[%s3422_s30 + $0x608] sm:$0xff] }
  0x32   : > { %300 = vst [vmem:[%s3430_s5 + $0x1e8] sm:$0xff] %v299_v61  ;;  %302 = vst [vmem:[%s3430_s5 + $0x1f0] sm:$0xff] %v301_v62  ;;  %v309_v2 = vld [vmem:[%s3422_s30 + $0x630] sm:$0xff]  ;;  %v311_v3 = vld [vmem:[%s3422_s30 + $0x638] sm:$0xff] }
  0x33   : > { %304 = vst [vmem:[%s3430_s5 + $0x1f8] sm:$0xff] %v303_v63  ;;  %306 = vst [vmem:[%s3430_s5 + $0x200] sm:$0xff] %v305_v0  ;;  %v313_v4 = vld [vmem:[%s3422_s30 + $0x660] sm:$0xff]  ;;  %v315_v5 = vld [vmem:[%s3422_s30 + $0x668] sm:$0xff] }
  0x34   : > { %308 = vst [vmem:[%s3430_s5 + $0x208] sm:$0xff] %v307_v1  ;;  %310 = vst [vmem:[%s3430_s5 + $0x210] sm:$0xff] %v309_v2  ;;  %v317_v6 = vld [vmem:[%s3422_s30 + $0x690] sm:$0xff]  ;;  %v319_v7 = vld [vmem:[%s3422_s30 + $0x698] sm:$0xff] }
  0x35   : > { %312 = vst [vmem:[%s3430_s5 + $0x218] sm:$0xff] %v311_v3  ;;  %314 = vst [vmem:[%s3430_s5 + $0x220] sm:$0xff] %v313_v4  ;;  %v321_v8 = vld [vmem:[%s3422_s30 + $0x6c0] sm:$0xff]  ;;  %v323_v9 = vld [vmem:[%s3422_s30 + $0x6c8] sm:$0xff] }
  0x36   : > { %316 = vst [vmem:[%s3430_s5 + $0x228] sm:$0xff] %v315_v5  ;;  %318 = vst [vmem:[%s3430_s5 + $0x230] sm:$0xff] %v317_v6  ;;  %v325_v10 = vld [vmem:[%s3422_s30 + $0x6f0] sm:$0xff]  ;;  %v327_v11 = vld [vmem:[%s3422_s30 + $0x6f8] sm:$0xff] }
  0x37   : > { %320 = vst [vmem:[%s3430_s5 + $0x238] sm:$0xff] %v319_v7  ;;  %322 = vst [vmem:[%s3430_s5 + $0x240] sm:$0xff] %v321_v8  ;;  %v329_v12 = vld [vmem:[%s3422_s30 + $0x720] sm:$0xff]  ;;  %v331_v13 = vld [vmem:[%s3422_s30 + $0x728] sm:$0xff] }
  0x38   : > { %324 = vst [vmem:[%s3430_s5 + $0x248] sm:$0xff] %v323_v9  ;;  %326 = vst [vmem:[%s3430_s5 + $0x250] sm:$0xff] %v325_v10  ;;  %v333_v14 = vld [vmem:[%s3422_s30 + $0x750] sm:$0xff]  ;;  %v335_v15 = vld [vmem:[%s3422_s30 + $0x758] sm:$0xff] }
  0x39   : > { %328 = vst [vmem:[%s3430_s5 + $0x258] sm:$0xff] %v327_v11  ;;  %330 = vst [vmem:[%s3430_s5 + $0x260] sm:$0xff] %v329_v12  ;;  %v337_v16 = vld [vmem:[%s3422_s30 + $0x780] sm:$0xff]  ;;  %v339_v17 = vld [vmem:[%s3422_s30 + $0x788] sm:$0xff] }
  0x3a   : > { %332 = vst [vmem:[%s3430_s5 + $0x268] sm:$0xff] %v331_v13  ;;  %334 = vst [vmem:[%s3430_s5 + $0x270] sm:$0xff] %v333_v14  ;;  %v341_v18 = vld [vmem:[%s3422_s30 + $0x7b0] sm:$0xff]  ;;  %v343_v19 = vld [vmem:[%s3422_s30 + $0x7b8] sm:$0xff] }
  0x3b   : > { %336 = vst [vmem:[%s3430_s5 + $0x278] sm:$0xff] %v335_v15  ;;  %338 = vst [vmem:[%s3430_s5 + $0x280] sm:$0xff] %v337_v16  ;;  %v345_v20 = vld [vmem:[%s3422_s30 + $0x7e0] sm:$0xff]  ;;  %v347_v21 = vld [vmem:[%s3422_s30 + $0x7e8] sm:$0xff] }
  0x3c   : > { %340 = vst [vmem:[%s3430_s5 + $0x288] sm:$0xff] %v339_v17  ;;  %342 = vst [vmem:[%s3430_s5 + $0x290] sm:$0xff] %v341_v18  ;;  %v349_v22 = vld [vmem:[%s3422_s30 + $0x810] sm:$0xff]  ;;  %v351_v23 = vld [vmem:[%s3422_s30 + $0x818] sm:$0xff] }
  0x3d   : > { %344 = vst [vmem:[%s3430_s5 + $0x298] sm:$0xff] %v343_v19  ;;  %346 = vst [vmem:[%s3430_s5 + $0x2a0] sm:$0xff] %v345_v20  ;;  %v353_v24 = vld [vmem:[%s3422_s30 + $0x840] sm:$0xff]  ;;  %v355_v25 = vld [vmem:[%s3422_s30 + $0x848] sm:$0xff] }
  0x3e   : > { %348 = vst [vmem:[%s3430_s5 + $0x2a8] sm:$0xff] %v347_v21  ;;  %350 = vst [vmem:[%s3430_s5 + $0x2b0] sm:$0xff] %v349_v22  ;;  %v357_v26 = vld [vmem:[%s3422_s30 + $0x870] sm:$0xff]  ;;  %v359_v27 = vld [vmem:[%s3422_s30 + $0x878] sm:$0xff] }
  0x3f   : > { %352 = vst [vmem:[%s3430_s5 + $0x2b8] sm:$0xff] %v351_v23  ;;  %354 = vst [vmem:[%s3430_s5 + $0x2c0] sm:$0xff] %v353_v24  ;;  %v361_v28 = vld [vmem:[%s3422_s30 + $0x8a0] sm:$0xff]  ;;  %v363_v29 = vld [vmem:[%s3422_s30 + $0x8a8] sm:$0xff] }
  0x40   : > { %356 = vst [vmem:[%s3430_s5 + $0x2c8] sm:$0xff] %v355_v25  ;;  %358 = vst [vmem:[%s3430_s5 + $0x2d0] sm:$0xff] %v357_v26  ;;  %v365_v30 = vld [vmem:[%s3422_s30 + $0x8d0] sm:$0xff]  ;;  %v367_v31 = vld [vmem:[%s3422_s30 + $0x8d8] sm:$0xff] }
  0x41   : > { %360 = vst [vmem:[%s3430_s5 + $0x2d8] sm:$0xff] %v359_v27  ;;  %362 = vst [vmem:[%s3430_s5 + $0x2e0] sm:$0xff] %v361_v28  ;;  %v369_v32 = vld [vmem:[%s3422_s30 + $0x900] sm:$0xff]  ;;  %v371_v33 = vld [vmem:[%s3422_s30 + $0x908] sm:$0xff] }
  0x42   : > { %364 = vst [vmem:[%s3430_s5 + $0x2e8] sm:$0xff] %v363_v29  ;;  %366 = vst [vmem:[%s3430_s5 + $0x2f0] sm:$0xff] %v365_v30  ;;  %v373_v34 = vld [vmem:[%s3422_s30 + $0x930] sm:$0xff]  ;;  %v375_v35 = vld [vmem:[%s3422_s30 + $0x938] sm:$0xff] }
  0x43   : > { %368 = vst [vmem:[%s3430_s5 + $0x2f8] sm:$0xff] %v367_v31  ;;  %370 = vst [vmem:[%s3430_s5 + $0x300] sm:$0xff] %v369_v32  ;;  %v377_v36 = vld [vmem:[%s3422_s30 + $0x960] sm:$0xff]  ;;  %v379_v37 = vld [vmem:[%s3422_s30 + $0x968] sm:$0xff] }
  0x44   : > { %372 = vst [vmem:[%s3430_s5 + $0x308] sm:$0xff] %v371_v33  ;;  %374 = vst [vmem:[%s3430_s5 + $0x310] sm:$0xff] %v373_v34  ;;  %v381_v38 = vld [vmem:[%s3422_s30 + $0x990] sm:$0xff]  ;;  %v383_v39 = vld [vmem:[%s3422_s30 + $0x998] sm:$0xff] }
  0x45   : > { %376 = vst [vmem:[%s3430_s5 + $0x318] sm:$0xff] %v375_v35  ;;  %378 = vst [vmem:[%s3430_s5 + $0x320] sm:$0xff] %v377_v36  ;;  %v385_v40 = vld [vmem:[%s3422_s30 + $0x9c0] sm:$0xff]  ;;  %v387_v41 = vld [vmem:[%s3422_s30 + $0x9c8] sm:$0xff] }
  0x46   : > { %380 = vst [vmem:[%s3430_s5 + $0x328] sm:$0xff] %v379_v37  ;;  %382 = vst [vmem:[%s3430_s5 + $0x330] sm:$0xff] %v381_v38  ;;  %v389_v42 = vld [vmem:[%s3422_s30 + $0x9f0] sm:$0xff]  ;;  %v391_v43 = vld [vmem:[%s3422_s30 + $0x9f8] sm:$0xff] }
  0x47   : > { %384 = vst [vmem:[%s3430_s5 + $0x338] sm:$0xff] %v383_v39  ;;  %386 = vst [vmem:[%s3430_s5 + $0x340] sm:$0xff] %v385_v40  ;;  %v393_v44 = vld [vmem:[%s3422_s30 + $0xa20] sm:$0xff]  ;;  %v395_v45 = vld [vmem:[%s3422_s30 + $0xa28] sm:$0xff] }
  0x48   : > { %388 = vst [vmem:[%s3430_s5 + $0x348] sm:$0xff] %v387_v41  ;;  %390 = vst [vmem:[%s3430_s5 + $0x350] sm:$0xff] %v389_v42  ;;  %v397_v46 = vld [vmem:[%s3422_s30 + $0xa50] sm:$0xff]  ;;  %v399_v47 = vld [vmem:[%s3422_s30 + $0xa58] sm:$0xff] }
  0x49   : > { %392 = vst [vmem:[%s3430_s5 + $0x358] sm:$0xff] %v391_v43  ;;  %394 = vst [vmem:[%s3430_s5 + $0x360] sm:$0xff] %v393_v44  ;;  %v401_v48 = vld [vmem:[%s3422_s30 + $0xa80] sm:$0xff]  ;;  %v403_v49 = vld [vmem:[%s3422_s30 + $0xa88] sm:$0xff] }
  0x4a   : > { %396 = vst [vmem:[%s3430_s5 + $0x368] sm:$0xff] %v395_v45  ;;  %398 = vst [vmem:[%s3430_s5 + $0x370] sm:$0xff] %v397_v46  ;;  %v405_v50 = vld [vmem:[%s3422_s30 + $0xab0] sm:$0xff]  ;;  %v407_v51 = vld [vmem:[%s3422_s30 + $0xab8] sm:$0xff] }
  0x4b   : > { %400 = vst [vmem:[%s3430_s5 + $0x378] sm:$0xff] %v399_v47  ;;  %402 = vst [vmem:[%s3430_s5 + $0x380] sm:$0xff] %v401_v48  ;;  %v409_v52 = vld [vmem:[%s3422_s30 + $0xae0] sm:$0xff]  ;;  %v411_v53 = vld [vmem:[%s3422_s30 + $0xae8] sm:$0xff] }
  0x4c   : > { %404 = vst [vmem:[%s3430_s5 + $0x388] sm:$0xff] %v403_v49  ;;  %406 = vst [vmem:[%s3430_s5 + $0x390] sm:$0xff] %v405_v50  ;;  %v413_v54 = vld [vmem:[%s3422_s30 + $0xb10] sm:$0xff]  ;;  %v415_v55 = vld [vmem:[%s3422_s30 + $0xb18] sm:$0xff] }
  0x4d   : > { %408 = vst [vmem:[%s3430_s5 + $0x398] sm:$0xff] %v407_v51  ;;  %410 = vst [vmem:[%s3430_s5 + $0x3a0] sm:$0xff] %v409_v52  ;;  %v417_v56 = vld [vmem:[%s3422_s30 + $0xb40] sm:$0xff]  ;;  %v419_v57 = vld [vmem:[%s3422_s30 + $0xb48] sm:$0xff] }
  0x4e   : > { %412 = vst [vmem:[%s3430_s5 + $0x3a8] sm:$0xff] %v411_v53  ;;  %414 = vst [vmem:[%s3430_s5 + $0x3b0] sm:$0xff] %v413_v54  ;;  %v421_v58 = vld [vmem:[%s3422_s30 + $0xb70] sm:$0xff]  ;;  %v423_v59 = vld [vmem:[%s3422_s30 + $0xb78] sm:$0xff] }
  0x4f   : > { %416 = vst [vmem:[%s3430_s5 + $0x3b8] sm:$0xff] %v415_v55  ;;  %418 = vst [vmem:[%s3430_s5 + $0x3c0] sm:$0xff] %v417_v56  ;;  %v425_v60 = vld [vmem:[%s3422_s30 + $0xba0] sm:$0xff]  ;;  %v427_v61 = vld [vmem:[%s3422_s30 + $0xba8] sm:$0xff] }
  0x50   : > { %420 = vst [vmem:[%s3430_s5 + $0x3c8] sm:$0xff] %v419_v57  ;;  %422 = vst [vmem:[%s3430_s5 + $0x3d0] sm:$0xff] %v421_v58  ;;  %v429_v62 = vld [vmem:[%s3422_s30 + $0xbd0] sm:$0xff]  ;;  %v431_v63 = vld [vmem:[%s3422_s30 + $0xbd8] sm:$0xff] }
  0x51   : > { %424 = vst [vmem:[%s3430_s5 + $0x3d8] sm:$0xff] %v423_v59  ;;  %426 = vst [vmem:[%s3430_s5 + $0x3e0] sm:$0xff] %v425_v60  ;;  %v433_v0 = vld [vmem:[%s3422_s30 + $0xc00] sm:$0xff]  ;;  %v435_v1 = vld [vmem:[%s3422_s30 + $0xc08] sm:$0xff] }
  0x52   : > { %428 = vst [vmem:[%s3430_s5 + $0x3e8] sm:$0xff] %v427_v61  ;;  %430 = vst [vmem:[%s3430_s5 + $0x3f0] sm:$0xff] %v429_v62  ;;  %v437_v2 = vld [vmem:[%s3422_s30 + $0xc30] sm:$0xff]  ;;  %v439_v3 = vld [vmem:[%s3422_s30 + $0xc38] sm:$0xff] }
  0x53   : > { %432 = vst [vmem:[%s3430_s5 + $0x3f8] sm:$0xff] %v431_v63  ;;  %434 = vst [vmem:[%s3430_s5 + $0x400] sm:$0xff] %v433_v0  ;;  %v441_v4 = vld [vmem:[%s3422_s30 + $0xc60] sm:$0xff]  ;;  %v443_v5 = vld [vmem:[%s3422_s30 + $0xc68] sm:$0xff] }
  0x54   : > { %436 = vst [vmem:[%s3430_s5 + $0x408] sm:$0xff] %v435_v1  ;;  %438 = vst [vmem:[%s3430_s5 + $0x410] sm:$0xff] %v437_v2  ;;  %v445_v6 = vld [vmem:[%s3422_s30 + $0xc90] sm:$0xff]  ;;  %v447_v7 = vld [vmem:[%s3422_s30 + $0xc98] sm:$0xff] }
  0x55   : > { %440 = vst [vmem:[%s3430_s5 + $0x418] sm:$0xff] %v439_v3  ;;  %442 = vst [vmem:[%s3430_s5 + $0x420] sm:$0xff] %v441_v4  ;;  %v449_v8 = vld [vmem:[%s3422_s30 + $0xcc0] sm:$0xff]  ;;  %v451_v9 = vld [vmem:[%s3422_s30 + $0xcc8] sm:$0xff] }
  0x56   : > { %444 = vst [vmem:[%s3430_s5 + $0x428] sm:$0xff] %v443_v5  ;;  %446 = vst [vmem:[%s3430_s5 + $0x430] sm:$0xff] %v445_v6  ;;  %v453_v10 = vld [vmem:[%s3422_s30 + $0xcf0] sm:$0xff]  ;;  %v455_v11 = vld [vmem:[%s3422_s30 + $0xcf8] sm:$0xff] }
  0x57   : > { %448 = vst [vmem:[%s3430_s5 + $0x438] sm:$0xff] %v447_v7  ;;  %450 = vst [vmem:[%s3430_s5 + $0x440] sm:$0xff] %v449_v8  ;;  %v457_v12 = vld [vmem:[%s3422_s30 + $0xd20] sm:$0xff]  ;;  %v459_v13 = vld [vmem:[%s3422_s30 + $0xd28] sm:$0xff] }
  0x58   : > { %452 = vst [vmem:[%s3430_s5 + $0x448] sm:$0xff] %v451_v9  ;;  %454 = vst [vmem:[%s3430_s5 + $0x450] sm:$0xff] %v453_v10  ;;  %v461_v14 = vld [vmem:[%s3422_s30 + $0xd50] sm:$0xff]  ;;  %v463_v15 = vld [vmem:[%s3422_s30 + $0xd58] sm:$0xff] }
  0x59   : > { %456 = vst [vmem:[%s3430_s5 + $0x458] sm:$0xff] %v455_v11  ;;  %458 = vst [vmem:[%s3430_s5 + $0x460] sm:$0xff] %v457_v12  ;;  %v465_v16 = vld [vmem:[%s3422_s30 + $0xd80] sm:$0xff]  ;;  %v467_v17 = vld [vmem:[%s3422_s30 + $0xd88] sm:$0xff] }
  0x5a   : > { %460 = vst [vmem:[%s3430_s5 + $0x468] sm:$0xff] %v459_v13  ;;  %462 = vst [vmem:[%s3430_s5 + $0x470] sm:$0xff] %v461_v14  ;;  %v469_v18 = vld [vmem:[%s3422_s30 + $0xdb0] sm:$0xff]  ;;  %v471_v19 = vld [vmem:[%s3422_s30 + $0xdb8] sm:$0xff] }
  0x5b   : > { %464 = vst [vmem:[%s3430_s5 + $0x478] sm:$0xff] %v463_v15  ;;  %466 = vst [vmem:[%s3430_s5 + $0x480] sm:$0xff] %v465_v16  ;;  %v473_v20 = vld [vmem:[%s3422_s30 + $0xde0] sm:$0xff]  ;;  %v475_v21 = vld [vmem:[%s3422_s30 + $0xde8] sm:$0xff] }
  0x5c   : > { %468 = vst [vmem:[%s3430_s5 + $0x488] sm:$0xff] %v467_v17  ;;  %470 = vst [vmem:[%s3430_s5 + $0x490] sm:$0xff] %v469_v18  ;;  %v477_v22 = vld [vmem:[%s3422_s30 + $0xe10] sm:$0xff]  ;;  %v479_v23 = vld [vmem:[%s3422_s30 + $0xe18] sm:$0xff] }
  0x5d   : > { %472 = vst [vmem:[%s3430_s5 + $0x498] sm:$0xff] %v471_v19  ;;  %474 = vst [vmem:[%s3430_s5 + $0x4a0] sm:$0xff] %v473_v20  ;;  %v481_v24 = vld [vmem:[%s3422_s30 + $0xe40] sm:$0xff]  ;;  %v483_v25 = vld [vmem:[%s3422_s30 + $0xe48] sm:$0xff] }
  0x5e   : > { %476 = vst [vmem:[%s3430_s5 + $0x4a8] sm:$0xff] %v475_v21  ;;  %478 = vst [vmem:[%s3430_s5 + $0x4b0] sm:$0xff] %v477_v22  ;;  %v485_v26 = vld [vmem:[%s3422_s30 + $0xe70] sm:$0xff]  ;;  %v487_v27 = vld [vmem:[%s3422_s30 + $0xe78] sm:$0xff] }
  0x5f   : > { %480 = vst [vmem:[%s3430_s5 + $0x4b8] sm:$0xff] %v479_v23  ;;  %482 = vst [vmem:[%s3430_s5 + $0x4c0] sm:$0xff] %v481_v24  ;;  %v489_v28 = vld [vmem:[%s3422_s30 + $0xea0] sm:$0xff]  ;;  %v491_v29 = vld [vmem:[%s3422_s30 + $0xea8] sm:$0xff] }
  0x60   : > { %484 = vst [vmem:[%s3430_s5 + $0x4c8] sm:$0xff] %v483_v25  ;;  %486 = vst [vmem:[%s3430_s5 + $0x4d0] sm:$0xff] %v485_v26  ;;  %v493_v30 = vld [vmem:[%s3422_s30 + $0xed0] sm:$0xff]  ;;  %v495_v31 = vld [vmem:[%s3422_s30 + $0xed8] sm:$0xff] }
  0x61   : > { %488 = vst [vmem:[%s3430_s5 + $0x4d8] sm:$0xff] %v487_v27  ;;  %490 = vst [vmem:[%s3430_s5 + $0x4e0] sm:$0xff] %v489_v28  ;;  %v497_v32 = vld [vmem:[%s3422_s30 + $0xf00] sm:$0xff]  ;;  %v499_v33 = vld [vmem:[%s3422_s30 + $0xf08] sm:$0xff] }
  0x62   : > { %492 = vst [vmem:[%s3430_s5 + $0x4e8] sm:$0xff] %v491_v29  ;;  %494 = vst [vmem:[%s3430_s5 + $0x4f0] sm:$0xff] %v493_v30  ;;  %v501_v34 = vld [vmem:[%s3422_s30 + $0xf30] sm:$0xff]  ;;  %v503_v35 = vld [vmem:[%s3422_s30 + $0xf38] sm:$0xff] }
  0x63   : > { %496 = vst [vmem:[%s3430_s5 + $0x4f8] sm:$0xff] %v495_v31  ;;  %498 = vst [vmem:[%s3430_s5 + $0x500] sm:$0xff] %v497_v32  ;;  %v505_v36 = vld [vmem:[%s3422_s30 + $0xf60] sm:$0xff]  ;;  %v507_v37 = vld [vmem:[%s3422_s30 + $0xf68] sm:$0xff] }
  0x64   : > { %500 = vst [vmem:[%s3430_s5 + $0x508] sm:$0xff] %v499_v33  ;;  %502 = vst [vmem:[%s3430_s5 + $0x510] sm:$0xff] %v501_v34  ;;  %v509_v38 = vld [vmem:[%s3422_s30 + $0xf90] sm:$0xff]  ;;  %v511_v39 = vld [vmem:[%s3422_s30 + $0xf98] sm:$0xff] }
  0x65   : > { %504 = vst [vmem:[%s3430_s5 + $0x518] sm:$0xff] %v503_v35  ;;  %506 = vst [vmem:[%s3430_s5 + $0x520] sm:$0xff] %v505_v36 }
  0x66   : > { %508 = vst [vmem:[%s3430_s5 + $0x528] sm:$0xff] %v507_v37  ;;  %510 = vst [vmem:[%s3430_s5 + $0x530] sm:$0xff] %v509_v38 }
  0x67   : > { %512 = vst [vmem:[%s3430_s5 + $0x538] sm:$0xff] %v511_v39 }
  0x68 PF: > { %518 = sbr.rel (!%p3406_p4) target bundleno = 112 (0x70), region = 51  ;;  %s520_s6 = sand.u32 (%p3406_p4), 1, %s3344_s16  }
  0x69   : > { %s2990_s7 = sshll.u32 (%p3406_p4), %s3348_s17, 5  ;;  %s2638_s8 = sshll.u32 (%p3406_p4), %s520_s6, 6 }
  0x6a   : > { %s525_s11 = scalar_lea.vmem (%p3406_p4), %s4096_s3, %s2990_s7  ;;  %s522_s12 = scalar_lea.vmem (%p3406_p4), [#allocation3], %s2638_s8 }
  0x6b   : > { %v538_v40 = vld [vmem:[%s525_s11] sm:$0xff] (%p3406_p4)  ;;  %v540_v41 = vld [vmem:[%s525_s11 + $0x8] sm:$0xff] (%p3406_p4)  ;;  %v542_v42 = vld [vmem:[%s525_s11 + $0x10] sm:$0xff] (%p3406_p4) }
  0x6c   : > { %539 = vst [vmem:[%s522_s12] sm:$0xff] (%p3406_p4), %v538_v40  ;;  %541 = vst [vmem:[%s522_s12 + $0x8] sm:$0xff] (%p3406_p4), %v540_v41  ;;  %v544_v43 = vld [vmem:[%s525_s11 + $0x18] sm:$0xff] (%p3406_p4)  ;;  %v546_v44 = vld [vmem:[%s525_s11 + $0x60] sm:$0xff] (%p3406_p4) }
  0x6d   : > { %543 = vst [vmem:[%s522_s12 + $0x10] sm:$0xff] %v542_v42  ;;  %v548_v45 = vld [vmem:[%s525_s11 + $0x68] sm:$0xff]  ;;  %545 = vst [vmem:[%s522_s12 + $0x18] sm:$0xff] %v544_v43  ;;  %v550_v46 = vld [vmem:[%s525_s11 + $0x70] sm:$0xff] }
  0x6e   : > { %547 = vst [vmem:[%s522_s12 + $0x20] sm:$0xff] %v546_v44  ;;  %549 = vst [vmem:[%s522_s12 + $0x28] sm:$0xff] %v548_v45  ;;  %v552_v47 = vld [vmem:[%s525_s11 + $0x78] sm:$0xff] }
  0x6f   : > { %551 = vst [vmem:[%s522_s12 + $0x30] sm:$0xff] %v550_v46  ;;  %553 = vst [vmem:[%s522_s12 + $0x38] sm:$0xff] %v552_v47 }
  0x70 PF: > { %p2641_p7 = scmp.ge.s32.totalorder %s3348_s17, 1  ;;  %p558_p8 = scmp.lt.s32.totalorder %s3348_s17, 4 }
  0x72   : > { %p559_p9 = pnand %p2641_p7, %p558_p8 }
  0x74   : > { %562 = sbr.rel (%p559_p9) target bundleno = 681 (0x2a9), region = 74 }
  0x79   : > { %v621_v48 = vld [vmem:[%s4093_s0 + $0x18] sm:$0xff]  ;;  %v620_v49 = vld [vmem:[%s4093_s0 + $0x10] sm:$0xff]  ;;  %vm622_vm0 = vcmask 261120   ;;  %s565_s23 = sand.u32 1, %s3340_s15   ;;  %v604_v50 = vld [vmem:[%s4094_s1] sm:$0xff]  ;;  %v3350_v28 = vmov 0  }
  0x7a   : > { %3010 = vmatprep.subr.mxu0 %v621_v48  ;;  %3039 = vmatprep.subr.mxu1 %v621_v48  ;;  %s3048_s27 = smul.u32 1344, %s565_s23  ;;  %v619_v51 = vld [vmem:[%s4093_s0 + $0x8] sm:$0xff]  ;;  %v618_v52 = vld [vmem:[%s4093_s0] sm:$0xff]  ;;  %v606_v54 = vld [vmem:[%s4094_s1 + $0x10] sm:$0xff]  ;;  %vm959_vm1 = vcmask 785408  }
  0x7b   : > { %3011 = vmatpush3.msra.mxu0 %v621_v48  ;;  %3018 = vmatprep.mubr.msk.f32.mxu0 %vm622_vm0, %v604_v50  ;;  %v605_v53 = vld [vmem:[%s4094_s1 + $0x8] sm:$0xff]  ;;  %v616_v55 = vld [vmem:[%s4094_s1 + $0x60] sm:$0xff]  ;;  %v607_v58 = vld [vmem:[%s4094_s1 + $0x18] sm:$0xff] }
  0x7c   : > { %3012 = vmatprep.subr.mxu0 %v620_v49  ;;  %3043 = vmatpush3.msra.mxu1 %v621_v48  ;;  %v617_v56 = vld [vmem:[%s4094_s1 + $0x68] sm:$0xff]  ;;  %s3802_s14 = scalar_lea.vmem [#allocation2], %s3048_s27  ;;  %v608_v61 = vld [vmem:[%s4094_s1 + $0x20] sm:$0xff]  ;;  %v610_v3 = vld [vmem:[%s4094_s1 + $0x30] sm:$0xff] }
  0x7d   : > { %3013 = vmatpush3.msra.mxu0 %v620_v49  ;;  %3040 = vmatprep.subr.mxu1 %v620_v49  ;;  %v3076_v57 = vld [vmem:[%s3802_s14 + $0xa4] ss:$16 sps:$4 sm:$0xff]   ;;  %v3074_v59 = vld [vmem:[%s3802_s14 + $0xa0] ss:$16 sps:$4 sm:$0xff]   ;;  %v3079_v60 = vld [vmem:[%s3802_s14 + $0xac] ss:$16 sps:$4 sm:$0xff]  }
  0x7e   : > { %3014 = vmatprep.subr.mxu0 %v619_v51  ;;  %3044 = vmatpush3.msra.mxu1 %v620_v49  ;;  %v3082_v62 = vld [vmem:[%s3802_s14 + $0x84] ss:$16 sps:$4 sm:$0xff]   ;;  %v3077_v63 = vld [vmem:[%s3802_s14 + $0xa8] ss:$16 sps:$4 sm:$0xff]   ;;  %v3085_v0 = vld [vmem:[%s3802_s14 + $0x8c] ss:$16 sps:$4 sm:$0xff]  }
  0x7f   : > { %3015 = vmatpush3.msra.mxu0 %v619_v51  ;;  %3041 = vmatprep.subr.mxu1 %v619_v51  ;;  %v609_v1 = vld [vmem:[%s4094_s1 + $0x28] sm:$0xff]  ;;  %v3080_v2 = vld [vmem:[%s3802_s14 + $0x80] ss:$16 sps:$4 sm:$0xff]   ;;  %v3088_v4 = vld [vmem:[%s3802_s14 + $0x64] ss:$16 sps:$4 sm:$0xff]  }
  0x80   : > { %3016 = vmatprep.subr.mxu0 %v618_v52  ;;  %3045 = vmatpush3.msra.mxu1 %v619_v51  ;;  %v3083_v5 = vld [vmem:[%s3802_s14 + $0x88] ss:$16 sps:$4 sm:$0xff]   ;;  %v3091_v6 = vld [vmem:[%s3802_s14 + $0x6c] ss:$16 sps:$4 sm:$0xff]   ;;  %v3086_v8 = vld [vmem:[%s3802_s14 + $0x60] ss:$16 sps:$4 sm:$0xff]  }
  0x81   : > { %3017 = vmatpush3.msra.mxu0 %v618_v52  ;;  %3042 = vmatprep.subr.mxu1 %v618_v52  ;;  %v611_v7 = vld [vmem:[%s4094_s1 + $0x38] sm:$0xff]  ;;  %v612_v9 = vld [vmem:[%s4094_s1 + $0x40] sm:$0xff]  ;;  %v613_v15 = vld [vmem:[%s4094_s1 + $0x48] sm:$0xff] }
  0x82   : > { %3019 = vmatmul.mubr.msk.f32.vlgmr.msra.gmra.mxu0 %vm622_vm0, %v605_v53  ;;  %3046 = vmatpush3.msra.mxu1 %v618_v52  ;;  %v3089_v10 = vld [vmem:[%s3802_s14 + $0x68] ss:$16 sps:$4 sm:$0xff]   ;;  %v3094_v11 = vld [vmem:[%s3802_s14 + $0x44] ss:$16 sps:$4 sm:$0xff]   ;;  %v3092_v12 = vld [vmem:[%s3802_s14 + $0x40] ss:$16 sps:$4 sm:$0xff]  }
  0x83   : > { %3021 = vmatprep.mubr.msk.f32.mxu0 %vm622_vm0, %v606_v54  ;;  %3036 = vmatprep.mubr.msk.f32.mxu1 %vm622_vm0, %v616_v55  ;;  %v3097_v13 = vld [vmem:[%s3802_s14 + $0x4c] ss:$16 sps:$4 sm:$0xff]   ;;  %v3100_v14 = vld [vmem:[%s3802_s14 + $0x24] ss:$16 sps:$4 sm:$0xff]   ;;  %v3095_v16 = vld [vmem:[%s3802_s14 + $0x48] ss:$16 sps:$4 sm:$0xff]  }
  0x84   : > { %3037 = vmatmul.mubr.msk.f32.vlgmr.msra.gmra.mxu1 %vm622_vm0, %v617_v56  ;;  %967 = vmatprep.subr.bf16.mxu1 %v3076_v57  ;;  %v614_v17 = vld [vmem:[%s4094_s1 + $0x50] sm:$0xff]  ;;  %v3103_v18 = vld [vmem:[%s3802_s14 + $0x2c] ss:$16 sps:$4 sm:$0xff]   ;;  %v3101_v21 = vld [vmem:[%s3802_s14 + $0x28] ss:$16 sps:$4 sm:$0xff]  }
  0x85   : > { %1010 = vmatprep.subr.bf16.mxu0 %v3079_v60  ;;  %968 = vmatpush1.bf16.msra.mxu1 %v3074_v59  ;;  %v3098_v19 = vld [vmem:[%s3802_s14 + $0x20] ss:$16 sps:$4 sm:$0xff]   ;;  %v615_v20 = vld [vmem:[%s4094_s1 + $0x58] sm:$0xff]  ;;  %v3106_v22 = vld [vmem:[%s3802_s14 + $0x4] ss:$16 sps:$4 sm:$0xff]  }
  0x86   : > { %3022 = vmatmul.mubr.msk.f32.gmra.mxu0 %vm622_vm0, %v607_v58  ;;  %969 = vmatprep.subr.bf16.mxu1 %v3082_v62  ;;  %v3109_v23 = vld [vmem:[%s3802_s14 + $0xc] ss:$16 sps:$4 sm:$0xff]   ;;  %v3104_v24 = vld [vmem:[%s3802_s14] ss:$16 sps:$4 sm:$0xff]   ;;  %v3107_v25 = vld [vmem:[%s3802_s14 + $0x8] ss:$16 sps:$4 sm:$0xff]  }
  0x87   : > { %3024 = vmatprep.mubr.msk.f32.mxu0 %vm622_vm0, %v608_v61  ;;  %1011 = vmatpush1.bf16.msra.mxu0 %v3077_v63  ;;  %v3112_v26 = vld [vmem:[%s3802_s14 + $0x164] ss:$16 sps:$4 sm:$0xff]   ;;  %v3115_v27 = vld [vmem:[%s3802_s14 + $0x16c] ss:$16 sps:$4 sm:$0xff]   ;;  %v3110_v31 = vld [vmem:[%s3802_s14 + $0x160] ss:$16 sps:$4 sm:$0xff]  }
  0x88   : > { %1012 = vmatprep.subr.bf16.mxu0 %v3085_v0  ;;  %995 = vmatprep.mubr.bf16.mxu1 %v3350_v28  ;;  %v3113_v32 = vld [vmem:[%s3802_s14 + $0x168] ss:$16 sps:$4 sm:$0xff]   ;;  %v3118_v34 = vld [vmem:[%s3802_s14 + $0x144] ss:$16 sps:$4 sm:$0xff]   ;;  %v3121_v35 = vld [vmem:[%s3802_s14 + $0x14c] ss:$16 sps:$4 sm:$0xff]  }
  0x89   : > { %970 = vmatpush1.bf16.msra.mxu1 %v3080_v2  ;;  %v3116_v36 = vld [vmem:[%s3802_s14 + $0x140] ss:$16 sps:$4 sm:$0xff]   ;;  %v3119_v37 = vld [vmem:[%s3802_s14 + $0x148] ss:$16 sps:$4 sm:$0xff]   ;;  %v3124_v38 = vld [vmem:[%s3802_s14 + $0x124] ss:$16 sps:$4 sm:$0xff]  }
  0x8a   : > { %3025 = vmatmul.mubr.msk.f32.gmra.mxu0 %vm622_vm0, %v609_v1  ;;  %971 = vmatprep.subr.bf16.mxu1 %v3088_v4  ;;  %v3127_v39 = vld [vmem:[%s3802_s14 + $0x12c] ss:$16 sps:$4 sm:$0xff]   ;;  %v3122_v40 = vld [vmem:[%s3802_s14 + $0x120] ss:$16 sps:$4 sm:$0xff]   ;;  %v3125_v41 = vld [vmem:[%s3802_s14 + $0x128] ss:$16 sps:$4 sm:$0xff]  }
  0x8b   : > { %3027 = vmatprep.mubr.msk.f32.mxu0 %vm622_vm0, %v610_v3  ;;  %1013 = vmatpush1.bf16.msra.mxu0 %v3083_v5  ;;  %v3130_v42 = vld [vmem:[%s3802_s14 + $0x104] ss:$16 sps:$4 sm:$0xff]   ;;  %v3133_v43 = vld [vmem:[%s3802_s14 + $0x10c] ss:$16 sps:$4 sm:$0xff]   ;;  %v3128_v44 = vld [vmem:[%s3802_s14 + $0x100] ss:$16 sps:$4 sm:$0xff]  }
  0x8c   : > { %1014 = vmatprep.subr.bf16.mxu0 %v3091_v6  ;;  %v3131_v45 = vld [vmem:[%s3802_s14 + $0x108] ss:$16 sps:$4 sm:$0xff]   ;;  %v3136_v46 = vld [vmem:[%s3802_s14 + $0xe4] ss:$16 sps:$4 sm:$0xff]   ;;  %v3139_v47 = vld [vmem:[%s3802_s14 + $0xec] ss:$16 sps:$4 sm:$0xff]  }
  0x8d   : > { %972 = vmatpush1.bf16.msra.mxu1 %v3086_v8  ;;  %v3134_v48 = vld [vmem:[%s3802_s14 + $0xe0] ss:$16 sps:$4 sm:$0xff]   ;;  %v3137_v49 = vld [vmem:[%s3802_s14 + $0xe8] ss:$16 sps:$4 sm:$0xff]   ;;  %v3142_v51 = vld [vmem:[%s3802_s14 + $0xc4] ss:$16 sps:$4 sm:$0xff]  }
  0x8e   : > { %3028 = vmatmul.mubr.msk.f32.gmra.mxu0 %vm622_vm0, %v611_v7  ;;  %973 = vmatprep.subr.bf16.mxu1 %v3094_v11  ;;  %v3145_v52 = vld [vmem:[%s3802_s14 + $0xcc] ss:$16 sps:$4 sm:$0xff]   ;;  %v3140_v54 = vld [vmem:[%s3802_s14 + $0xc0] ss:$16 sps:$4 sm:$0xff]   ;;  %v3143_v55 = vld [vmem:[%s3802_s14 + $0xc8] ss:$16 sps:$4 sm:$0xff]  }
  0x8f   : > { %3030 = vmatprep.mubr.msk.f32.mxu0 %vm622_vm0, %v612_v9  ;;  %1015 = vmatpush1.bf16.msra.mxu0 %v3089_v10  ;;  %v3148_v56 = vld [vmem:[%s3802_s14 + $0x224] ss:$16 sps:$4 sm:$0xff]   ;;  %v3151_v57 = vld [vmem:[%s3802_s14 + $0x22c] ss:$16 sps:$4 sm:$0xff]   ;;  %v3146_v59 = vld [vmem:[%s3802_s14 + $0x220] ss:$16 sps:$4 sm:$0xff]  }
  0x90   : > { %1016 = vmatprep.subr.bf16.mxu0 %v3097_v13  ;;  %v3149_v60 = vld [vmem:[%s3802_s14 + $0x228] ss:$16 sps:$4 sm:$0xff]   ;;  %v3154_v61 = vld [vmem:[%s3802_s14 + $0x204] ss:$16 sps:$4 sm:$0xff]   ;;  %v3157_v62 = vld [vmem:[%s3802_s14 + $0x20c] ss:$16 sps:$4 sm:$0xff]  }
  0x91   : > { %974 = vmatpush1.bf16.msra.mxu1 %v3092_v12  ;;  %v3152_v63 = vld [vmem:[%s3802_s14 + $0x200] ss:$16 sps:$4 sm:$0xff]   ;;  %v3155_v0 = vld [vmem:[%s3802_s14 + $0x208] ss:$16 sps:$4 sm:$0xff]   ;;  %v3160_v1 = vld [vmem:[%s3802_s14 + $0x1e4] ss:$16 sps:$4 sm:$0xff]  }
  0x92   : > { %3031 = vmatmul.mubr.msk.f32.gmra.mxu0 %vm622_vm0, %v613_v15  ;;  %975 = vmatprep.subr.bf16.mxu1 %v3100_v14  ;;  %v3163_v2 = vld [vmem:[%s3802_s14 + $0x1ec] ss:$16 sps:$4 sm:$0xff]   ;;  %v3158_v3 = vld [vmem:[%s3802_s14 + $0x1e0] ss:$16 sps:$4 sm:$0xff]   ;;  %v3161_v4 = vld [vmem:[%s3802_s14 + $0x1e8] ss:$16 sps:$4 sm:$0xff]  }
  0x93   : > { %3033 = vmatprep.mubr.msk.f32.mxu0 %vm622_vm0, %v614_v17  ;;  %1017 = vmatpush1.bf16.msra.mxu0 %v3095_v16  ;;  %v3166_v5 = vld [vmem:[%s3802_s14 + $0x1c4] ss:$16 sps:$4 sm:$0xff]   ;;  %v3169_v6 = vld [vmem:[%s3802_s14 + $0x1cc] ss:$16 sps:$4 sm:$0xff]   ;;  %v3164_v7 = vld [vmem:[%s3802_s14 + $0x1c0] ss:$16 sps:$4 sm:$0xff]  }
  0x94   : > { %1018 = vmatprep.subr.bf16.mxu0 %v3103_v18  ;;  %v3167_v8 = vld [vmem:[%s3802_s14 + $0x1c8] ss:$16 sps:$4 sm:$0xff]   ;;  %v3172_v9 = vld [vmem:[%s3802_s14 + $0x1a4] ss:$16 sps:$4 sm:$0xff]   ;;  %v3175_v10 = vld [vmem:[%s3802_s14 + $0x1ac] ss:$16 sps:$4 sm:$0xff]  }
  0x95   : > { %976 = vmatpush1.bf16.msra.mxu1 %v3098_v19  ;;  %v3170_v11 = vld [vmem:[%s3802_s14 + $0x1a0] ss:$16 sps:$4 sm:$0xff]   ;;  %v3173_v12 = vld [vmem:[%s3802_s14 + $0x1a8] ss:$16 sps:$4 sm:$0xff]   ;;  %v3178_v14 = vld [vmem:[%s3802_s14 + $0x184] ss:$16 sps:$4 sm:$0xff]  }
  0x96   : > { %3034 = vmatmul.mubr.msk.f32.gmra.mxu0 %vm622_vm0, %v615_v20  ;;  %977 = vmatprep.subr.bf16.mxu1 %v3106_v22  ;;  %v3181_v15 = vld [vmem:[%s3802_s14 + $0x18c] ss:$16 sps:$4 sm:$0xff]   ;;  %v3176_v17 = vld [vmem:[%s3802_s14 + $0x180] ss:$16 sps:$4 sm:$0xff]   ;;  %v3179_v18 = vld [vmem:[%s3802_s14 + $0x188] ss:$16 sps:$4 sm:$0xff]  }
  0x97   : > { %1019 = vmatpush1.bf16.msra.mxu0 %v3101_v21  ;;  %1038 = vmatprep.mubr.bf16.mxu0 %v3350_v28  ;;  %v3184_v19 = vld [vmem:[%s3802_s14 + $0x2e4] ss:$16 sps:$4 sm:$0xff]   ;;  %v3187_v20 = vld [vmem:[%s3802_s14 + $0x2ec] ss:$16 sps:$4 sm:$0xff]   ;;  %v3182_v22 = vld [vmem:[%s3802_s14 + $0x2e0] ss:$16 sps:$4 sm:$0xff]  }
  0x98   : > { %1020 = vmatprep.subr.bf16.mxu0 %v3109_v23  ;;  %v3185_v23 = vld [vmem:[%s3802_s14 + $0x2e8] ss:$16 sps:$4 sm:$0xff]  }
  0x99   : > { %978 = vmatpush1.bf16.msra.mxu1 %v3104_v24  ;;  %v3190_v24 = vld [vmem:[%s3802_s14 + $0x2c4] ss:$16 sps:$4 sm:$0xff]  }
  0x9a   : > { %1209 = vmatprep.subr.bf16.mxu1 %v3112_v26  ;;  %v3188_v26 = vld [vmem:[%s3802_s14 + $0x2c0] ss:$16 sps:$4 sm:$0xff]  }
  0x9b   : > { %1021 = vmatpush1.bf16.msra.mxu0 %v3107_v25  ;;  %v3193_v25 = vld [vmem:[%s3802_s14 + $0x2cc] ss:$16 sps:$4 sm:$0xff]  }
  0x9c   : > { %1252 = vmatprep.subr.bf16.mxu0 %v3115_v27  ;;  %v3191_v27 = vld [vmem:[%s3802_s14 + $0x2c8] ss:$16 sps:$4 sm:$0xff]  }
 0x142   : > { %v3020_v29 = vpop.f32.mrf.mxu0 }
 0x144   : > { %v731_v30 = vpop.f32.mrf.mxu0 }
 0x145   : > { %v800_v33 = vpack.c.bf16 %v3020_v29, %v731_v30  ;;  %v3196_v29 = vld [vmem:[%s3802_s14 + $0x2a4] ss:$16 sps:$4 sm:$0xff]   ;;  %v3199_v30 = vld [vmem:[%s3802_s14 + $0x2ac] ss:$16 sps:$4 sm:$0xff]  }
 0x146   : > { %v3023_v50 = vpop.f32.mrf.mxu0 }
 0x147   : > { %2682 = vmatmul.mubr.msk.bf16.vlgmr.msra.gmra.mxu1 %vm959_vm1, %v800_v33  ;;  %2683 = vmatmul.mubr.msk.bf16.vlgmr.msra.gmra.mxu0 %vm959_vm1, %v800_v33  ;;  %v3202_v33 = vld [vmem:[%s3802_s14 + $0x284] ss:$16 sps:$4 sm:$0xff]  }
 0x148   : > { %1210 = vmatpush1.bf16.msra.mxu1 %v3110_v31  ;;  %1253 = vmatpush1.bf16.msra.mxu0 %v3113_v32  ;;  %v741_v53 = vpop.f32.mrf.mxu0  ;;  %v3194_v31 = vld [vmem:[%s3802_s14 + $0x2a0] ss:$16 sps:$4 sm:$0xff]   ;;  %v3197_v32 = vld [vmem:[%s3802_s14 + $0x2a8] ss:$16 sps:$4 sm:$0xff]  }
 0x149   : > { %1211 = vmatprep.subr.bf16.mxu1 %v3118_v34  ;;  %1254 = vmatprep.subr.bf16.mxu0 %v3121_v35  ;;  %v801_v58 = vpack.c.bf16 %v3023_v50, %v741_v53  ;;  %v3205_v34 = vld [vmem:[%s3802_s14 + $0x28c] ss:$16 sps:$4 sm:$0xff]   ;;  %v3200_v35 = vld [vmem:[%s3802_s14 + $0x280] ss:$16 sps:$4 sm:$0xff]  }
 0x14a   : > { %1237 = vmatprep.mubr.bf16.mxu1 %v3350_v28  ;;  %1280 = vmatprep.mubr.bf16.mxu0 %v3350_v28  ;;  %v3026_v13 = vpop.f32.mrf.mxu0  ;;  %v3218_v50 = vld [vmem:[%s3802_s14 + $0x3a0] ss:$16 sps:$4 sm:$0xff]   ;;  %v3229_v53 = vld [vmem:[%s3802_s14 + $0x38c] ss:$16 sps:$4 sm:$0xff]  }
 0x14c   : > { %1212 = vmatpush1.bf16.msra.mxu1 %v3116_v36  ;;  %1255 = vmatpush1.bf16.msra.mxu0 %v3119_v37  ;;  %v751_v16 = vpop.f32.mrf.mxu0  ;;  %v3203_v36 = vld [vmem:[%s3802_s14 + $0x288] ss:$16 sps:$4 sm:$0xff]   ;;  %v3208_v37 = vld [vmem:[%s3802_s14 + $0x264] ss:$16 sps:$4 sm:$0xff]  }
 0x14d   : > { %1213 = vmatprep.subr.bf16.mxu1 %v3124_v38  ;;  %1256 = vmatprep.subr.bf16.mxu0 %v3127_v39  ;;  %v802_v21 = vpack.c.bf16 %v3026_v13, %v751_v16  ;;  %v3211_v38 = vld [vmem:[%s3802_s14 + $0x26c] ss:$16 sps:$4 sm:$0xff]   ;;  %v3206_v39 = vld [vmem:[%s3802_s14 + $0x260] ss:$16 sps:$4 sm:$0xff]  }
 0x14e   : > { %v3254_v13 = vld [vmem:[%s3802_s14 + $0x460] ss:$16 sps:$4 sm:$0xff]   ;;  %v3265_v16 = vld [vmem:[%s3802_s14 + $0x44c] ss:$16 sps:$4 sm:$0xff]  }
 0x150   : > { %1214 = vmatpush1.bf16.msra.mxu1 %v3122_v40  ;;  %1257 = vmatpush1.bf16.msra.mxu0 %v3125_v41  ;;  %v3209_v40 = vld [vmem:[%s3802_s14 + $0x268] ss:$16 sps:$4 sm:$0xff]   ;;  %v3029_v41 = vpop.f32.mrf.mxu0 }
 0x151   : > { %1215 = vmatprep.subr.bf16.mxu1 %v3130_v42  ;;  %1258 = vmatprep.subr.bf16.mxu0 %v3133_v43  ;;  %v3214_v42 = vld [vmem:[%s3802_s14 + $0x244] ss:$16 sps:$4 sm:$0xff]   ;;  %v3217_v43 = vld [vmem:[%s3802_s14 + $0x24c] ss:$16 sps:$4 sm:$0xff]  }
 0x154   : > { %1216 = vmatpush1.bf16.msra.mxu1 %v3128_v44  ;;  %1259 = vmatpush1.bf16.msra.mxu0 %v3131_v45  ;;  %v761_v44 = vpop.f32.mrf.mxu0  ;;  %v3212_v45 = vld [vmem:[%s3802_s14 + $0x240] ss:$16 sps:$4 sm:$0xff]  }
 0x155   : > { %1217 = vmatprep.subr.bf16.mxu1 %v3136_v46  ;;  %1260 = vmatprep.subr.bf16.mxu0 %v3139_v47  ;;  %v3215_v46 = vld [vmem:[%s3802_s14 + $0x248] ss:$16 sps:$4 sm:$0xff]   ;;  %v3220_v47 = vld [vmem:[%s3802_s14 + $0x3a4] ss:$16 sps:$4 sm:$0xff]  }
 0x158   : > { %1218 = vmatpush1.bf16.msra.mxu1 %v3134_v48  ;;  %1261 = vmatpush1.bf16.msra.mxu0 %v3137_v49  ;;  %v3223_v48 = vld [vmem:[%s3802_s14 + $0x3ac] ss:$16 sps:$4 sm:$0xff]   ;;  %v803_v49 = vpack.c.bf16 %v3029_v41, %v761_v44  ;;  %v3290_v41 = vld [vmem:[%s3802_s14 + $0x520] ss:$16 sps:$4 sm:$0xff]  }
 0x159   : > { %1219 = vmatprep.subr.bf16.mxu1 %v3142_v51  ;;  %1262 = vmatprep.subr.bf16.mxu0 %v3145_v52  ;;  %v3221_v51 = vld [vmem:[%s3802_s14 + $0x3a8] ss:$16 sps:$4 sm:$0xff]   ;;  %v3226_v52 = vld [vmem:[%s3802_s14 + $0x384] ss:$16 sps:$4 sm:$0xff]   ;;  %v3301_v44 = vld [vmem:[%s3802_s14 + $0x50c] ss:$16 sps:$4 sm:$0xff]  }
 0x15c   : > { %1220 = vmatpush1.bf16.msra.mxu1 %v3140_v54  ;;  %1263 = vmatpush1.bf16.msra.mxu0 %v3143_v55  ;;  %v3224_v54 = vld [vmem:[%s3802_s14 + $0x380] ss:$16 sps:$4 sm:$0xff]   ;;  %v3227_v55 = vld [vmem:[%s3802_s14 + $0x388] ss:$16 sps:$4 sm:$0xff]  }
 0x15d   : > { %1451 = vmatprep.subr.bf16.mxu1 %v3148_v56  ;;  %1494 = vmatprep.subr.bf16.mxu0 %v3151_v57  ;;  %v3232_v56 = vld [vmem:[%s3802_s14 + $0x364] ss:$16 sps:$4 sm:$0xff]   ;;  %v3235_v57 = vld [vmem:[%s3802_s14 + $0x36c] ss:$16 sps:$4 sm:$0xff]  }
 0x15f   : > { %2732 = vmatmul.mubr.msk.bf16.vlgmr.msra.gmra.mxu1 %vm959_vm1, %v801_v58  ;;  %2733 = vmatmul.mubr.msk.bf16.vlgmr.msra.gmra.mxu0 %vm959_vm1, %v801_v58  ;;  %v3230_v58 = vld [vmem:[%s3802_s14 + $0x360] ss:$16 sps:$4 sm:$0xff]  }
 0x160   : > { %1452 = vmatpush1.bf16.msra.mxu1 %v3146_v59  ;;  %1495 = vmatpush1.bf16.msra.mxu0 %v3149_v60  ;;  %v3233_v59 = vld [vmem:[%s3802_s14 + $0x368] ss:$16 sps:$4 sm:$0xff]   ;;  %v3238_v60 = vld [vmem:[%s3802_s14 + $0x344] ss:$16 sps:$4 sm:$0xff]  }
 0x161   : > { %1453 = vmatprep.subr.bf16.mxu1 %v3154_v61  ;;  %1496 = vmatprep.subr.bf16.mxu0 %v3157_v62  ;;  %v3241_v61 = vld [vmem:[%s3802_s14 + $0x34c] ss:$16 sps:$4 sm:$0xff]   ;;  %v3236_v62 = vld [vmem:[%s3802_s14 + $0x340] ss:$16 sps:$4 sm:$0xff]  }
 0x162   : > { %1479 = vmatprep.mubr.bf16.mxu1 %v3350_v28  ;;  %1522 = vmatprep.mubr.bf16.mxu0 %v3350_v28 }
 0x164   : > { %1454 = vmatpush1.bf16.msra.mxu1 %v3152_v63  ;;  %1497 = vmatpush1.bf16.msra.mxu0 %v3155_v0  ;;  %v3239_v63 = vld [vmem:[%s3802_s14 + $0x348] ss:$16 sps:$4 sm:$0xff]   ;;  %v3244_v0 = vld [vmem:[%s3802_s14 + $0x324] ss:$16 sps:$4 sm:$0xff]  }
 0x165   : > { %1455 = vmatprep.subr.bf16.mxu1 %v3160_v1  ;;  %1498 = vmatprep.subr.bf16.mxu0 %v3163_v2  ;;  %v3247_v1 = vld [vmem:[%s3802_s14 + $0x32c] ss:$16 sps:$4 sm:$0xff]   ;;  %v3242_v2 = vld [vmem:[%s3802_s14 + $0x320] ss:$16 sps:$4 sm:$0xff]  }
 0x168   : > { %1456 = vmatpush1.bf16.msra.mxu1 %v3158_v3  ;;  %1499 = vmatpush1.bf16.msra.mxu0 %v3161_v4  ;;  %v3245_v3 = vld [vmem:[%s3802_s14 + $0x328] ss:$16 sps:$4 sm:$0xff]   ;;  %v3032_v4 = vpop.f32.mrf.mxu0 }
 0x169   : > { %1457 = vmatprep.subr.bf16.mxu1 %v3166_v5  ;;  %1500 = vmatprep.subr.bf16.mxu0 %v3169_v6  ;;  %v3250_v5 = vld [vmem:[%s3802_s14 + $0x304] ss:$16 sps:$4 sm:$0xff]   ;;  %v3253_v6 = vld [vmem:[%s3802_s14 + $0x30c] ss:$16 sps:$4 sm:$0xff]  }
 0x16c   : > { %1458 = vmatpush1.bf16.msra.mxu1 %v3164_v7  ;;  %1501 = vmatpush1.bf16.msra.mxu0 %v3167_v8  ;;  %v771_v7 = vpop.f32.mrf.mxu0  ;;  %v3248_v8 = vld [vmem:[%s3802_s14 + $0x300] ss:$16 sps:$4 sm:$0xff]  }
 0x16d   : > { %1459 = vmatprep.subr.bf16.mxu1 %v3172_v9  ;;  %1502 = vmatprep.subr.bf16.mxu0 %v3175_v10  ;;  %v3251_v9 = vld [vmem:[%s3802_s14 + $0x308] ss:$16 sps:$4 sm:$0xff]   ;;  %v3256_v10 = vld [vmem:[%s3802_s14 + $0x464] ss:$16 sps:$4 sm:$0xff]  }
 0x170   : > { %1460 = vmatpush1.bf16.msra.mxu1 %v3170_v11  ;;  %1503 = vmatpush1.bf16.msra.mxu0 %v3173_v12  ;;  %v3259_v11 = vld [vmem:[%s3802_s14 + $0x46c] ss:$16 sps:$4 sm:$0xff]   ;;  %v804_v12 = vpack.c.bf16 %v3032_v4, %v771_v7 }
 0x171   : > { %1461 = vmatprep.subr.bf16.mxu1 %v3178_v14  ;;  %1504 = vmatprep.subr.bf16.mxu0 %v3181_v15  ;;  %v3257_v14 = vld [vmem:[%s3802_s14 + $0x468] ss:$16 sps:$4 sm:$0xff]   ;;  %v3262_v15 = vld [vmem:[%s3802_s14 + $0x444] ss:$16 sps:$4 sm:$0xff]  }
 0x174   : > { %1462 = vmatpush1.bf16.msra.mxu1 %v3176_v17  ;;  %1505 = vmatpush1.bf16.msra.mxu0 %v3179_v18  ;;  %v3260_v17 = vld [vmem:[%s3802_s14 + $0x440] ss:$16 sps:$4 sm:$0xff]   ;;  %v3263_v18 = vld [vmem:[%s3802_s14 + $0x448] ss:$16 sps:$4 sm:$0xff]  }
 0x175   : > { %1693 = vmatprep.subr.bf16.mxu1 %v3184_v19  ;;  %1736 = vmatprep.subr.bf16.mxu0 %v3187_v20  ;;  %v3268_v19 = vld [vmem:[%s3802_s14 + $0x424] ss:$16 sps:$4 sm:$0xff]   ;;  %v3271_v20 = vld [vmem:[%s3802_s14 + $0x42c] ss:$16 sps:$4 sm:$0xff]  }
 0x177   : > { %2782 = vmatmul.mubr.msk.bf16.vlgmr.msra.gmra.mxu1 %vm959_vm1, %v802_v21  ;;  %2783 = vmatmul.mubr.msk.bf16.vlgmr.msra.gmra.mxu0 %vm959_vm1, %v802_v21  ;;  %v3266_v21 = vld [vmem:[%s3802_s14 + $0x420] ss:$16 sps:$4 sm:$0xff]  }
 0x178   : > { %1694 = vmatpush1.bf16.msra.mxu1 %v3182_v22  ;;  %1737 = vmatpush1.bf16.msra.mxu0 %v3185_v23  ;;  %v3269_v22 = vld [vmem:[%s3802_s14 + $0x428] ss:$16 sps:$4 sm:$0xff]   ;;  %v3274_v23 = vld [vmem:[%s3802_s14 + $0x404] ss:$16 sps:$4 sm:$0xff]  }
 0x179   : > { %1695 = vmatprep.subr.bf16.mxu1 %v3190_v24  ;;  %1738 = vmatprep.subr.bf16.mxu0 %v3193_v25  ;;  %v3277_v24 = vld [vmem:[%s3802_s14 + $0x40c] ss:$16 sps:$4 sm:$0xff]   ;;  %v3272_v25 = vld [vmem:[%s3802_s14 + $0x400] ss:$16 sps:$4 sm:$0xff]  }
 0x17a   : > { %1721 = vmatprep.mubr.bf16.mxu1 %v3350_v28  ;;  %1764 = vmatprep.mubr.bf16.mxu0 %v3350_v28 }
 0x17c   : > { %1696 = vmatpush1.bf16.msra.mxu1 %v3188_v26  ;;  %1739 = vmatpush1.bf16.msra.mxu0 %v3191_v27  ;;  %v3275_v26 = vld [vmem:[%s3802_s14 + $0x408] ss:$16 sps:$4 sm:$0xff]   ;;  %v3280_v27 = vld [vmem:[%s3802_s14 + $0x3e4] ss:$16 sps:$4 sm:$0xff]  }
 0x17d   : > { %1697 = vmatprep.subr.bf16.mxu1 %v3196_v29  ;;  %1740 = vmatprep.subr.bf16.mxu0 %v3199_v30  ;;  %v3283_v29 = vld [vmem:[%s3802_s14 + $0x3ec] ss:$16 sps:$4 sm:$0xff]   ;;  %v3278_v30 = vld [vmem:[%s3802_s14 + $0x3e0] ss:$16 sps:$4 sm:$0xff]  }
 0x180   : > { %1698 = vmatpush1.bf16.msra.mxu1 %v3194_v31  ;;  %1741 = vmatpush1.bf16.msra.mxu0 %v3197_v32  ;;  %v3281_v31 = vld [vmem:[%s3802_s14 + $0x3e8] ss:$16 sps:$4 sm:$0xff]   ;;  %v3035_v32 = vpop.f32.mrf.mxu0 }
 0x181   : > { %1699 = vmatprep.subr.bf16.mxu1 %v3202_v33  ;;  %1742 = vmatprep.subr.bf16.mxu0 %v3205_v34  ;;  %v3286_v33 = vld [vmem:[%s3802_s14 + $0x3c4] ss:$16 sps:$4 sm:$0xff]   ;;  %v3289_v34 = vld [vmem:[%s3802_s14 + $0x3cc] ss:$16 sps:$4 sm:$0xff]  }
 0x184   : > { %1700 = vmatpush1.bf16.msra.mxu1 %v3200_v35  ;;  %1743 = vmatpush1.bf16.msra.mxu0 %v3203_v36  ;;  %v781_v35 = vpop.f32.mrf.mxu0  ;;  %v3284_v36 = vld [vmem:[%s3802_s14 + $0x3c0] ss:$16 sps:$4 sm:$0xff]  }
 0x185   : > { %1701 = vmatprep.subr.bf16.mxu1 %v3208_v37  ;;  %1744 = vmatprep.subr.bf16.mxu0 %v3211_v38  ;;  %v3287_v37 = vld [vmem:[%s3802_s14 + $0x3c8] ss:$16 sps:$4 sm:$0xff]   ;;  %v3292_v38 = vld [vmem:[%s3802_s14 + $0x524] ss:$16 sps:$4 sm:$0xff]  }
 0x188   : > { %1702 = vmatpush1.bf16.msra.mxu1 %v3206_v39  ;;  %1745 = vmatpush1.bf16.msra.mxu0 %v3209_v40  ;;  %v3295_v39 = vld [vmem:[%s3802_s14 + $0x52c] ss:$16 sps:$4 sm:$0xff]   ;;  %v805_v40 = vpack.c.bf16 %v3035_v32, %v781_v35 }
 0x189   : > { %1703 = vmatprep.subr.bf16.mxu1 %v3214_v42  ;;  %1746 = vmatprep.subr.bf16.mxu0 %v3217_v43  ;;  %v3293_v42 = vld [vmem:[%s3802_s14 + $0x528] ss:$16 sps:$4 sm:$0xff]   ;;  %v3298_v43 = vld [vmem:[%s3802_s14 + $0x504] ss:$16 sps:$4 sm:$0xff]  }
 0x18c   : > { %1704 = vmatpush1.bf16.msra.mxu1 %v3212_v45  ;;  %1747 = vmatpush1.bf16.msra.mxu0 %v3215_v46  ;;  %v3296_v45 = vld [vmem:[%s3802_s14 + $0x500] ss:$16 sps:$4 sm:$0xff]   ;;  %v3299_v46 = vld [vmem:[%s3802_s14 + $0x508] ss:$16 sps:$4 sm:$0xff]  }
 0x18d   : > { %1935 = vmatprep.subr.bf16.mxu1 %v3220_v47  ;;  %1978 = vmatprep.subr.bf16.mxu0 %v3223_v48  ;;  %v3304_v47 = vld [vmem:[%s3802_s14 + $0x4e4] ss:$16 sps:$4 sm:$0xff]   ;;  %v3307_v48 = vld [vmem:[%s3802_s14 + $0x4ec] ss:$16 sps:$4 sm:$0xff]  }
 0x18f   : > { %2832 = vmatmul.mubr.msk.bf16.vlgmr.msra.gmra.mxu1 %vm959_vm1, %v803_v49  ;;  %2833 = vmatmul.mubr.msk.bf16.vlgmr.msra.gmra.mxu0 %vm959_vm1, %v803_v49  ;;  %v3302_v49 = vld [vmem:[%s3802_s14 + $0x4e0] ss:$16 sps:$4 sm:$0xff]  }
 0x190   : > { %1936 = vmatpush1.bf16.msra.mxu1 %v3218_v50  ;;  %1979 = vmatpush1.bf16.msra.mxu0 %v3221_v51  ;;  %v3305_v50 = vld [vmem:[%s3802_s14 + $0x4e8] ss:$16 sps:$4 sm:$0xff]   ;;  %v3310_v51 = vld [vmem:[%s3802_s14 + $0x4c4] ss:$16 sps:$4 sm:$0xff]  }
 0x191   : > { %1937 = vmatprep.subr.bf16.mxu1 %v3226_v52  ;;  %1980 = vmatprep.subr.bf16.mxu0 %v3229_v53  ;;  %v3313_v52 = vld [vmem:[%s3802_s14 + $0x4cc] ss:$16 sps:$4 sm:$0xff]   ;;  %v3308_v53 = vld [vmem:[%s3802_s14 + $0x4c0] ss:$16 sps:$4 sm:$0xff]  }
 0x192   : > { %1963 = vmatprep.mubr.bf16.mxu1 %v3350_v28  ;;  %2006 = vmatprep.mubr.bf16.mxu0 %v3350_v28 }
 0x194   : > { %1938 = vmatpush1.bf16.msra.mxu1 %v3224_v54  ;;  %1981 = vmatpush1.bf16.msra.mxu0 %v3227_v55  ;;  %v3311_v54 = vld [vmem:[%s3802_s14 + $0x4c8] ss:$16 sps:$4 sm:$0xff]   ;;  %v3319_v55 = vld [vmem:[%s3802_s14 + $0x4ac] ss:$16 sps:$4 sm:$0xff]  }
 0x195   : > { %1939 = vmatprep.subr.bf16.mxu1 %v3232_v56  ;;  %1982 = vmatprep.subr.bf16.mxu0 %v3235_v57  ;;  %v3314_v56 = vld [vmem:[%s3802_s14 + $0x4a0] ss:$16 sps:$4 sm:$0xff]   ;;  %v3317_v57 = vld [vmem:[%s3802_s14 + $0x4a8] ss:$16 sps:$4 sm:$0xff]  }
 0x198   : > { %1940 = vmatpush1.bf16.msra.mxu1 %v3230_v58  ;;  %1983 = vmatpush1.bf16.msra.mxu0 %v3233_v59  ;;  %v3322_v58 = vld [vmem:[%s3802_s14 + $0x484] ss:$16 sps:$4 sm:$0xff]   ;;  %v3325_v59 = vld [vmem:[%s3802_s14 + $0x48c] ss:$16 sps:$4 sm:$0xff]  }
 0x199   : > { %1941 = vmatprep.subr.bf16.mxu1 %v3238_v60  ;;  %1984 = vmatprep.subr.bf16.mxu0 %v3241_v61  ;;  %v3038_v60 = vpop.f32.mrf.mxu1  ;;  %v3320_v61 = vld [vmem:[%s3802_s14 + $0x480] ss:$16 sps:$4 sm:$0xff]  }
 0x19c   : > { %1942 = vmatpush1.bf16.msra.mxu1 %v3236_v62  ;;  %1985 = vmatpush1.bf16.msra.mxu0 %v3239_v63  ;;  %v3323_v62 = vld [vmem:[%s3802_s14 + $0x488] ss:$16 sps:$4 sm:$0xff]   ;;  %v791_v63 = vpop.f32.mrf.mxu1 }
 0x19d   : > { %1943 = vmatprep.subr.bf16.mxu1 %v3244_v0  ;;  %1986 = vmatprep.subr.bf16.mxu0 %v3247_v1  ;;  %v806_v0 = vpack.c.bf16 %v3038_v60, %v791_v63 }
 0x1a0   : > { %1944 = vmatpush1.bf16.msra.mxu1 %v3242_v2  ;;  %1987 = vmatpush1.bf16.msra.mxu0 %v3245_v3 }
 0x1a1   : > { %1945 = vmatprep.subr.bf16.mxu1 %v3250_v5  ;;  %1988 = vmatprep.subr.bf16.mxu0 %v3253_v6 }
 0x1a4   : > { %1946 = vmatpush1.bf16.msra.mxu1 %v3248_v8  ;;  %1989 = vmatpush1.bf16.msra.mxu0 %v3251_v9 }
 0x1a5   : > { %2177 = vmatprep.subr.bf16.mxu1 %v3256_v10  ;;  %2220 = vmatprep.subr.bf16.mxu0 %v3259_v11 }
 0x1a7   : > { %2882 = vmatmul.mubr.msk.bf16.vlgmr.msra.gmra.mxu1 %vm959_vm1, %v804_v12  ;;  %2883 = vmatmul.mubr.msk.bf16.vlgmr.msra.gmra.mxu0 %vm959_vm1, %v804_v12 }
 0x1a8   : > { %2178 = vmatpush1.bf16.msra.mxu1 %v3254_v13  ;;  %2221 = vmatpush1.bf16.msra.mxu0 %v3257_v14 }
 0x1a9   : > { %2179 = vmatprep.subr.bf16.mxu1 %v3262_v15  ;;  %2222 = vmatprep.subr.bf16.mxu0 %v3265_v16 }
 0x1aa   : > { %2205 = vmatprep.mubr.bf16.mxu1 %v3350_v28  ;;  %2248 = vmatprep.mubr.bf16.mxu0 %v3350_v28 }
 0x1ac   : > { %2180 = vmatpush1.bf16.msra.mxu1 %v3260_v17  ;;  %2223 = vmatpush1.bf16.msra.mxu0 %v3263_v18 }
 0x1ad   : > { %2181 = vmatprep.subr.bf16.mxu1 %v3268_v19  ;;  %2224 = vmatprep.subr.bf16.mxu0 %v3271_v20 }
 0x1b0   : > { %2182 = vmatpush1.bf16.msra.mxu1 %v3266_v21  ;;  %2225 = vmatpush1.bf16.msra.mxu0 %v3269_v22 }
 0x1b1   : > { %2183 = vmatprep.subr.bf16.mxu1 %v3274_v23  ;;  %2226 = vmatprep.subr.bf16.mxu0 %v3277_v24 }
 0x1b4   : > { %2184 = vmatpush1.bf16.msra.mxu1 %v3272_v25  ;;  %2227 = vmatpush1.bf16.msra.mxu0 %v3275_v26 }
 0x1b5   : > { %2185 = vmatprep.subr.bf16.mxu1 %v3280_v27  ;;  %2228 = vmatprep.subr.bf16.mxu0 %v3283_v29 }
 0x1b8   : > { %2186 = vmatpush1.bf16.msra.mxu1 %v3278_v30  ;;  %2229 = vmatpush1.bf16.msra.mxu0 %v3281_v31 }
 0x1b9   : > { %2187 = vmatprep.subr.bf16.mxu1 %v3286_v33  ;;  %2230 = vmatprep.subr.bf16.mxu0 %v3289_v34 }
 0x1bc   : > { %2188 = vmatpush1.bf16.msra.mxu1 %v3284_v36  ;;  %2231 = vmatpush1.bf16.msra.mxu0 %v3287_v37 }
 0x1bd   : > { %2419 = vmatprep.subr.bf16.mxu1 %v3292_v38  ;;  %2462 = vmatprep.subr.bf16.mxu0 %v3295_v39 }
 0x1bf   : > { %2932 = vmatmul.mubr.msk.bf16.vlgmr.msra.gmra.mxu1 %vm959_vm1, %v805_v40  ;;  %2933 = vmatmul.mubr.msk.bf16.vlgmr.msra.gmra.mxu0 %vm959_vm1, %v805_v40 }
 0x1c0   : > { %2420 = vmatpush1.bf16.msra.mxu1 %v3290_v41  ;;  %2463 = vmatpush1.bf16.msra.mxu0 %v3293_v42 }
 0x1c1   : > { %2421 = vmatprep.subr.bf16.mxu1 %v3298_v43  ;;  %2464 = vmatprep.subr.bf16.mxu0 %v3301_v44 }
 0x1c2   : > { %2447 = vmatprep.mubr.bf16.mxu1 %v3350_v28  ;;  %2490 = vmatprep.mubr.bf16.mxu0 %v3350_v28  ;;  %v3316_v28 = vld [vmem:[%s3802_s14 + $0x4a4] ss:$16 sps:$4 sm:$0xff]   ;;  %s4046_s14 = sshll.u32 %s565_s23, 6  ;;  %s2991_s23 = sshll.u32 (%p3410_p5), %s2632_s18, 5 }
 0x1c3   : > { %s574_s21 = scalar_lea.vmem [#allocation3], %s4046_s14  ;;  %s4058_s15 = scalar_lea.vmem [#allocation4], %s4046_s14 }
 0x1c4   : > { %2422 = vmatpush1.bf16.msra.mxu1 %v3296_v45  ;;  %2465 = vmatpush1.bf16.msra.mxu0 %v3299_v46  ;;  %v807_v42 = vld [vmem:[%s574_s21] sm:$0xff]  ;;  %v809_v43 = vld [vmem:[%s574_s21 + $0x10] sm:$0xff]  ;;  %v808_v46 = vld [vmem:[%s574_s21 + $0x8] sm:$0xff]  ;;  %s2526_s27 = scalar_lea.vmem (%p3410_p5), %s4097_s4, %s2991_s23 }
 0x1c5   : > { %2423 = vmatprep.subr.bf16.mxu1 %v3304_v47  ;;  %2466 = vmatprep.subr.bf16.mxu0 %v3307_v48  ;;  %v810_v47 = vld [vmem:[%s574_s21 + $0x18] sm:$0xff] }
 0x1c8   : > { %2424 = vmatpush1.bf16.msra.mxu1 %v3302_v49  ;;  %2467 = vmatpush1.bf16.msra.mxu0 %v3305_v50  ;;  %v811_v50 = vld [vmem:[%s574_s21 + $0x20] sm:$0xff] }
 0x1c9   : > { %2425 = vmatprep.subr.bf16.mxu1 %v3310_v51  ;;  %2468 = vmatprep.subr.bf16.mxu0 %v3313_v52  ;;  %v813_v51 = vld [vmem:[%s574_s21 + $0x30] sm:$0xff] }
 0x1cc   : > { %2426 = vmatpush1.bf16.msra.mxu1 %v3308_v53  ;;  %2469 = vmatpush1.bf16.msra.mxu0 %v3311_v54 }
 0x1cd   : > { %2427 = vmatprep.subr.bf16.mxu1 %v3316_v28  ;;  %2470 = vmatprep.subr.bf16.mxu0 %v3319_v55  ;;  %v812_v55 = vld [vmem:[%s574_s21 + $0x28] sm:$0xff] }
 0x1d0   : > { %2428 = vmatpush1.bf16.msra.mxu1 %v3314_v56  ;;  %2471 = vmatpush1.bf16.msra.mxu0 %v3317_v57  ;;  %v814_v56 = vld [vmem:[%s574_s21 + $0x38] sm:$0xff] }
 0x1d1   : > { %2429 = vmatprep.subr.bf16.mxu1 %v3322_v58  ;;  %2472 = vmatprep.subr.bf16.mxu0 %v3325_v59 }
 0x1d4   : > { %2430 = vmatpush1.bf16.msra.mxu1 %v3320_v61  ;;  %2473 = vmatpush1.bf16.msra.mxu0 %v3323_v62 }
 0x1d7   : > { %2982 = vmatmul.mubr.msk.bf16.vlgmr.msra.gmra.mxu1 %vm959_vm1, %v806_v0  ;;  %2983 = vmatmul.mubr.msk.bf16.vlgmr.msra.gmra.mxu0 %vm959_vm1, %v806_v0 }
 0x207   : > { %v997_v1 = vpop.f32.mrf.mxu1  ;;  %v1040_v2 = vpop.f32.mrf.mxu0 }
 0x208   : > { %v1049_v48 = vadd.f32 %v997_v1, %v807_v42  ;;  %v1051_v49 = vadd.f32 %v1040_v2, %v809_v43 }
 0x209   : > { %v999_v3 = vpop.f32.mrf.mxu1  ;;  %v1042_v4 = vpop.f32.mrf.mxu0 }
 0x20a   : > { %v1050_v54 = vadd.f32 %v999_v3, %v808_v46  ;;  %v1052_v28 = vadd.f32 %v1042_v4, %v810_v47 }
 0x20b   : > { %v1001_v5 = vpop.f32.mrf.mxu1  ;;  %v1044_v6 = vpop.f32.mrf.mxu0 }
 0x20c   : > { %v1053_v59 = vadd.f32 %v1001_v5, %v811_v50  ;;  %v1055_v60 = vadd.f32 %v1044_v6, %v813_v51 }
 0x20d   : > { %v1003_v7 = vpop.f32.mrf.mxu1  ;;  %v1046_v8 = vpop.f32.mrf.mxu0 }
 0x21f   : > { %v1239_v9 = vpop.f32.mrf.mxu1  ;;  %v1282_v10 = vpop.f32.mrf.mxu0 }
 0x220   : > { %v1291_v57 = vadd.f32 %v1239_v9, %v1049_v48  ;;  %v1293_v58 = vadd.f32 %v1282_v10, %v1051_v49 }
 0x221   : > { %v1241_v11 = vpop.f32.mrf.mxu1  ;;  %v1284_v12 = vpop.f32.mrf.mxu0 }
 0x222   : > { %v1292_v61 = vadd.f32 %v1241_v11, %v1050_v54  ;;  %v1294_v62 = vadd.f32 %v1284_v12, %v1052_v28 }
 0x223   : > { %v1243_v13 = vpop.f32.mrf.mxu1  ;;  %v1286_v14 = vpop.f32.mrf.mxu0 }
 0x224   : > { %v1295_v1 = vadd.f32 %v1243_v13, %v1053_v59  ;;  %v1297_v2 = vadd.f32 %v1286_v14, %v1055_v60 }
 0x225   : > { %v1245_v15 = vpop.f32.mrf.mxu1  ;;  %v1288_v16 = vpop.f32.mrf.mxu0 }
 0x237   : > { %v1481_v17 = vpop.f32.mrf.mxu1  ;;  %v1524_v18 = vpop.f32.mrf.mxu0 }
 0x238   : > { %v1533_v63 = vadd.f32 %v1481_v17, %v1291_v57  ;;  %v1535_v0 = vadd.f32 %v1524_v18, %v1293_v58 }
 0x239   : > { %v1483_v19 = vpop.f32.mrf.mxu1  ;;  %v1526_v20 = vpop.f32.mrf.mxu0 }
 0x23b   : > { %v1485_v21 = vpop.f32.mrf.mxu1  ;;  %v1528_v22 = vpop.f32.mrf.mxu0 }
 0x23c   : > { %v1537_v9 = vadd.f32 %v1485_v21, %v1295_v1  ;;  %v1539_v10 = vadd.f32 %v1528_v22, %v1297_v2 }
 0x23d   : > { %v1487_v23 = vpop.f32.mrf.mxu1  ;;  %v1530_v24 = vpop.f32.mrf.mxu0 }
 0x24f   : > { %v1723_v25 = vpop.f32.mrf.mxu1  ;;  %v1766_v26 = vpop.f32.mrf.mxu0 }
 0x250   : > { %v1775_v3 = vadd.f32 %v1723_v25, %v1533_v63  ;;  %v1777_v4 = vadd.f32 %v1766_v26, %v1535_v0 }
 0x251   : > { %v1725_v27 = vpop.f32.mrf.mxu1  ;;  %v1768_v29 = vpop.f32.mrf.mxu0 }
 0x253   : > { %v1727_v30 = vpop.f32.mrf.mxu1  ;;  %v1770_v31 = vpop.f32.mrf.mxu0 }
 0x255   : > { %v4040_v32 = vpop.f32.mrf.mxu1  ;;  %v4042_v33 = vpop.f32.mrf.mxu0 }
 0x256   : > { %4100 = vst [vmem:[#allocation5_spill] sm:$0xff] %v4040_v32  ;;  %4101 = vst [vmem:[#allocation6_spill] sm:$0xff] %v4042_v33  ;;  %v1534_v33 = vadd.f32 %v1483_v19, %v1292_v61  ;;  %v1536_v32 = vadd.f32 %v1526_v20, %v1294_v62 }
 0x258   : > { %v1776_v5 = vadd.f32 %v1725_v27, %v1534_v33  ;;  %v1778_v6 = vadd.f32 %v1768_v29, %v1536_v32 }
 0x25d   : > { %v4104_v25 = vld [vmem:[#allocation5_spill] sm:$0xff] }
 0x267   : > { %v1965_v34 = vpop.f32.mrf.mxu1  ;;  %v2008_v35 = vpop.f32.mrf.mxu0 }
 0x268   : > { %v2017_v11 = vadd.f32 %v1965_v34, %v1775_v3  ;;  %v2019_v12 = vadd.f32 %v2008_v35, %v1777_v4 }
 0x269   : > { %v1967_v36 = vpop.f32.mrf.mxu1  ;;  %v2010_v37 = vpop.f32.mrf.mxu0 }
 0x26a   : > { %v2018_v48 = vadd.f32 %v1967_v36, %v1776_v5  ;;  %v2020_v49 = vadd.f32 %v2010_v37, %v1778_v6 }
 0x26b   : > { %v1969_v38 = vpop.f32.mrf.mxu1  ;;  %v2012_v39 = vpop.f32.mrf.mxu0 }
 0x26d   : > { %v4048_v40 = vpop.f32.mrf.mxu1  ;;  %v4050_v41 = vpop.f32.mrf.mxu0 }
 0x26e   : > { %4102 = vst [vmem:[#allocation7_spill] sm:$0xff] %v4048_v40  ;;  %4103 = vst [vmem:[#allocation8_spill] sm:$0xff] %v4050_v41  ;;  %v1054_v41 = vadd.f32 %v1003_v7, %v812_v55  ;;  %v1056_v40 = vadd.f32 %v1046_v8, %v814_v56  ;;  %v1779_v7 = vadd.f32 %v1727_v30, %v1537_v9 }
 0x26f   : > { %v1781_v8 = vadd.f32 %v1770_v31, %v1539_v10 }
 0x270   : > { %v1296_v46 = vadd.f32 %v1245_v15, %v1054_v41  ;;  %v1298_v47 = vadd.f32 %v1288_v16, %v1056_v40  ;;  %v4105_v15 = vld [vmem:[#allocation6_spill] sm:$0xff]  ;;  %v2021_v21 = vadd.f32 %v1969_v38, %v1779_v7 }
 0x271   : > { %v2023_v22 = vadd.f32 %v2012_v39, %v1781_v8 }
 0x272   : > { %v1538_v17 = vadd.f32 %v1487_v23, %v1296_v46  ;;  %v1540_v18 = vadd.f32 %v1530_v24, %v1298_v47 }
 0x274   : > { %v1780_v26 = vadd.f32 %v4104_v25, %v1538_v17  ;;  %v1782_v16 = vadd.f32 %v4105_v15, %v1540_v18 }
 0x275   : > { %v4106_v31 = vld [vmem:[#allocation7_spill] sm:$0xff]  ;;  %v4107_v34 = vld [vmem:[#allocation8_spill] sm:$0xff] }
 0x276   : > { %v2022_v33 = vadd.f32 %v4106_v31, %v1780_v26  ;;  %v2024_v35 = vadd.f32 %v4107_v34, %v1782_v16 }
 0x27f   : > { %v2207_v44 = vpop.f32.mrf.mxu1  ;;  %v2250_v45 = vpop.f32.mrf.mxu0 }
 0x280   : > { %v2259_v19 = vadd.f32 %v2207_v44, %v2017_v11  ;;  %v2261_v20 = vadd.f32 %v2250_v45, %v2019_v12 }
 0x281   : > { %v2209_v52 = vpop.f32.mrf.mxu1  ;;  %v2252_v53 = vpop.f32.mrf.mxu0 }
 0x282   : > { %v2260_v32 = vadd.f32 %v2209_v52, %v2018_v48  ;;  %v2262_v23 = vadd.f32 %v2252_v53, %v2020_v49 }
 0x283   : > { %v2211_v42 = vpop.f32.mrf.mxu1  ;;  %v2254_v43 = vpop.f32.mrf.mxu0 }
 0x284   : > { %v2263_v40 = vadd.f32 %v2211_v42, %v2021_v21  ;;  %v2265_v41 = vadd.f32 %v2254_v43, %v2023_v22 }
 0x285   : > { %v2213_v13 = vpop.f32.mrf.mxu1  ;;  %v2256_v14 = vpop.f32.mrf.mxu0 }
 0x286   : > { %v2264_v50 = vadd.f32 %v2213_v13, %v2022_v33  ;;  %v2266_v51 = vadd.f32 %v2256_v14, %v2024_v35 }
 0x297   : > { %v2449_v27 = vpop.f32.mrf.mxu1  ;;  %v2492_v29 = vpop.f32.mrf.mxu0 }
 0x298   : > { %v2501_v24 = vadd.f32 %v2449_v27, %v2259_v19  ;;  %v2503_v30 = vadd.f32 %v2492_v29, %v2261_v20 }
 0x299   : > { %v2451_v36 = vpop.f32.mrf.mxu1  ;;  %v2494_v37 = vpop.f32.mrf.mxu0 }
 0x29a   : > { %2509 = vst [vmem:[%s4058_s15] sm:$0xff] %v2501_v24  ;;  %2511 = vst [vmem:[%s4058_s15 + $0x10] sm:$0xff] %v2503_v30  ;;  %v2502_v38 = vadd.f32 %v2451_v36, %v2260_v32  ;;  %v2504_v39 = vadd.f32 %v2494_v37, %v2262_v23 }
 0x29b   : > { %v2453_v44 = vpop.f32.mrf.mxu1  ;;  %v2496_v45 = vpop.f32.mrf.mxu0 }
 0x29c   : > { %2510 = vst [vmem:[%s4058_s15 + $0x8] sm:$0xff] %v2502_v38  ;;  %2512 = vst [vmem:[%s4058_s15 + $0x18] sm:$0xff] %v2504_v39  ;;  %v2505_v52 = vadd.f32 %v2453_v44, %v2263_v40  ;;  %v2507_v53 = vadd.f32 %v2496_v45, %v2265_v41  ;;  %2523 = sbr.rel (!%p3410_p5) target bundleno = 681 (0x2a9), region = 86 }
 0x29d   : > { %v2455_v54 = vpop.f32.mrf.mxu1  ;;  %v2498_v28 = vpop.f32.mrf.mxu0 }
 0x29e   : > { %2513 = vst [vmem:[%s4058_s15 + $0x20] sm:$0xff] %v2505_v52  ;;  %2515 = vst [vmem:[%s4058_s15 + $0x30] sm:$0xff] %v2507_v53  ;;  %v2506_v55 = vadd.f32 %v2455_v54, %v2264_v50  ;;  %v2508_v56 = vadd.f32 %v2498_v28, %v2266_v51 }
 0x2a0   : > { %2514 = vst [vmem:[%s4058_s15 + $0x28] sm:$0xff] %v2506_v55  ;;  %2516 = vst [vmem:[%s4058_s15 + $0x38] sm:$0xff] %v2508_v56 }
 0x2a1   : > { %v2539_v57 = vld [vmem:[%s4058_s15] sm:$0xff]  ;;  %v2543_v59 = vld [vmem:[%s4058_s15 + $0x10] sm:$0xff] }
 0x2a2   : > { %2540 = vst [vmem:[%s2526_s27] sm:$0xff] %v2539_v57  ;;  %2544 = vst [vmem:[%s2526_s27 + $0x10] sm:$0xff] %v2543_v59 }
 0x2a3   : > { %v2541_v58 = vld [vmem:[%s4058_s15 + $0x8] sm:$0xff]  ;;  %v2545_v60 = vld [vmem:[%s4058_s15 + $0x18] sm:$0xff] }
 0x2a4   : > { %2542 = vst [vmem:[%s2526_s27 + $0x8] sm:$0xff] %v2541_v58  ;;  %2546 = vst [vmem:[%s2526_s27 + $0x18] sm:$0xff] %v2545_v60 }
 0x2a5   : > { %v2547_v61 = vld [vmem:[%s4058_s15 + $0x20] sm:$0xff]  ;;  %v2551_v63 = vld [vmem:[%s4058_s15 + $0x30] sm:$0xff] }
 0x2a6   : > { %2548 = vst [vmem:[%s2526_s27 + $0x60] sm:$0xff] %v2547_v61  ;;  %2552 = vst [vmem:[%s2526_s27 + $0x70] sm:$0xff] %v2551_v63 }
 0x2a7   : > { %v2549_v62 = vld [vmem:[%s4058_s15 + $0x28] sm:$0xff]  ;;  %v2553_v0 = vld [vmem:[%s4058_s15 + $0x38] sm:$0xff] }
 0x2a8   : > { %2550 = vst [vmem:[%s2526_s27 + $0x68] sm:$0xff] %v2549_v62  ;;  %2554 = vst [vmem:[%s2526_s27 + $0x78] sm:$0xff] %v2553_v0 }
 0x2a9 PF: > { %p11_p10 = scmp.ge.s32.totalorder %s3393_s19, 5   ;;  %s4108_s15 = smov %s3344_s16 }
 0x2aa   : > { %s4109_s16 = smov %s3404_s22  ;;  %s4110_s17 = smov %s3393_s19 }
 0x2ab   :  { %13 = sbr.rel (!%p11_p10) target bundleno = 2 (0x2), region = 154 }

</bundles_post_ra>
